<compile_context>
chip_gen: v7x
topology: tpu7x:2x2x1
jax: 0.10.0
libtpu: 0.0.40
codegen_flags: <defaults>
</compile_context>

<pallas_src>
import math
import jax
import jax.numpy as jnp
from jax.experimental import pallas as pl
from jax.experimental.pallas import tpu as pltpu

d_model = 96
len_c = 384


def pointer_kernel(m1_ref, m2_ref, m3_ref, wst_ref,
                   wl1t_ref, bl1_ref, wl2t_ref, bl2_ref,
                   p1_ref, p2_ref):
    # wst rows: [w1[:C], w1[C:], w2[:C], w2[C:]], each shaped (1, C, 1).
    w = wst_ref[...]                   # (4, C, 1)
    m1 = m1_ref[...]                   # (tb, C, L)
    m2 = m2_ref[...]
    m3 = m3_ref[...]

    # Stage 1 (VPU multiply + cross-sublane reduce over C):
    #   Y[b, l] = sum_c w[c] * M[b, c, l]
    y1 = (jnp.sum(m1 * w[0:1], axis=1)
          + jnp.sum(m2 * w[1:2], axis=1))          # (tb, L)
    y2 = (jnp.sum(m1 * w[2:3], axis=1)
          + jnp.sum(m3 * w[3:4], axis=1))          # (tb, L)

    # Stage 2 (MXU): the two Linear layers; weights pre-transposed (L_in, L_out).
    p1_ref[...] = (jnp.dot(y1, wl1t_ref[...], preferred_element_type=jnp.float32)
                   + bl1_ref[...])
    p2_ref[...] = (jnp.dot(y2, wl2t_ref[...], preferred_element_type=jnp.float32)
                   + bl2_ref[...])


def _pick_batch_tile(B):
    """Batch tile: no padding for small B; {8,16,24} multiples-of-8 otherwise."""
    if B <= 8:
        return B  # single grid step, zero padded reads
    def score(c):
        pad = (-B) % c
        steps = (B + pad) // c
        # minimise padded rows, then prefer >=2 grid steps (v7x megacore),
        # then the largest tile (fewer per-step overheads, fuller MXU LHS).
        return (pad, 0 if steps >= 2 else 1, -c)
    return min((8, 16, 24), key=score)


def pointer_forward(M1, M2, M3, mask, params, *, tb=None):
    """mask is accepted for signature fidelity but does not affect (p1, p2)."""
    del mask
    w1, w2, Wl1, bl1, Wl2, bl2 = params
    B, C, L = M1.shape

    if tb is None:
        tb = _pick_batch_tile(B)
    B_pad = -(-B // tb) * tb
    if B_pad != B:
        # Padded rows produce bias-only garbage that is sliced off below.
        pad = ((0, B_pad - B), (0, 0), (0, 0))
        M1 = jnp.pad(M1, pad)
        M2 = jnp.pad(M2, pad)
        M3 = jnp.pad(M3, pad)

    # Stage-1 weight stack, O(C) bytes (no O(tb^2) kron replication):
    #   row 0: w1[:C] (for M1 -> Y1)   row 1: w1[C:] (for M2 -> Y1)
    #   row 2: w2[:C] (for M1 -> Y2)   row 3: w2[C:] (for M3 -> Y2)
    wst = jnp.stack([w1[:C], w1[C:], w2[:C], w2[C:]], axis=0).reshape(4, C, 1)
    wst = wst.astype(jnp.float32)

    wl1t = Wl1.T                       # (L_in, L_out)
    wl2t = Wl2.T
    bl1_2d = bl1.reshape(1, L)
    bl2_2d = bl2.reshape(1, L)

    m_spec = pl.BlockSpec((tb, C, L), lambda b: (b, 0, 0))
    wst_spec = pl.BlockSpec((4, C, 1), lambda b: (0, 0, 0))
    w_mat_spec = pl.BlockSpec((L, L), lambda b: (0, 0))
    b_spec = pl.BlockSpec((1, L), lambda b: (0, 0))
    out_spec = pl.BlockSpec((tb, L), lambda b: (b, 0))

    # VMEM budget (bytes): double-buffered M blocks + resident Linear weights
    # + headroom for spilled stage-1 (tb, C, L) intermediates + misc scratch.
    m_blk = tb * C * L * 4
    vmem_limit = (2 * 3 * m_blk
                  + 2 * 2 * L * L * 4
                  + 4 * m_blk
                  + (6 << 20))
    vmem_limit = max(32 << 20, min(vmem_limit, 56 << 20))  # <= v7x 64 MiB phys

    p1, p2 = pl.pallas_call(
        pointer_kernel,
        out_shape=(jax.ShapeDtypeStruct((B_pad, L), jnp.float32),
                   jax.ShapeDtypeStruct((B_pad, L), jnp.float32)),
        grid_spec=pltpu.PrefetchScalarGridSpec(
            num_scalar_prefetch=0,
            grid=(B_pad // tb,),
            in_specs=[m_spec, m_spec, m_spec,
                      wst_spec, w_mat_spec, b_spec, w_mat_spec, b_spec],
            out_specs=[out_spec, out_spec],
        ),
        compiler_params=pltpu.CompilerParams(
            dimension_semantics=("parallel",),
            vmem_limit_bytes=vmem_limit),
    )(M1, M2, M3, wst, wl1t, bl1_2d, wl2t, bl2_2d)

    return p1[:B], p2[:B]


def init_params(key):
    """Deterministic parameter init mirroring the PyTorch __init__ shapes."""
    k1, k2, k3, k4, k5, k6 = jax.random.split(key, 6)
    lim = math.sqrt(3.0 / (2.0 * d_model))
    w1 = jax.random.uniform(k1, (2 * d_model,), jnp.float32, -lim, lim)
    w2 = jax.random.uniform(k2, (2 * d_model,), jnp.float32, -lim, lim)
    # nn.Linear default init: U(-1/sqrt(in), 1/sqrt(in)) for weight and bias.
    lin_lim = 1.0 / math.sqrt(len_c)
    Wl1 = jax.random.uniform(k3, (len_c, len_c), jnp.float32, -lin_lim, lin_lim)
    bl1 = jax.random.uniform(k4, (len_c,), jnp.float32, -lin_lim, lin_lim)
    Wl2 = jax.random.uniform(k5, (len_c, len_c), jnp.float32, -lin_lim, lin_lim)
    bl2 = jax.random.uniform(k6, (len_c,), jnp.float32, -lin_lim, lin_lim)
    return (w1, w2, Wl1, bl1, Wl2, bl2)


def reference_forward(M1, M2, M3, mask, params):
    del mask
    w1, w2, Wl1, bl1, Wl2, bl2 = params
    X1 = jnp.concatenate([M1, M2], axis=1)   # (B, 2C, L)
    X2 = jnp.concatenate([M1, M3], axis=1)
    Y1 = jnp.einsum('c,bcl->bl', w1, X1)
    Y2 = jnp.einsum('c,bcl->bl', w2, X2)
    p1 = Y1 @ Wl1.T + bl1
    p2 = Y2 @ Wl2.T + bl2
    return p1, p2


if __name__ == "__main__":
    key = jax.random.PRNGKey(0)
    kp, km1, km2, km3, kmask = jax.random.split(key, 5)

    B = 2
    params = init_params(kp)
    M1 = jax.random.normal(km1, (B, d_model, len_c), jnp.float32)
    M2 = jax.random.normal(km2, (B, d_model, len_c), jnp.float32)
    M3 = jax.random.normal(km3, (B, d_model, len_c), jnp.float32)
    mask = (jax.random.uniform(kmask, (B, len_c)) > 0.8).astype(jnp.float32)

    p1, p2 = pointer_forward(M1, M2, M3, mask, params)
    jax.block_until_ready((p1, p2))

    r1, r2 = reference_forward(M1, M2, M3, mask, params)
    assert p1.shape == r1.shape and p2.shape == r2.shape
    assert jnp.allclose(p1, r1, rtol=1e-4, atol=1e-4), "p1 mismatch"
    assert jnp.allclose(p2, r2, rtol=1e-4, atol=1e-4), "p2 mismatch"

    print("KERNEL_OK")
</pallas_src>

<mosaic_0001>
module attributes {stable_mosaic.version = 11 : i64} {
  func.func @pointer_kernel(%arg0: i32, %arg1: memref<2x96x384xf32, #tpu.memory_space<vmem>>, %arg2: memref<2x96x384xf32, #tpu.memory_space<vmem>>, %arg3: memref<2x96x384xf32, #tpu.memory_space<vmem>>, %arg4: memref<4x96x1xf32, #tpu.memory_space<vmem>>, %arg5: memref<384x384xf32, #tpu.memory_space<vmem>>, %arg6: memref<1x384xf32, #tpu.memory_space<vmem>>, %arg7: memref<384x384xf32, #tpu.memory_space<vmem>>, %arg8: memref<1x384xf32, #tpu.memory_space<vmem>>, %arg9: memref<2x384xf32, #tpu.memory_space<vmem>>, %arg10: memref<2x384xf32, #tpu.memory_space<vmem>>) attributes {dimension_semantics = [#tpu.dimension_semantics<parallel>], iteration_bounds = array<i64: 1>, scalar_prefetch = 0 : i64, scratch_operands = 0 : i64, tpu.core_type = #tpu.core_type<tc>, window_params = [{transform_indices = @transform_0, window_bounds = array<i64: 2, 96, 384>}, {transform_indices = @transform_1, window_bounds = array<i64: 2, 96, 384>}, {transform_indices = @transform_2, window_bounds = array<i64: 2, 96, 384>}, {pipeline_mode = #tpu.pipeline_mode<synchronous>, transform_indices = @transform_3, window_bounds = array<i64: 4, 96, 1>}, {pipeline_mode = #tpu.pipeline_mode<synchronous>, transform_indices = @transform_4, window_bounds = array<i64: 384, 384>}, {pipeline_mode = #tpu.pipeline_mode<synchronous>, transform_indices = @transform_5, window_bounds = array<i64: 1, 384>}, {pipeline_mode = #tpu.pipeline_mode<synchronous>, transform_indices = @transform_6, window_bounds = array<i64: 384, 384>}, {pipeline_mode = #tpu.pipeline_mode<synchronous>, transform_indices = @transform_7, window_bounds = array<i64: 1, 384>}, {transform_indices = @transform_8, window_bounds = array<i64: 2, 384>}, {transform_indices = @transform_9, window_bounds = array<i64: 2, 384>}]} {
    %c0 = arith.constant 0 : index
    %c0_0 = arith.constant 0 : index
    %c0_1 = arith.constant 0 : index
    %0 = vector.load %arg4[%c0, %c0_0, %c0_1] : memref<4x96x1xf32, #tpu.memory_space<vmem>>, vector<4x96x1xf32>
    %c0_2 = arith.constant 0 : index
    %c0_3 = arith.constant 0 : index
    %c0_4 = arith.constant 0 : index
    %1 = vector.load %arg1[%c0_2, %c0_3, %c0_4] : memref<2x96x384xf32, #tpu.memory_space<vmem>>, vector<2x96x384xf32>
    %c0_5 = arith.constant 0 : index
    %c0_6 = arith.constant 0 : index
    %c0_7 = arith.constant 0 : index
    %2 = vector.load %arg2[%c0_5, %c0_6, %c0_7] : memref<2x96x384xf32, #tpu.memory_space<vmem>>, vector<2x96x384xf32>
    %c0_8 = arith.constant 0 : index
    %c0_9 = arith.constant 0 : index
    %c0_10 = arith.constant 0 : index
    %3 = vector.load %arg3[%c0_8, %c0_9, %c0_10] : memref<2x96x384xf32, #tpu.memory_space<vmem>>, vector<2x96x384xf32>
    %4 = vector.extract_strided_slice %0 {offsets = [0, 0, 0], sizes = [1, 96, 1], strides = [1, 1, 1]} : vector<4x96x1xf32> to vector<1x96x1xf32>
    %5 = vector.broadcast %4 : vector<1x96x1xf32> to vector<2x96x384xf32>
    %6 = arith.mulf %1, %5 : vector<2x96x384xf32>
    %cst = arith.constant dense<0.000000e+00> : vector<2x384xf32>
    %7 = vector.multi_reduction <add>, %6, %cst [1] : vector<2x96x384xf32> to vector<2x384xf32>
    %8 = vector.extract_strided_slice %0 {offsets = [1, 0, 0], sizes = [1, 96, 1], strides = [1, 1, 1]} : vector<4x96x1xf32> to vector<1x96x1xf32>
    %9 = vector.broadcast %8 : vector<1x96x1xf32> to vector<2x96x384xf32>
    %10 = arith.mulf %2, %9 : vector<2x96x384xf32>
    %cst_11 = arith.constant dense<0.000000e+00> : vector<2x384xf32>
    %11 = vector.multi_reduction <add>, %10, %cst_11 [1] : vector<2x96x384xf32> to vector<2x384xf32>
    %12 = arith.addf %7, %11 : vector<2x384xf32>
    %13 = vector.extract_strided_slice %0 {offsets = [2, 0, 0], sizes = [1, 96, 1], strides = [1, 1, 1]} : vector<4x96x1xf32> to vector<1x96x1xf32>
    %14 = vector.broadcast %13 : vector<1x96x1xf32> to vector<2x96x384xf32>
    %15 = arith.mulf %1, %14 : vector<2x96x384xf32>
    %cst_12 = arith.constant dense<0.000000e+00> : vector<2x384xf32>
    %16 = vector.multi_reduction <add>, %15, %cst_12 [1] : vector<2x96x384xf32> to vector<2x384xf32>
    %17 = vector.extract_strided_slice %0 {offsets = [3, 0, 0], sizes = [1, 96, 1], strides = [1, 1, 1]} : vector<4x96x1xf32> to vector<1x96x1xf32>
    %18 = vector.broadcast %17 : vector<1x96x1xf32> to vector<2x96x384xf32>
    %19 = arith.mulf %3, %18 : vector<2x96x384xf32>
    %cst_13 = arith.constant dense<0.000000e+00> : vector<2x384xf32>
    %20 = vector.multi_reduction <add>, %19, %cst_13 [1] : vector<2x96x384xf32> to vector<2x384xf32>
    %21 = arith.addf %16, %20 : vector<2x384xf32>
    %c0_14 = arith.constant 0 : index
    %c0_15 = arith.constant 0 : index
    %22 = vector.load %arg5[%c0_14, %c0_15] : memref<384x384xf32, #tpu.memory_space<vmem>>, vector<384x384xf32>
    %cst_16 = arith.constant dense<0.000000e+00> : vector<2x384xf32>
    %23 = tpu.matmul %12, %22, %cst_16 {dimension_numbers = #tpu.dot_dimension_numbers<[1], [0], [0], [1], [0, 0, 1, 1], [], []>} : vector<2x384xf32>, vector<384x384xf32>, vector<2x384xf32> -> vector<2x384xf32>
    %c0_17 = arith.constant 0 : index
    %c0_18 = arith.constant 0 : index
    %24 = vector.load %arg6[%c0_17, %c0_18] : memref<1x384xf32, #tpu.memory_space<vmem>>, vector<1x384xf32>
    %25 = vector.broadcast %24 : vector<1x384xf32> to vector<2x384xf32>
    %26 = arith.addf %23, %25 : vector<2x384xf32>
    %c0_19 = arith.constant 0 : index
    %c0_20 = arith.constant 0 : index
    %27 = vector.load %arg9[%c0_19, %c0_20] : memref<2x384xf32, #tpu.memory_space<vmem>>, vector<2x384xf32>
    tpu.vector_store %arg9[%c0_19, %c0_20], %26 {strides = array<i32>} : memref<2x384xf32, #tpu.memory_space<vmem>>, vector<2x384xf32>,
    %c0_21 = arith.constant 0 : index
    %c0_22 = arith.constant 0 : index
    %28 = vector.load %arg7[%c0_21, %c0_22] : memref<384x384xf32, #tpu.memory_space<vmem>>, vector<384x384xf32>
    %cst_23 = arith.constant dense<0.000000e+00> : vector<2x384xf32>
    %29 = tpu.matmul %21, %28, %cst_23 {dimension_numbers = #tpu.dot_dimension_numbers<[1], [0], [0], [1], [0, 0, 1, 1], [], []>} : vector<2x384xf32>, vector<384x384xf32>, vector<2x384xf32> -> vector<2x384xf32>
    %c0_24 = arith.constant 0 : index
    %c0_25 = arith.constant 0 : index
    %30 = vector.load %arg8[%c0_24, %c0_25] : memref<1x384xf32, #tpu.memory_space<vmem>>, vector<1x384xf32>
    %31 = vector.broadcast %30 : vector<1x384xf32> to vector<2x384xf32>
    %32 = arith.addf %29, %31 : vector<2x384xf32>
    %c0_26 = arith.constant 0 : index
    %c0_27 = arith.constant 0 : index
    %33 = vector.load %arg10[%c0_26, %c0_27] : memref<2x384xf32, #tpu.memory_space<vmem>>, vector<2x384xf32>
    tpu.vector_store %arg10[%c0_26, %c0_27], %32 {strides = array<i32>} : memref<2x384xf32, #tpu.memory_space<vmem>>, vector<2x384xf32>,
    return
  }
  func.func @transform_0(%arg0: i32) -> (i32, i32, i32) {
    %c0_i32 = arith.constant 0 : i32
    %c0_i32_0 = arith.constant 0 : i32
    %c0_i32_1 = arith.constant 0 : i32
    return %arg0, %c0_i32, %c0_i32_0 : i32, i32, i32
  }
  func.func @transform_1(%arg0: i32) -> (i32, i32, i32) {
    %c0_i32 = arith.constant 0 : i32
    %c0_i32_0 = arith.constant 0 : i32
    %c0_i32_1 = arith.constant 0 : i32
    return %arg0, %c0_i32, %c0_i32_0 : i32, i32, i32
  }
  func.func @transform_2(%arg0: i32) -> (i32, i32, i32) {
    %c0_i32 = arith.constant 0 : i32
    %c0_i32_0 = arith.constant 0 : i32
    %c0_i32_1 = arith.constant 0 : i32
    return %arg0, %c0_i32, %c0_i32_0 : i32, i32, i32
  }
  func.func @transform_3(%arg0: i32) -> (i32, i32, i32) {
    %c0_i32 = arith.constant 0 : i32
    %c0_i32_0 = arith.constant 0 : i32
    %c0_i32_1 = arith.constant 0 : i32
    %c0_i32_2 = arith.constant 0 : i32
    return %c0_i32, %c0_i32_0, %c0_i32_1 : i32, i32, i32
  }
  func.func @transform_4(%arg0: i32) -> (i32, i32) {
    %c0_i32 = arith.constant 0 : i32
    %c0_i32_0 = arith.constant 0 : i32
    %c0_i32_1 = arith.constant 0 : i32
    return %c0_i32, %c0_i32_0 : i32, i32
  }
  func.func @transform_5(%arg0: i32) -> (i32, i32) {
    %c0_i32 = arith.constant 0 : i32
    %c0_i32_0 = arith.constant 0 : i32
    %c0_i32_1 = arith.constant 0 : i32
    return %c0_i32, %c0_i32_0 : i32, i32
  }
  func.func @transform_6(%arg0: i32) -> (i32, i32) {
    %c0_i32 = arith.constant 0 : i32
    %c0_i32_0 = arith.constant 0 : i32
    %c0_i32_1 = arith.constant 0 : i32
    return %c0_i32, %c0_i32_0 : i32, i32
  }
  func.func @transform_7(%arg0: i32) -> (i32, i32) {
    %c0_i32 = arith.constant 0 : i32
    %c0_i32_0 = arith.constant 0 : i32
    %c0_i32_1 = arith.constant 0 : i32
    return %c0_i32, %c0_i32_0 : i32, i32
  }
  func.func @transform_8(%arg0: i32) -> (i32, i32) {
    %c0_i32 = arith.constant 0 : i32
    %c0_i32_0 = arith.constant 0 : i32
    return %arg0, %c0_i32 : i32, i32
  }
  func.func @transform_9(%arg0: i32) -> (i32, i32) {
    %c0_i32 = arith.constant 0 : i32
    %c0_i32_0 = arith.constant 0 : i32
    return %arg0, %c0_i32 : i32, i32
  }
}

</mosaic_0001>

<bundles_post_ra>
// kernel: tpu_custom_call.1
= control target key start
LH: loop header
LB: loop body
LE: loop exit
PB: predicated region body
PF: predicated region fallthrough
CT: control target
= control target key end

     0   :  { %15 = vsyncpa [#allocation3], 0  ;;  %s4144_s0 = inlined_call_operand.hbm [shape: f32[2,96,384], index: 0, kind: input, shape index: {}]   ;;  %s4145_s1 = inlined_call_operand.hbm [shape: f32[2,96,384], index: 1, kind: input, shape index: {}]   ;;  %s4146_s2 = inlined_call_operand.hbm [shape: f32[2,96,384], index: 2, kind: input, shape index: {}]   ;;  %s4147_s3 = inlined_call_operand.vmem [shape: f32[4,96,1], index: 3, kind: input, shape index: {}]   ;;  %s4148_s4 = inlined_call_operand.hbm [shape: f32[384,384], index: 4, kind: input, shape index: {}]   ;;  %s4149_s5 = inlined_call_operand.vmem [shape: f32[1,384], index: 5, kind: input, shape index: {}]   ;;  %s4150_s6 = inlined_call_operand.hbm [shape: f32[384,384], index: 6, kind: input, shape index: {}]   ;;  %s4151_s7 = inlined_call_operand.vmem [shape: f32[1,384], index: 7, kind: input, shape index: {}]   ;;  %s4152_s8 = inlined_call_operand.hbm [shape: f32[2,384], index: 8, kind: output, shape index: {0}]   ;;  %s4153_s9 = inlined_call_operand.hbm [shape: f32[2,384], index: 9, kind: output, shape index: {1}]  }
   0x1   :  { %16 = vsyncpa [#allocation6], 0 }
   0x2   :  { %17 = vsyncpa [#allocation9], 0 }
   0x3   :  { %18 = vsyncpa [#allocation4], 0 }
   0x4   :  { %19 = vsyncpa [#allocation13], 0  ;;  %s2967_s30 = smov [#allocation5]   ;;  %s2968_s11 = smov [#allocation8]  }
   0x5   :  { %s37_s10 = sshll.u32 %s2967_s30, 4  ;;  %s63_s12 = sshll.u32 %s2968_s11, 4  ;;  %s38_s10 = int_to_ptr.vmem [resolvable:$true] %s37_s10  ;;  %s3031_s12 = int_to_ptr.vmem [resolvable:$true] %s63_s12 }
   0x6   :  { %s2803_s15 = scalar_lea.hbm %s4145_s1, 9216 }
   0x7   :  { %p2804_p0 = scmp.ne.s32.totalorder %s4145_s1, %s2803_s15  ;;  %p2807_p1 = scmp.lt.u32.totalorder %s2803_s15, %s4145_s1 }
   0x9   :  { %p2809_p2 = pnand %p2807_p1, %p2804_p0 }
   0xb   :  { %2812 = shalt.err (!%p2809_p2)
}
   0xc   :  { %s2813_s20 = scalar_lea.vmem %s38_s10, 9216  ;;  %p2818_p4 = scmp.lt.s32.totalorder %s38_s10, %s38_s10 }
   0xd   :  { %p2814_p3 = scmp.ne.s32.totalorder %s38_s10, %s2813_s20  ;;  %p2819_p5 = scmp.lt.s32.totalorder %s2813_s20, %s2813_s20 }
   0xf   :  { %p2820_p6 = por %p2819_p5, %p2818_p4 }
  0x11   :  { %p2821_p7 = pnand %p2820_p6, %p2814_p3 }
  0x13   :  { %2824 = shalt.err (!%p2821_p7)
}
  0x14   :  { %s2969_s21 = smov 384   ;;  %s2970_s22 = smov 24  }
  0x15   :  { %43 = dma.hbm_to_vmem [thread:$0]  %s4145_s1, 9216, %s38_s10, [#allocation6], %s2969_s21, %s2969_s21, %s2970_s22  }
  0x16   :  { %s2825_s27 = scalar_lea.hbm %s4148_s4, 18432 }
  0x17   :  { %p2826_p8 = scmp.ne.s32.totalorder %s4148_s4, %s2825_s27  ;;  %p2829_p9 = scmp.lt.u32.totalorder %s2825_s27, %s4148_s4 }
  0x19   :  { %p2831_p10 = pnand %p2829_p9, %p2826_p8 }
  0x1b   :  { %2834 = shalt.err (!%p2831_p10)
}
  0x1c   :  { %s2835_s13 = scalar_lea.vmem %s3031_s12, 18432  ;;  %p2840_p12 = scmp.lt.s32.totalorder %s3031_s12, %s3031_s12 }
  0x1d   :  { %p2836_p11 = scmp.ne.s32.totalorder %s3031_s12, %s2835_s13  ;;  %p2841_p13 = scmp.lt.s32.totalorder %s2835_s13, %s2835_s13 }
  0x1f   :  { %p2842_p0 = por %p2841_p13, %p2840_p12 }
  0x21   :  { %p2843_p1 = pnand %p2842_p0, %p2836_p11 }
  0x23   :  { %2846 = shalt.err (!%p2843_p1)
}
  0x24   :  { %69 = dma.hbm_to_vmem [thread:$0]  %s4148_s4, 18432, %s3031_s12, [#allocation9], %s2969_s21, %s2969_s21, %s2970_s22  }
  0x25   :  { %s2971_s14 = smov [#allocation2]   ;;  %s2972_s16 = smov [#allocation7]  }
  0x26   :  { %s25_s15 = sshll.u32 %s2971_s14, 4  ;;  %s49_s17 = sshll.u32 %s2972_s16, 4  ;;  %s26_s15 = int_to_ptr.vmem [resolvable:$true] %s25_s15  ;;  %s3068_s17 = int_to_ptr.vmem [resolvable:$true] %s49_s17 }
  0x27   :  { %s2847_s20 = scalar_lea.hbm %s4144_s0, 9216 }
  0x28   :  { %p2848_p2 = scmp.ne.s32.totalorder %s4144_s0, %s2847_s20  ;;  %p2851_p3 = scmp.lt.u32.totalorder %s2847_s20, %s4144_s0 }
  0x2a   :  { %p2853_p4 = pnand %p2851_p3, %p2848_p2 }
  0x2c   :  { %2856 = shalt.err (!%p2853_p4)
}
  0x2d   :  { %s2857_s4 = scalar_lea.vmem %s26_s15, 9216  ;;  %p2862_p6 = scmp.lt.s32.totalorder %s26_s15, %s26_s15 }
  0x2e   :  { %p2858_p5 = scmp.ne.s32.totalorder %s26_s15, %s2857_s4  ;;  %p2863_p7 = scmp.lt.s32.totalorder %s2857_s4, %s2857_s4 }
  0x30   :  { %p2864_p8 = por %p2863_p7, %p2862_p6 }
  0x32   :  { %p2865_p9 = pnand %p2864_p8, %p2858_p5 }
  0x34   :  { %2868 = shalt.err (!%p2865_p9)
}
  0x35   :  { %31 = dma.hbm_to_vmem [thread:$0]  %s4144_s0, 9216, %s26_s15, [#allocation3], %s2969_s21, %s2969_s21, %s2970_s22  }
  0x36   :  { %s2869_s30 = scalar_lea.hbm %s4146_s2, 9216 }
  0x37   :  { %p2870_p10 = scmp.ne.s32.totalorder %s4146_s2, %s2869_s30  ;;  %p2873_p11 = scmp.lt.u32.totalorder %s2869_s30, %s4146_s2 }
  0x39   :  { %p2875_p12 = pnand %p2873_p11, %p2870_p10 }
  0x3b   :  { %2878 = shalt.err (!%p2875_p12)
}
  0x3c   :  { %s2879_s14 = scalar_lea.vmem %s3068_s17, 9216  ;;  %p2884_p0 = scmp.lt.s32.totalorder %s3068_s17, %s3068_s17 }
  0x3d   :  { %p2880_p13 = scmp.ne.s32.totalorder %s3068_s17, %s2879_s14  ;;  %p2885_p1 = scmp.lt.s32.totalorder %s2879_s14, %s2879_s14 }
  0x3f   :  { %p2886_p2 = por %p2885_p1, %p2884_p0 }
  0x41   :  { %p2887_p3 = pnand %p2886_p2, %p2880_p13 }
  0x43   :  { %2890 = shalt.err (!%p2887_p3)
}
  0x44   :  { %55 = dma.hbm_to_vmem [thread:$0]  %s4146_s2, 9216, %s3068_s17, [#allocation6], %s2969_s21, %s2969_s21, %s2970_s22  }
  0x45   :  { %s2973_s16 = smov [#allocation10]   ;;  %s2891_s23 = scalar_lea.hbm %s4150_s6, 18432 }
  0x46   :  { %s77_s18 = sshll.u32 %s2973_s16, 4  ;;  %p2892_p4 = scmp.ne.s32.totalorder %s4150_s6, %s2891_s23  ;;  %s78_s18 = int_to_ptr.vmem [resolvable:$true] %s77_s18 }
  0x47   :  { %p2895_p5 = scmp.lt.u32.totalorder %s2891_s23, %s4150_s6 }
  0x49   :  { %p2897_p6 = pnand %p2895_p5, %p2892_p4 }
  0x4b   :  { %2900 = shalt.err (!%p2897_p6)
}
  0x4c   :  { %s2901_s12 = scalar_lea.vmem %s78_s18, 18432  ;;  %p2906_p8 = scmp.lt.s32.totalorder %s78_s18, %s78_s18 }
  0x4d   :  { %p2902_p7 = scmp.ne.s32.totalorder %s78_s18, %s2901_s12  ;;  %p2907_p9 = scmp.lt.s32.totalorder %s2901_s12, %s2901_s12 }
  0x4f   :  { %p2908_p10 = por %p2907_p9, %p2906_p8 }
  0x51   :  { %p2909_p11 = pnand %p2908_p10, %p2902_p7 }
  0x53   :  { %2912 = shalt.err (!%p2909_p11)
}
  0x54   :  { %83 = dma.hbm_to_vmem [thread:$0]  %s4150_s6, 18432, %s78_s18, [#allocation9], %s2969_s21, %s2969_s21, %s2970_s22  }
  0x55   :  { %2957 = dma.done.wait [#allocation3], 9216  }
  0x56   :  { %2958 = vsyncadd [#allocation3], 4294958080 }
  0x57   :  { %2959 = dma.done.wait [#allocation6], 18432  }
  0x58   :  { %2960 = vsyncadd [#allocation6], 4294948864 }
  0x59   :  { %2961 = dma.done.wait [#allocation9], 36864  }
  0x5a   :  { %2962 = vsyncadd [#allocation9], 4294930432  ;;  %v2974_v0 = vmov 0   ;;  %v113_v1 = vld [vmem:[%s4147_s3 + $0x60] sm:$0xff]  ;;  %v114_v3 = vld [vmem:[%s4147_s3 + $0x68] sm:$0xff]  ;;  %vm1480_vm0 = vcmask 1041409  }
  0x5b   :  { %2798 = vset.pattern.permute.xlu1 %v2974_v0  ;;  %2797 = vset.pattern.permute.xlu0 %v2974_v0  ;;  %v101_v2 = vld [vmem:[%s4147_s3] sm:$0xff]  ;;  %v102_v4 = vld [vmem:[%s4147_s3 + $0x8] sm:$0xff]  ;;  %v115_v5 = vld [vmem:[%s4147_s3 + $0x70] sm:$0xff]  ;;  %vm2977_vm1 = vmmov 0   ;;  %s2979_s24 = smov [#allocation11]  }
  0x5c   :  { %601 = vperm.xlu1 %2798, %v113_v1   ;;  %367 = vperm.xlu0 %2797, %v101_v2   ;;  %v103_v6 = vld [vmem:[%s4147_s3 + $0x10] sm:$0xff]  ;;  %v116_v7 = vld [vmem:[%s4147_s3 + $0x78] sm:$0xff]  ;;  %v117_v9 = vld [vmem:[%s4147_s3 + $0x80] sm:$0xff] }
  0x5d   :  { %v104_v8 = vld [vmem:[%s4147_s3 + $0x18] sm:$0xff]  ;;  %v105_v10 = vld [vmem:[%s4147_s3 + $0x20] sm:$0xff]  ;;  %v1314_v11 = vld [vmem:[#allocation8 + $0x8] sm:$0xff] }
  0x5e   :  { %v1317_v12 = vld [vmem:[#allocation8 + $0x20] sm:$0xff]  ;;  %v118_v14 = vld [vmem:[%s4147_s3 + $0x88] sm:$0xff]  ;;  %v1316_v17 = vld [vmem:[#allocation8 + $0x18] sm:$0xff] }
  0x5f   :  { %v2471_v13 = vpack.c.bf16 %v1317_v12, %v1314_v11  ;;  %v106_v15 = vld [vmem:[%s4147_s3 + $0x28] sm:$0xff]  ;;  %v1313_v16 = vld [vmem:[#allocation8] sm:$0xff]  ;;  %v1320_v18 = vld [vmem:[#allocation8 + $0x38] sm:$0xff] }
  0x60   :  { %606 = vperm.xlu1 %2798, %v114_v3   ;;  %372 = vperm.xlu0 %2797, %v102_v4   ;;  %v1323_v19 = vld [vmem:[#allocation8 + $0x50] sm:$0xff]  ;;  %v2473_v22 = vpack.c.bf16 %v1316_v17, %v1313_v16  ;;  %v120_v24 = vld [vmem:[%s4147_s3 + $0x98] sm:$0xff]  ;;  %v1322_v27 = vld [vmem:[#allocation8 + $0x48] sm:$0xff] }
  0x61   :  { %2472 = vmatprep.subr.bf16.mxu0 %v2471_v13  ;;  %v119_v20 = vld [vmem:[%s4147_s3 + $0x90] sm:$0xff]  ;;  %v2475_v23 = vpack.c.bf16 %v1323_v19, %v1320_v18  ;;  %v108_v25 = vld [vmem:[%s4147_s3 + $0x38] sm:$0xff]  ;;  %v1326_v28 = vld [vmem:[#allocation8 + $0x68] sm:$0xff] }
  0x62   :  { %v107_v21 = vld [vmem:[%s4147_s3 + $0x30] sm:$0xff]  ;;  %2474 = vmatpush1.bf16.msra.mxu0 %v2473_v22  ;;  %v1329_v30 = vld [vmem:[#allocation8 + $0x80] sm:$0xff]  ;;  %v1328_v35 = vld [vmem:[#allocation8 + $0x78] sm:$0xff] }
  0x63   :  { %2476 = vmatprep.subr.bf16.mxu0 %v2475_v23  ;;  %v1319_v26 = vld [vmem:[#allocation8 + $0x30] sm:$0xff]  ;;  %v2479_v31 = vpack.c.bf16 %v1329_v30, %v1326_v28  ;;  %v121_v32 = vld [vmem:[%s4147_s3 + $0xa0] sm:$0xff]  ;;  %v1332_v37 = vld [vmem:[#allocation8 + $0x98] sm:$0xff] }
  0x64   :  { %611 = vperm.xlu1 %2798, %v115_v5   ;;  %377 = vperm.xlu0 %2797, %v103_v6   ;;  %v2477_v29 = vpack.c.bf16 %v1322_v27, %v1319_v26  ;;  %v109_v33 = vld [vmem:[%s4147_s3 + $0x40] sm:$0xff]  ;;  %v1335_v38 = vld [vmem:[#allocation8 + $0xb0] sm:$0xff]  ;;  %v122_v40 = vld [vmem:[%s4147_s3 + $0xa8] sm:$0xff] }
  0x65   :  { %v1325_v34 = vld [vmem:[#allocation8 + $0x60] sm:$0xff]  ;;  %v2483_v39 = vpack.c.bf16 %v1335_v38, %v1332_v37  ;;  %v110_v41 = vld [vmem:[%s4147_s3 + $0x48] sm:$0xff]  ;;  %v1331_v42 = vld [vmem:[#allocation8 + $0x90] sm:$0xff] }
  0x66   :  { %2478 = vmatpush1.bf16.msra.mxu0 %v2477_v29  ;;  %v2481_v36 = vpack.c.bf16 %v1328_v35, %v1325_v34  ;;  %v1334_v43 = vld [vmem:[#allocation8 + $0xa8] sm:$0xff]  ;;  %v1341_v45 = vld [vmem:[#allocation8 + $0xe0] sm:$0xff]  ;;  %v123_v46 = vld [vmem:[%s4147_s3 + $0xb0] sm:$0xff] }
  0x67   :  { %2480 = vmatprep.subr.bf16.mxu0 %v2479_v31  ;;  %v1338_v44 = vld [vmem:[#allocation8 + $0xc8] sm:$0xff]  ;;  %v111_v47 = vld [vmem:[%s4147_s3 + $0x50] sm:$0xff]  ;;  %v2485_v48 = vpack.c.bf16 %v1334_v43, %v1331_v42  ;;  %v124_v50 = vld [vmem:[%s4147_s3 + $0xb8] sm:$0xff] }
  0x68   :  { %616 = vperm.xlu1 %2798, %v116_v7   ;;  %382 = vperm.xlu0 %2797, %v104_v8   ;;  %v2487_v49 = vpack.c.bf16 %v1341_v45, %v1338_v44  ;;  %v112_v51 = vld [vmem:[%s4147_s3 + $0x58] sm:$0xff]  ;;  %v1337_v52 = vld [vmem:[#allocation8 + $0xc0] sm:$0xff]  ;;  %v1347_v56 = vld [vmem:[#allocation8 + $0x110] sm:$0xff] }
  0x69   :  { %v1340_v53 = vld [vmem:[#allocation8 + $0xd8] sm:$0xff]  ;;  %v126_v58 = vld [vmem:[%s4147_s3 + $0xc8] sm:$0xff]  ;;  %v125_v59 = vld [vmem:[%s4147_s3 + $0xc0] sm:$0xff] }
  0x6a   :  { %2482 = vmatpush1.bf16.msra.mxu0 %v2481_v36  ;;  %v1344_v54 = vld [vmem:[#allocation8 + $0xf8] sm:$0xff]  ;;  %v2489_v55 = vpack.c.bf16 %v1340_v53, %v1337_v52  ;;  %v1343_v60 = vld [vmem:[#allocation8 + $0xf0] sm:$0xff]  ;;  %v1346_v61 = vld [vmem:[#allocation8 + $0x108] sm:$0xff] }
  0x6b   :  { %2484 = vmatprep.subr.bf16.mxu0 %v2483_v39  ;;  %v2491_v57 = vpack.c.bf16 %v1347_v56, %v1344_v54  ;;  %v2493_v62 = vpack.c.bf16 %v1346_v61, %v1343_v60  ;;  %v1350_v63 = vld [vmem:[#allocation8 + $0x128] sm:$0xff]  ;;  %v1353_v0 = vld [vmem:[#allocation8 + $0x140] sm:$0xff]  ;;  %v1352_v5 = vld [vmem:[#allocation8 + $0x138] sm:$0xff] }
  0x6c   :  { %621 = vperm.xlu1 %2798, %v117_v9   ;;  %387 = vperm.xlu0 %2797, %v105_v10   ;;  %v2495_v1 = vpack.c.bf16 %v1353_v0, %v1350_v63  ;;  %v138_v2 = vld [vmem:[%s4147_s3 + $0x128] sm:$0xff]  ;;  %v137_v3 = vld [vmem:[%s4147_s3 + $0x120] sm:$0xff]  ;;  %v1356_v6 = vld [vmem:[#allocation8 + $0x158] sm:$0xff] }
  0x6d   :  { %v1349_v4 = vld [vmem:[#allocation8 + $0x120] sm:$0xff]  ;;  %v1359_v7 = vld [vmem:[#allocation8 + $0x170] sm:$0xff]  ;;  %v140_v12 = vld [vmem:[%s4147_s3 + $0x138] sm:$0xff] }
  0x6e   :  { %2486 = vmatpush1.bf16.msra.mxu0 %v2485_v48  ;;  %v139_v8 = vld [vmem:[%s4147_s3 + $0x130] sm:$0xff]  ;;  %v2497_v10 = vpack.c.bf16 %v1352_v5, %v1349_v4  ;;  %v2499_v11 = vpack.c.bf16 %v1359_v7, %v1356_v6  ;;  %v128_v13 = vld [vmem:[%s4147_s3 + $0xd8] sm:$0xff]  ;;  %v1362_v16 = vld [vmem:[#allocation8 + $0x188] sm:$0xff] }
  0x6f   :  { %2488 = vmatprep.subr.bf16.mxu0 %v2487_v49  ;;  %v127_v9 = vld [vmem:[%s4147_s3 + $0xd0] sm:$0xff]  ;;  %v1365_v18 = vld [vmem:[#allocation8 + $0x1a0] sm:$0xff]  ;;  %v1364_v27 = vld [vmem:[#allocation8 + $0x198] sm:$0xff] }
  0x70   :  { %626 = vperm.xlu1 %2798, %v118_v14   ;;  %392 = vperm.xlu0 %2797, %v106_v15   ;;  %v1355_v14 = vld [vmem:[#allocation8 + $0x150] sm:$0xff]  ;;  %v1358_v15 = vld [vmem:[#allocation8 + $0x168] sm:$0xff]  ;;  %v141_v23 = vld [vmem:[%s4147_s3 + $0x140] sm:$0xff] }
  0x71   :  { %v2501_v17 = vpack.c.bf16 %v1358_v15, %v1355_v14  ;;  %v1363_v19 = vld [vmem:[#allocation8 + $0x190] sm:$0xff]  ;;  %v1361_v26 = vld [vmem:[#allocation8 + $0x180] sm:$0xff]  ;;  %v1318_v30 = vld [vmem:[#allocation8 + $0x28] sm:$0xff] }
  0x72   :  { %2490 = vmatpush1.bf16.msra.mxu0 %v2489_v55  ;;  %v1315_v28 = vld [vmem:[#allocation8 + $0x10] sm:$0xff]  ;;  %v2505_v29 = vpack.c.bf16 %v1364_v27, %v1361_v26  ;;  %v1368_v31 = vld [vmem:[#allocation8 + $0x1b8] sm:$0xff]  ;;  %v1369_v36 = vld [vmem:[#allocation8 + $0x1c0] sm:$0xff] }
  0x73   :  { %2492 = vmatprep.subr.bf16.mxu0 %v2491_v57  ;;  %v2569_v34 = vpack.c.bf16 %v1318_v30, %v1315_v28  ;;  %v1372_v37 = vld [vmem:[#allocation8 + $0x1d8] sm:$0xff]  ;;  %v143_v39 = vld [vmem:[%s4147_s3 + $0x150] sm:$0xff]  ;;  %v1370_v42 = vld [vmem:[#allocation8 + $0x1c8] sm:$0xff] }
  0x74   :  { %631 = vperm.xlu1 %2798, %v119_v20   ;;  %397 = vperm.xlu0 %2797, %v107_v21   ;;  %v1366_v20 = vld [vmem:[#allocation8 + $0x1a8] sm:$0xff]  ;;  %v2503_v21 = vpack.c.bf16 %v1365_v18, %v1362_v16  ;;  %v2571_v38 = vpack.c.bf16 %v1372_v37, %v1369_v36  ;;  %v1321_v43 = vld [vmem:[#allocation8 + $0x40] sm:$0xff]  ;;  %v1324_v44 = vld [vmem:[#allocation8 + $0x58] sm:$0xff] }
  0x75   :  { %v2567_v22 = vpack.c.bf16 %v1366_v20, %v1363_v19  ;;  %v1377_v48 = vld [vmem:[#allocation8 + $0x200] sm:$0xff]  ;;  %v1375_v49 = vld [vmem:[#allocation8 + $0x1f0] sm:$0xff]  ;;  %v144_v52 = vld [vmem:[%s4147_s3 + $0x158] sm:$0xff] }
  0x76   :  { %2494 = vmatpush1.bf16.msra.mxu0 %v2493_v62  ;;  %v132_v53 = vld [vmem:[%s4147_s3 + $0xf8] sm:$0xff]  ;;  %v145_v55 = vld [vmem:[%s4147_s3 + $0x160] sm:$0xff]  ;;  %v1327_v60 = vld [vmem:[#allocation8 + $0x70] sm:$0xff] }
  0x77   :  { %2496 = vmatprep.subr.bf16.mxu0 %v2495_v1  ;;  %2568 = vmatprep.subr.bf16.mxu1 %v2567_v22  ;;  %v133_v56 = vld [vmem:[%s4147_s3 + $0x100] sm:$0xff]  ;;  %v1330_v61 = vld [vmem:[#allocation8 + $0x88] sm:$0xff]  ;;  %v1380_v62 = vld [vmem:[#allocation8 + $0x218] sm:$0xff] }
  0x78   :  { %636 = vperm.xlu1 %2798, %v120_v24   ;;  %402 = vperm.xlu0 %2797, %v108_v25   ;;  %v129_v24 = vld [vmem:[%s4147_s3 + $0xe0] sm:$0xff]  ;;  %v142_v25 = vld [vmem:[%s4147_s3 + $0x148] sm:$0xff]  ;;  %v2577_v63 = vpack.c.bf16 %v1330_v61, %v1327_v60  ;;  %v1383_v0 = vld [vmem:[#allocation8 + $0x230] sm:$0xff] }
  0x79   :  { %2570 = vmatpush3.bf16.msra.mxu1 %v2569_v34  ;;  %v1373_v57 = vld [vmem:[#allocation8 + $0x1e0] sm:$0xff]  ;;  %v146_v5 = vld [vmem:[%s4147_s3 + $0x168] sm:$0xff]  ;;  %v1379_v7 = vld [vmem:[#allocation8 + $0x210] sm:$0xff] }
  0x7a   :  { %2498 = vmatpush1.bf16.msra.mxu0 %v2497_v10  ;;  %2572 = vmatprep.subr.bf16.mxu1 %v2571_v38  ;;  %v1381_v1 = vld [vmem:[#allocation8 + $0x220] sm:$0xff]  ;;  %v134_v6 = vld [vmem:[%s4147_s3 + $0x108] sm:$0xff]  ;;  %v135_v10 = vld [vmem:[%s4147_s3 + $0x110] sm:$0xff] }
  0x7b   :  { %2500 = vmatprep.subr.bf16.mxu0 %v2499_v11  ;;  %v1386_v14 = vld [vmem:[#allocation8 + $0x248] sm:$0xff]  ;;  %v1389_v16 = vld [vmem:[#allocation8 + $0x260] sm:$0xff]  ;;  %v1388_v22 = vld [vmem:[#allocation8 + $0x258] sm:$0xff] }
  0x7c   :  { %641 = vperm.xlu1 %2798, %v121_v32   ;;  %407 = vperm.xlu0 %2797, %v109_v33   ;;  %v1371_v32 = vld [vmem:[#allocation8 + $0x1d0] sm:$0xff]  ;;  %v130_v33 = vld [vmem:[%s4147_s3 + $0xe8] sm:$0xff]  ;;  %v2519_v19 = vpack.c.bf16 %v1389_v16, %v1386_v14  ;;  %v1392_v26 = vld [vmem:[#allocation8 + $0x278] sm:$0xff] }
  0x7d   :  { %v2507_v35 = vpack.c.bf16 %v1371_v32, %v1368_v31  ;;  %v1390_v18 = vld [vmem:[#allocation8 + $0x268] sm:$0xff]  ;;  %v1395_v27 = vld [vmem:[#allocation8 + $0x290] sm:$0xff]  ;;  %v1393_v30 = vld [vmem:[#allocation8 + $0x280] sm:$0xff] }
  0x7e   :  { %2502 = vmatpush1.bf16.msra.mxu0 %v2501_v17  ;;  %v1387_v17 = vld [vmem:[#allocation8 + $0x250] sm:$0xff]  ;;  %v1396_v31 = vld [vmem:[#allocation8 + $0x298] sm:$0xff]  ;;  %v1394_v36 = vld [vmem:[#allocation8 + $0x288] sm:$0xff] }
  0x7f   :  { %2504 = vmatprep.subr.bf16.mxu0 %v2503_v21  ;;  %v2583_v20 = vpack.c.bf16 %v1390_v18, %v1387_v17  ;;  %v1385_v21 = vld [vmem:[#allocation8 + $0x240] sm:$0xff]  ;;  %v2587_v32 = vpack.c.bf16 %v1396_v31, %v1393_v30  ;;  %v136_v34 = vld [vmem:[%s4147_s3 + $0x118] sm:$0xff]  ;;  %v1406_v60 = vld [vmem:[#allocation8 + $0x2e8] sm:$0xff] }
  0x80   :  { %646 = vperm.xlu1 %2798, %v122_v40   ;;  %412 = vperm.xlu0 %2797, %v110_v41   ;;  %v131_v40 = vld [vmem:[%s4147_s3 + $0xf0] sm:$0xff]  ;;  %v1345_v37 = vld [vmem:[#allocation8 + $0x100] sm:$0xff]  ;;  %v1348_v38 = vld [vmem:[#allocation8 + $0x118] sm:$0xff] }
  0x81   :  { %v1367_v41 = vld [vmem:[#allocation8 + $0x1b0] sm:$0xff]  ;;  %v1357_v61 = vld [vmem:[#allocation8 + $0x160] sm:$0xff]  ;;  %v3275_v14 = vld [vmem:[#allocation8 + $0x328] sm:$0xff] }
  0x82   :  { %2506 = vmatpush1.bf16.msra.mxu0 %v2505_v29  ;;  %v2509_v45 = vpack.c.bf16 %v1370_v42, %v1367_v41  ;;  %v2523_v29 = vpack.c.bf16 %v1395_v27, %v1392_v26  ;;  %v1398_v41 = vld [vmem:[#allocation8 + $0x2a8] sm:$0xff]  ;;  %v1401_v42 = vld [vmem:[#allocation8 + $0x2c0] sm:$0xff]  ;;  %4232 = vst [vmem:[#allocation22_spill] sm:$0xff] %v3275_v14  ;;  %v3281_v17 = vld [vmem:[#allocation8 + $0x338] sm:$0xff] }
  0x83   :  { %2508 = vmatprep.subr.bf16.mxu0 %v2507_v35  ;;  %v1391_v35 = vld [vmem:[#allocation8 + $0x270] sm:$0xff]  ;;  %v3279_v16 = vld [vmem:[#allocation2 + $0x28] sm:$0xff]  ;;  %4233 = vst [vmem:[#allocation23_spill] sm:$0xff] %v3281_v17  ;;  %v3299_v26 = vld [vmem:[#allocation8 + $0x358] sm:$0xff] }
  0x84   :  { %651 = vperm.xlu1 %2798, %v123_v46   ;;  %417 = vperm.xlu0 %2797, %v111_v47   ;;  %v2573_v46 = vpack.c.bf16 %v1324_v44, %v1321_v43  ;;  %v1374_v47 = vld [vmem:[#allocation8 + $0x1e8] sm:$0xff]  ;;  %v1399_v43 = vld [vmem:[#allocation8 + $0x2b0] sm:$0xff]  ;;  %v2527_v44 = vpack.c.bf16 %v1401_v42, %v1398_v41  ;;  %4238 = vst [vmem:[#allocation28_spill] sm:$0xff] %v3299_v26  ;;  %v221_v27 = vld [vmem:[#allocation5] sm:$0xff] }
  0x85   :  { %v3283_v18 = vld [vmem:[#allocation8 + $0x350] sm:$0xff]  ;;  %v3319_v41 = vld [vmem:[#allocation8 + $0x388] sm:$0xff] }
  0x86   :  { %2510 = vmatpush1.bf16.msra.mxu0 %v2509_v45  ;;  %2574 = vmatpush3.bf16.msra.mxu1 %v2573_v46  ;;  %v1402_v45 = vld [vmem:[#allocation8 + $0x2c8] sm:$0xff]  ;;  %4234 = vst [vmem:[#allocation24_spill] sm:$0xff] %v3283_v18  ;;  %4244 = vst [vmem:[#allocation34_spill] sm:$0xff] %v3319_v41  ;;  %v232_v41 = vld [vmem:[#allocation5 + $0x58] sm:$0xff] }
  0x87   :  { %v2591_v46 = vpack.c.bf16 %v1402_v45, %v1399_v43  ;;  %v258_v42 = vld [vmem:[#allocation5 + $0x128] sm:$0xff]  ;;  %v3321_v43 = vld [vmem:[#allocation2] sm:$0xff]  ;;  %v263_v26 = vld [vmem:[#allocation5 + $0x150] sm:$0xff] }
  0x88   :  { %656 = vperm.xlu1 %2798, %v124_v50   ;;  %422 = vperm.xlu0 %2797, %v112_v51   ;;  %v2511_v50 = vpack.c.bf16 %v1377_v48, %v1374_v47  ;;  %v1378_v51 = vld [vmem:[#allocation8 + $0x208] sm:$0xff]  ;;  %v1397_v47 = vld [vmem:[#allocation8 + $0x2a0] sm:$0xff]  ;;  %v1400_v48 = vld [vmem:[#allocation8 + $0x2b8] sm:$0xff] }
  0x89   :  { %v2575_v54 = vpack.c.bf16 %v1378_v51, %v1375_v49  ;;  %v2529_v49 = vpack.c.bf16 %v1400_v48, %v1397_v47  ;;  %v1354_v51 = vld [vmem:[#allocation8 + $0x148] sm:$0xff]  ;;  %v3418_v18 = vld [vmem:[#allocation2 + $0x58] sm:$0xff] }
  0x8a   :  { %2512 = vmatprep.subr.bf16.mxu0 %v2511_v50  ;;  %v1351_v50 = vld [vmem:[#allocation8 + $0x130] sm:$0xff] }
  0x8b   :  { %2576 = vmatprep.subr.bf16.mxu1 %v2575_v54  ;;  %v1407_v54 = vld [vmem:[#allocation8 + $0x2f0] sm:$0xff] }
  0x8c   :  { %846 = vperm.xlu1 %2798, %v126_v58   ;;  %841 = vperm.xlu0 %2797, %v125_v59   ;;  %v1376_v58 = vld [vmem:[#allocation8 + $0x1f8] sm:$0xff] }
  0x8d   :  { %v2513_v59 = vpack.c.bf16 %v1376_v58, %v1373_v57  ;;  %2578 = vmatpush3.bf16.msra.mxu1 %v2577_v63  ;;  %v1360_v63 = vld [vmem:[#allocation8 + $0x178] sm:$0xff] }
  0x8f   :  { %2514 = vmatpush1.bf16.msra.mxu0 %v2513_v59  ;;  %v1403_v59 = vld [vmem:[#allocation8 + $0x2d0] sm:$0xff] }
  0x90   :  { %1080 = vperm.xlu1 %2798, %v138_v2   ;;  %1075 = vperm.xlu0 %2797, %v137_v3   ;;  %v1384_v2 = vld [vmem:[#allocation8 + $0x238] sm:$0xff]  ;;  %v2515_v3 = vpack.c.bf16 %v1383_v0, %v1380_v62  ;;  %v2533_v62 = vpack.c.bf16 %v1406_v60, %v1403_v59  ;;  %v1410_v0 = vld [vmem:[#allocation8 + $0x308] sm:$0xff]  ;;  %v225_v60 = vld [vmem:[#allocation5 + $0x20] sm:$0xff] }
  0x91   :  { %v2579_v4 = vpack.c.bf16 %v1384_v2, %v1381_v1  ;;  %v1413_v1 = vld [vmem:[#allocation8 + $0x320] sm:$0xff]  ;;  %v2597_v2 = vpack.c.bf16 %v1360_v63, %v1357_v61  ;;  %v260_v61 = vld [vmem:[#allocation5 + $0x138] sm:$0xff] }
  0x92   :  { %2516 = vmatprep.subr.bf16.mxu0 %v2515_v3  ;;  %v2535_v3 = vpack.c.bf16 %v1413_v1, %v1410_v0  ;;  %v265_v63 = vld [vmem:[#allocation5 + $0x160] sm:$0xff] }
  0x93   :  { %2580 = vmatprep.subr.bf16.mxu1 %v2579_v4  ;;  %v4154_v4 = vmov 0.0|0.0   ;;  %v3364_v0 = vld [vmem:[#allocation2 + $0x40] sm:$0xff] }
  0x94   :  { %1085 = vperm.xlu1 %2798, %v139_v8   ;;  %851 = vperm.xlu0 %2797, %v127_v9   ;;  %v1382_v8 = vld [vmem:[#allocation8 + $0x228] sm:$0xff]  ;;  %v147_v9 = vld [vmem:[%s4147_s3 + $0x170] sm:$0xff] }
  0x95   :  { %v2517_v11 = vpack.c.bf16 %v1382_v8, %v1379_v7  ;;  %v259_v8 = vld [vmem:[#allocation5 + $0x130] sm:$0xff] }
  0x97   :  { %2518 = vmatpush1.bf16.msra.mxu0 %v2517_v11  ;;  %v3269_v11 = vld [vmem:[#allocation8 + $0x300] sm:$0xff] }
  0x98   :  { %1090 = vperm.xlu1 %2798, %v140_v12   ;;  %856 = vperm.xlu0 %2797, %v128_v13   ;;  %v1333_v12 = vld [vmem:[#allocation8 + $0xa0] sm:$0xff]  ;;  %v1336_v13 = vld [vmem:[#allocation8 + $0xb8] sm:$0xff]  ;;  %4229 = vst [vmem:[#allocation19_spill] sm:$0xff] %v3269_v11 }
  0x99   :  { %v2581_v15 = vpack.c.bf16 %v1336_v13, %v1333_v12  ;;  %2520 = vmatprep.subr.bf16.mxu0 %v2519_v19  ;;  %v3271_v12 = vld [vmem:[#allocation8 + $0x318] sm:$0xff]  ;;  %v3273_v13 = vld [vmem:[#allocation8 + $0x310] sm:$0xff] }
  0x9a   :  { %4230 = vst [vmem:[#allocation20_spill] sm:$0xff] %v3271_v12  ;;  %4231 = vst [vmem:[#allocation21_spill] sm:$0xff] %v3273_v13  ;;  %v3285_v19 = vld [vmem:[#allocation8 + $0x330] sm:$0xff] }
  0x9b   :  { %2582 = vmatpush3.bf16.msra.mxu1 %v2581_v15  ;;  %v3277_v15 = vld [vmem:[#allocation2 + $0x10] sm:$0xff]  ;;  %4235 = vst [vmem:[#allocation25_spill] sm:$0xff] %v3285_v19  ;;  %v264_v19 = vld [vmem:[#allocation5 + $0x158] sm:$0xff] }
  0x9c   :  { %1095 = vperm.xlu1 %2798, %v141_v23   ;;  %861 = vperm.xlu0 %2797, %v129_v24   ;;  %v1339_v23 = vld [vmem:[#allocation8 + $0xd0] sm:$0xff]  ;;  %v2521_v24 = vpack.c.bf16 %v1388_v22, %v1385_v21  ;;  %v3291_v22 = vld [vmem:[#allocation2 + $0x148] sm:$0xff] }
  0x9d   :  { %2584 = vmatprep.subr.bf16.mxu1 %v2583_v20  ;;  %v3287_v20 = vld [vmem:[#allocation2 + $0x130] sm:$0xff] }
  0x9e   :  { %2522 = vmatpush1.bf16.msra.mxu0 %v2521_v24  ;;  %v3295_v24 = vld [vmem:[#allocation8 + $0x348] sm:$0xff]  ;;  %v3454_v13 = vld [vmem:[#allocation2 + $0x70] sm:$0xff] }
  0x9f   :  { %2524 = vmatprep.subr.bf16.mxu0 %v2523_v29  ;;  %4236 = vst [vmem:[#allocation26_spill] sm:$0xff] %v3295_v24  ;;  %v257_v29 = vld [vmem:[#allocation5 + $0x120] sm:$0xff]  ;;  %4253 = vst [vmem:[#allocation43_spill] sm:$0xff] %v3454_v13 }
  0xa0   :  { %1100 = vperm.xlu1 %2798, %v142_v25   ;;  %866 = vperm.xlu0 %2797, %v130_v33   ;;  %v1342_v25 = vld [vmem:[#allocation8 + $0xe8] sm:$0xff]  ;;  %v148_v33 = vld [vmem:[%s4147_s3 + $0x178] sm:$0xff] }
  0xa1   :  { %v2585_v28 = vpack.c.bf16 %v1342_v25, %v1339_v23  ;;  %v3297_v25 = vld [vmem:[#allocation8 + $0x340] sm:$0xff] }
  0xa2   :  { %4237 = vst [vmem:[#allocation27_spill] sm:$0xff] %v3297_v25 }
  0xa3   :  { %2586 = vmatpush3.bf16.msra.mxu1 %v2585_v28  ;;  %v222_v28 = vld [vmem:[#allocation5 + $0x8] sm:$0xff] }
  0xa4   :  { %1105 = vperm.xlu1 %2798, %v143_v39   ;;  %871 = vperm.xlu0 %2797, %v131_v40   ;;  %v2525_v39 = vpack.c.bf16 %v1394_v36, %v1391_v35  ;;  %v2589_v40 = vpack.c.bf16 %v1348_v38, %v1345_v37  ;;  %v3395_v38 = vld [vmem:[#allocation2 + $0x138] sm:$0xff] }
  0xa5   :  { %2588 = vmatprep.subr.bf16.mxu1 %v2587_v32  ;;  %v3303_v32 = vld [vmem:[#allocation8 + $0x368] sm:$0xff] }
  0xa6   :  { %2526 = vmatpush1.bf16.msra.mxu0 %v2525_v39  ;;  %4239 = vst [vmem:[#allocation29_spill] sm:$0xff] %v3303_v32  ;;  %v3315_v39 = vld [vmem:[#allocation8 + $0x378] sm:$0xff] }
  0xa7   :  { %2590 = vmatpush3.bf16.msra.mxu1 %v2589_v40  ;;  %2528 = vmatprep.subr.bf16.mxu0 %v2527_v44  ;;  %4242 = vst [vmem:[#allocation32_spill] sm:$0xff] %v3315_v39  ;;  %v3317_v40 = vld [vmem:[#allocation8 + $0x370] sm:$0xff]  ;;  %v3323_v44 = vld [vmem:[#allocation2 + $0x8] sm:$0xff]  ;;  %v228_v32 = vld [vmem:[#allocation5 + $0x38] sm:$0xff] }
  0xa8   :  { %1110 = vperm.xlu1 %2798, %v144_v52   ;;  %876 = vperm.xlu0 %2797, %v132_v53   ;;  %v1404_v52 = vld [vmem:[#allocation8 + $0x2d8] sm:$0xff]  ;;  %v2593_v53 = vpack.c.bf16 %v1354_v51, %v1351_v50  ;;  %4243 = vst [vmem:[#allocation33_spill] sm:$0xff] %v3317_v40  ;;  %v3333_v50 = vld [vmem:[#allocation2 + $0x128] sm:$0xff] }
  0xa9   :  { %2592 = vmatprep.subr.bf16.mxu1 %v2591_v46  ;;  %v2531_v57 = vpack.c.bf16 %v1407_v54, %v1404_v52  ;;  %v224_v52 = vld [vmem:[#allocation5 + $0x18] sm:$0xff] }
  0xaa   :  { %2530 = vmatpush1.bf16.msra.mxu0 %v2529_v49  ;;  %v3331_v49 = vld [vmem:[#allocation2 + $0x120] sm:$0xff] }
  0xab   :  { %2594 = vmatpush3.bf16.msra.mxu1 %v2593_v53  ;;  %2532 = vmatprep.subr.bf16.mxu0 %v2531_v57 }
  0xac   :  { %1115 = vperm.xlu1 %2798, %v145_v55   ;;  %881 = vperm.xlu0 %2797, %v133_v56   ;;  %v1405_v55 = vld [vmem:[#allocation8 + $0x2e0] sm:$0xff]  ;;  %v1408_v56 = vld [vmem:[#allocation8 + $0x2f8] sm:$0xff] }
  0xad   :  { %v2595_v58 = vpack.c.bf16 %v1408_v56, %v1405_v55  ;;  %v229_v55 = vld [vmem:[#allocation5 + $0x40] sm:$0xff] }
  0xae   :  { %2534 = vmatpush1.bf16.msra.mxu0 %v2533_v62 }
  0xaf   :  { %2596 = vmatprep.subr.bf16.mxu1 %v2595_v58  ;;  %2536 = vmatprep.subr.bf16.mxu0 %v2535_v3 }
  0xb0   :  { %1120 = vperm.xlu1 %2798, %v146_v5   ;;  %886 = vperm.xlu0 %2797, %v134_v6   ;;  %v223_v5 = vld [vmem:[#allocation5 + $0x10] sm:$0xff] }
  0xb1   :  { %2598 = vmatpush3.bf16.msra.mxu1 %v2597_v2 }
  0xb2   :  { %2599 = vmatprep.subr.bf16.mxu1 %v4154_v4  ;;  %v3392_v4 = vld [vmem:[#allocation8 + $0x3b8] sm:$0xff] }
  0xb3   :  { %4250 = vst [vmem:[#allocation40_spill] sm:$0xff] %v3392_v4  ;;  %v266_v4 = vld [vmem:[#allocation5 + $0x168] sm:$0xff] }
  0xb4   :  { %1125 = vperm.xlu1 %2798, %v147_v9   ;;  %891 = vperm.xlu0 %2797, %v135_v10   ;;  %v226_v9 = vld [vmem:[#allocation5 + $0x28] sm:$0xff] }
  0xb5   :  { %v262_v10 = vld [vmem:[#allocation5 + $0x148] sm:$0xff] }
  0xb8   :  { %1130 = vperm.xlu1 %2798, %v148_v33   ;;  %896 = vperm.xlu0 %2797, %v136_v34   ;;  %v3305_v33 = vld [vmem:[#allocation8 + $0x380] sm:$0xff] }
  0xb9   :  { %4240 = vst [vmem:[#allocation30_spill] sm:$0xff] %v3305_v33  ;;  %v3307_v34 = vld [vmem:[#allocation8 + $0x360] sm:$0xff] }
  0xba   :  { %4241 = vst [vmem:[#allocation31_spill] sm:$0xff] %v3307_v34  ;;  %v227_v34 = vld [vmem:[#allocation5 + $0x30] sm:$0xff] }
  0xdb   :  { %v3265_v6 = vpop.permute.xlu1 %601  ;;  %v3267_v7 = vpop.permute.xlu0 %367 }
  0xdc   :  { %v661_v30 = vmul.f32 %v3265_v6, %v223_v5  ;;  %v697_v35 = vmul.f32 %v3265_v6, %v259_v8  ;;  %v427_v51 = vmul.f32 %v3267_v7, %v3277_v15  ;;  %v463_v59 = vmul.f32 %v3267_v7, %v3287_v20  ;;  %v261_v8 = vld [vmem:[#allocation5 + $0x140] sm:$0xff] }
  0xdd   :  { %v659_v2 = vmul.f32 %v3265_v6, %v221_v27  ;;  %v660_v3 = vmul.f32 %v3265_v6, %v222_v28  ;;  %v695_v5 = vmul.f32 %v3265_v6, %v257_v29  ;;  %v3366_v27 = vld [vmem:[#allocation8 + $0x398] sm:$0xff]  ;;  %v3368_v28 = vld [vmem:[#allocation8 + $0x3b0] sm:$0xff]  ;;  %v426_v29 = vmul.f32 %v3267_v7, %v3323_v44 }
  0xde   :  { %4245 = vst [vmem:[#allocation35_spill] sm:$0xff] %v3366_v27  ;;  %4246 = vst [vmem:[#allocation36_spill] sm:$0xff] %v3368_v28  ;;  %v462_v48 = vmul.f32 %v3267_v7, %v3333_v50  ;;  %v3437_v28 = vld [vmem:[#allocation2 + $0x158] sm:$0xff] }
  0xdf   :  { %v3289_v21 = vpop.permute.xlu1 %606  ;;  %v3293_v23 = vpop.permute.xlu0 %372  ;;  %4252 = vst [vmem:[#allocation42_spill] sm:$0xff] %v3437_v28 }
  0xe0   :  { %v664_v31 = vmul.f32 %v3289_v21, %v226_v9  ;;  %v700_v36 = vmul.f32 %v3289_v21, %v262_v10  ;;  %v430_v54 = vmul.f32 %v3293_v23, %v3279_v16  ;;  %v466_v62 = vmul.f32 %v3293_v23, %v3291_v22  ;;  %v3356_v9 = vld [vmem:[#allocation2 + $0x18] sm:$0xff]  ;;  %v3358_v10 = vld [vmem:[#allocation2 + $0x20] sm:$0xff] }
  0xe1   :  { %v662_v58 = vmul.f32 %v3289_v21, %v224_v52  ;;  %v698_v52 = vmul.f32 %v3289_v21, %v260_v61  ;;  %v699_v46 = vmul.f32 %v3289_v21, %v261_v8  ;;  %v3401_v61 = vld [vmem:[#allocation2 + $0x140] sm:$0xff]  ;;  %v464_v25 = vmul.f32 %v3293_v23, %v3395_v38 }
  0xe2   :  { %v765_v45 = vadd.f32 %v664_v31, %v661_v30  ;;  %v816_v53 = vadd.f32 %v700_v36, %v697_v35  ;;  %v531_v30 = vadd.f32 %v430_v54, %v427_v51  ;;  %v696_v31 = vmul.f32 %v3265_v6, %v258_v42  ;;  %v3375_v42 = vld [vmem:[#allocation2 + $0x160] sm:$0xff] }
  0xe3   :  { %v3339_v56 = vpop.permute.xlu1 %611  ;;  %v3341_v57 = vpop.permute.xlu0 %377  ;;  %v425_v35 = vmul.f32 %v3267_v7, %v3321_v43  ;;  %v582_v36 = vadd.f32 %v466_v62, %v463_v59  ;;  %v663_v51 = vmul.f32 %v3289_v21, %v225_v60  ;;  %v3381_v59 = vld [vmem:[#allocation8 + $0x3a8] sm:$0xff]  ;;  %v461_v62 = vmul.f32 %v3267_v7, %v3331_v49 }
  0xe4   :  { %v667_v1 = vmul.f32 %v3339_v56, %v229_v55  ;;  %v703_v6 = vmul.f32 %v3339_v56, %v265_v63  ;;  %v3379_v55 = vld [vmem:[#allocation8 + $0x390] sm:$0xff]  ;;  %4248 = vst [vmem:[#allocation38_spill] sm:$0xff] %v3381_v59  ;;  %v3390_v63 = vld [vmem:[#allocation8 + $0x3a0] sm:$0xff]  ;;  %v433_v40 = vmul.f32 %v3341_v57, %v3364_v0  ;;  %v469_v21 = vmul.f32 %v3341_v57, %v3375_v42 }
  0xe5   :  { %4247 = vst [vmem:[#allocation37_spill] sm:$0xff] %v3379_v55  ;;  %4249 = vst [vmem:[#allocation39_spill] sm:$0xff] %v3390_v63  ;;  %v748_v39 = vadd.f32 %v663_v51, %v660_v3  ;;  %v782_v33 = vadd.f32 %v698_v52, %v695_v5  ;;  %v3423_v3 = vld [vmem:[#allocation2 + $0x30] sm:$0xff]  ;;  %v3428_v51 = vld [vmem:[#allocation2 + $0x178] sm:$0xff] }
  0xe6   :  { %v766_v47 = vadd.f32 %v765_v45, %v667_v1  ;;  %v817_v37 = vadd.f32 %v816_v53, %v703_v6  ;;  %v428_v45 = vmul.f32 %v3293_v23, %v3356_v9  ;;  %v429_v1 = vmul.f32 %v3293_v23, %v3358_v10  ;;  %v268_v53 = vld [vmem:[#allocation5 + $0x178] sm:$0xff]  ;;  %v235_v63 = vld [vmem:[#allocation5 + $0x70] sm:$0xff] }
  0xe7   :  { %v3377_v54 = vpop.permute.xlu1 %616  ;;  %v3388_v60 = vpop.permute.xlu0 %382  ;;  %v731_v6 = vadd.f32 %v662_v58, %v659_v2  ;;  %v532_v7 = vadd.f32 %v531_v30, %v433_v40  ;;  %v583_v24 = vadd.f32 %v582_v36, %v469_v21  ;;  %v799_v58 = vadd.f32 %v699_v46, %v696_v31  ;;  %v3425_v30 = vld [vmem:[#allocation2 + $0x38] sm:$0xff]  ;;  %v3431_v21 = vld [vmem:[#allocation2 + $0x150] sm:$0xff] }
  0xe8   :  { %v670_v17 = vmul.f32 %v3377_v54, %v232_v41  ;;  %v465_v40 = vmul.f32 %v3293_v23, %v3401_v61  ;;  %v665_v2 = vmul.f32 %v3339_v56, %v227_v34  ;;  %v706_v5 = vmul.f32 %v3377_v54, %v268_v53  ;;  %4251 = vst [vmem:[#allocation41_spill] sm:$0xff] %v3431_v21 }
  0xe9   :  { %v497_v52 = vadd.f32 %v428_v45, %v425_v35  ;;  %v514_v36 = vadd.f32 %v429_v1, %v426_v29  ;;  %v666_v41 = vmul.f32 %v3339_v56, %v228_v32  ;;  %v701_v23 = vmul.f32 %v3339_v56, %v263_v26  ;;  %v271_v29 = vld [vmem:[#allocation5 + $0x190] sm:$0xff] }
  0xea   :  { %v767_v46 = vadd.f32 %v766_v47, %v670_v17  ;;  %v702_v34 = vmul.f32 %v3339_v56, %v264_v19  ;;  %v818_v8 = vadd.f32 %v817_v37, %v706_v5  ;;  %v436_v53 = vmul.f32 %v3388_v60, %v3418_v18  ;;  %v230_v47 = vld [vmem:[#allocation5 + $0x48] sm:$0xff]  ;;  %v231_v45 = vld [vmem:[#allocation5 + $0x50] sm:$0xff] }
  0xeb   :  { %v3411_v27 = vpop.permute.xlu1 %621  ;;  %v3433_v31 = vpop.permute.xlu0 %387  ;;  %v548_v35 = vadd.f32 %v464_v25, %v461_v62  ;;  %v431_v32 = vmul.f32 %v3341_v57, %v3423_v3  ;;  %v432_v17 = vmul.f32 %v3341_v57, %v3425_v30  ;;  %v472_v26 = vmul.f32 %v3388_v60, %v3428_v51 }
  0xec   :  { %v565_v19 = vadd.f32 %v465_v40, %v462_v48  ;;  %v732_v56 = vadd.f32 %v731_v6, %v665_v2  ;;  %v467_v37 = vmul.f32 %v3341_v57, %v3431_v21  ;;  %v533_v1 = vadd.f32 %v532_v7, %v436_v53  ;;  %v267_v6 = vld [vmem:[#allocation5 + $0x170] sm:$0xff]  ;;  %v3457_v2 = vld [vmem:[#allocation2 + $0x48] sm:$0xff]  ;;  %v3672_v21 = vld [vmem:[#allocation2 + $0x200] sm:$0xff] }
  0xed   :  { %v749_v25 = vadd.f32 %v748_v39, %v666_v41  ;;  %v468_v62 = vmul.f32 %v3341_v57, %v3437_v28  ;;  %v584_v55 = vadd.f32 %v583_v24, %v472_v26  ;;  %v673_v59 = vmul.f32 %v3411_v27, %v235_v63  ;;  %4254 = vst [vmem:[#allocation44_spill] sm:$0xff] %v3457_v2  ;;  %v3460_v53 = vld [vmem:[#allocation2 + $0x190] sm:$0xff]  ;;  %v3465_v63 = vld [vmem:[#allocation2 + $0x168] sm:$0xff]  ;;  %v3541_v28 = vld [vmem:[#allocation2 + $0x1a0] sm:$0xff] }
  0xee   :  { %v783_v14 = vadd.f32 %v782_v33, %v701_v23  ;;  %v800_v48 = vadd.f32 %v799_v58, %v702_v34  ;;  %v668_v40 = vmul.f32 %v3377_v54, %v230_v47  ;;  %v709_v7 = vmul.f32 %v3411_v27, %v271_v29  ;;  %4255 = vst [vmem:[#allocation45_spill] sm:$0xff] %v3460_v53  ;;  %v3463_v24 = vld [vmem:[#allocation2 + $0x50] sm:$0xff] }
  0xef   :  { %v3449_v5 = vpop.permute.xlu1 %626  ;;  %v498_v39 = vadd.f32 %v497_v52, %v431_v32  ;;  %v515_v41 = vadd.f32 %v514_v36, %v432_v17  ;;  %v669_v57 = vmul.f32 %v3377_v54, %v231_v45  ;;  %4256 = vst [vmem:[#allocation46_spill] sm:$0xff] %v3463_v24  ;;  %4257 = vst [vmem:[#allocation47_spill] sm:$0xff] %v3465_v63  ;;  %v3467_v33 = vpop.permute.xlu0 %392  ;;  %v3470_v34 = vld [vmem:[#allocation2 + $0x170] sm:$0xff]  ;;  %v238_v52 = vld [vmem:[#allocation5 + $0x88] sm:$0xff] }
  0xf0   :  { %v768_v26 = vadd.f32 %v767_v46, %v673_v59  ;;  %v549_v58 = vadd.f32 %v548_v35, %v467_v37  ;;  %v704_v23 = vmul.f32 %v3377_v54, %v266_v4  ;;  %4258 = vst [vmem:[#allocation48_spill] sm:$0xff] %v3470_v34  ;;  %v819_v47 = vadd.f32 %v818_v8, %v709_v7  ;;  %v233_v45 = vld [vmem:[#allocation5 + $0x60] sm:$0xff]  ;;  %v234_v59 = vld [vmem:[#allocation5 + $0x68] sm:$0xff] }
  0xf1   :  { %v439_v29 = vmul.f32 %v3433_v31, %v3454_v13  ;;  %v566_v36 = vadd.f32 %v565_v19, %v468_v62  ;;  %v705_v32 = vmul.f32 %v3377_v54, %v267_v6  ;;  %v434_v17 = vmul.f32 %v3388_v60, %v3457_v2  ;;  %v274_v35 = vld [vmem:[#allocation5 + $0x1a8] sm:$0xff]  ;;  %v269_v7 = vld [vmem:[#allocation5 + $0x180] sm:$0xff]  ;;  %4270 = vst [vmem:[#allocation60_spill] sm:$0xff] %v3541_v28 }
  0xf2   :  { %v475_v46 = vmul.f32 %v3433_v31, %v3460_v53  ;;  %v733_v4 = vadd.f32 %v732_v56, %v668_v40  ;;  %v435_v8 = vmul.f32 %v3388_v60, %v3463_v24  ;;  %v470_v37 = vmul.f32 %v3388_v60, %v3465_v63  ;;  %v3488_v53 = vld [vmem:[#allocation2 + $0x88] sm:$0xff]  ;;  %v3492_v63 = vld [vmem:[#allocation2 + $0x60] sm:$0xff]  ;;  %4293 = vst [vmem:[#allocation83_spill] sm:$0xff] %v3672_v21 }
  0xf3   :  { %v534_v19 = vadd.f32 %v533_v1, %v439_v29  ;;  %v3483_v62 = vpop.permute.xlu1 %631  ;;  %v750_v54 = vadd.f32 %v749_v25, %v669_v57  ;;  %v471_v6 = vmul.f32 %v3388_v60, %v3470_v34  ;;  %v676_v12 = vmul.f32 %v3449_v5, %v238_v52  ;;  %4259 = vst [vmem:[#allocation49_spill] sm:$0xff] %v3488_v53  ;;  %v270_v40 = vld [vmem:[#allocation5 + $0x188] sm:$0xff]  ;;  %v241_v13 = vld [vmem:[#allocation5 + $0xa0] sm:$0xff] }
  0xf4   :  { %v585_v11 = vadd.f32 %v584_v55, %v475_v46  ;;  %v784_v56 = vadd.f32 %v783_v14, %v704_v23  ;;  %v671_v24 = vmul.f32 %v3411_v27, %v233_v45  ;;  %v672_v2 = vmul.f32 %v3411_v27, %v234_v59  ;;  %4260 = vst [vmem:[#allocation50_spill] sm:$0xff] %v3492_v63  ;;  %v3495_v29 = vld [vmem:[#allocation2 + $0x1a8] sm:$0xff]  ;;  %v3500_v46 = vpop.permute.xlu0 %397  ;;  %v3502_v45 = vld [vmem:[#allocation2 + $0x180] sm:$0xff] }
  0xf5   :  { %v712_v1 = vmul.f32 %v3449_v5, %v274_v35  ;;  %4261 = vst [vmem:[#allocation51_spill] sm:$0xff] %v3495_v29  ;;  %v801_v25 = vadd.f32 %v800_v48, %v705_v32  ;;  %v499_v57 = vadd.f32 %v498_v39, %v434_v17  ;;  %v707_v55 = vmul.f32 %v3411_v27, %v269_v7  ;;  %v3498_v60 = vld [vmem:[#allocation2 + $0x68] sm:$0xff] }
  0xf6   :  { %4262 = vst [vmem:[#allocation52_spill] sm:$0xff] %v3498_v60  ;;  %v769_v52 = vadd.f32 %v768_v26, %v676_v12  ;;  %v516_v14 = vadd.f32 %v515_v41, %v435_v8  ;;  %v550_v23 = vadd.f32 %v549_v58, %v470_v37  ;;  %4263 = vst [vmem:[#allocation53_spill] sm:$0xff] %v3502_v45  ;;  %v3504_v59 = vld [vmem:[#allocation2 + $0x188] sm:$0xff]  ;;  %v236_v12 = vld [vmem:[#allocation5 + $0x78] sm:$0xff] }
  0xf7   :  { %4264 = vst [vmem:[#allocation54_spill] sm:$0xff] %v3504_v59  ;;  %v820_v34 = vadd.f32 %v819_v47, %v712_v1  ;;  %v442_v35 = vmul.f32 %v3467_v33, %v3488_v53  ;;  %v567_v48 = vadd.f32 %v566_v36, %v471_v6  ;;  %v708_v39 = vmul.f32 %v3411_v27, %v270_v40  ;;  %v237_v26 = vld [vmem:[#allocation5 + $0x80] sm:$0xff]  ;;  %v272_v37 = vld [vmem:[#allocation5 + $0x198] sm:$0xff]  ;;  %v3515_v1 = vpop.permute.xlu1 %636 }
  0xf8   :  { %v437_v32 = vmul.f32 %v3433_v31, %v3492_v63  ;;  %v478_v41 = vmul.f32 %v3467_v33, %v3495_v29  ;;  %v277_v58 = vld [vmem:[#allocation5 + $0x1c0] sm:$0xff]  ;;  %v734_v17 = vadd.f32 %v733_v4, %v671_v24  ;;  %v751_v8 = vadd.f32 %v750_v54, %v672_v2  ;;  %v3534_v29 = vpop.permute.xlu0 %402 }
  0xf9   :  { %v438_v47 = vmul.f32 %v3433_v31, %v3498_v60  ;;  %v535_v7 = vadd.f32 %v534_v19, %v442_v35  ;;  %v785_v36 = vadd.f32 %v784_v56, %v707_v55  ;;  %v473_v27 = vmul.f32 %v3433_v31, %v3502_v45  ;;  %v273_v6 = vld [vmem:[#allocation5 + $0x1a0] sm:$0xff]  ;;  %v3526_v19 = vld [vmem:[#allocation2 + $0x78] sm:$0xff] }
  0xfa   :  { %v586_v40 = vadd.f32 %v585_v11, %v478_v41  ;;  %v679_v63 = vmul.f32 %v3483_v62, %v241_v13  ;;  %v3520_v53 = vld [vmem:[#allocation2 + $0xa0] sm:$0xff]  ;;  %v474_v2 = vmul.f32 %v3433_v31, %v3504_v59  ;;  %v674_v24 = vmul.f32 %v3449_v5, %v236_v12  ;;  %4266 = vst [vmem:[#allocation56_spill] sm:$0xff] %v3526_v19  ;;  %v3537_v59 = vld [vmem:[#allocation2 + $0x198] sm:$0xff] }
  0xfb   :  { %4265 = vst [vmem:[#allocation55_spill] sm:$0xff] %v3520_v53  ;;  %v675_v4 = vmul.f32 %v3449_v5, %v237_v26  ;;  %v3528_v54 = vld [vmem:[#allocation2 + $0x80] sm:$0xff]  ;;  %v715_v56 = vmul.f32 %v3483_v62, %v277_v58  ;;  %v802_v11 = vadd.f32 %v801_v25, %v708_v39  ;;  %v500_v35 = vadd.f32 %v499_v57, %v437_v32  ;;  %v244_v60 = vld [vmem:[#allocation5 + $0xb8] sm:$0xff]  ;;  %v239_v57 = vld [vmem:[#allocation5 + $0x90] sm:$0xff] }
  0xfc   :  { %4267 = vst [vmem:[#allocation57_spill] sm:$0xff] %v3528_v54  ;;  %v3531_v55 = vld [vmem:[#allocation2 + $0x1c0] sm:$0xff]  ;;  %v710_v13 = vmul.f32 %v3449_v5, %v272_v37  ;;  %v770_v41 = vadd.f32 %v769_v52, %v679_v63  ;;  %v517_v31 = vadd.f32 %v516_v14, %v438_v47  ;;  %v711_v12 = vmul.f32 %v3449_v5, %v273_v6  ;;  %v280_v52 = vld [vmem:[#allocation5 + $0x1d8] sm:$0xff]  ;;  %v3549_v37 = vpop.permute.xlu1 %641  ;;  %v275_v6 = vld [vmem:[#allocation5 + $0x1b0] sm:$0xff] }
  0xfd   :  { %4268 = vst [vmem:[#allocation58_spill] sm:$0xff] %v3531_v55  ;;  %4269 = vst [vmem:[#allocation59_spill] sm:$0xff] %v3537_v59  ;;  %v821_v26 = vadd.f32 %v820_v34, %v715_v56  ;;  %v445_v45 = vmul.f32 %v3500_v46, %v3520_v53  ;;  %v551_v58 = vadd.f32 %v550_v23, %v473_v27  ;;  %v240_v32 = vld [vmem:[#allocation5 + $0x98] sm:$0xff] }
  0xfe   :  { %v440_v25 = vmul.f32 %v3467_v33, %v3526_v19  ;;  %v441_v63 = vmul.f32 %v3467_v33, %v3528_v54  ;;  %v481_v5 = vmul.f32 %v3500_v46, %v3531_v55  ;;  %v568_v14 = vadd.f32 %v567_v48, %v474_v2  ;;  %v276_v56 = vld [vmem:[#allocation5 + $0x1b8] sm:$0xff] }
  0xff   :  { %v735_v34 = vadd.f32 %v734_v17, %v674_v24  ;;  %v752_v39 = vadd.f32 %v751_v8, %v675_v4  ;;  %v536_v47 = vadd.f32 %v535_v7, %v445_v45  ;;  %v786_v23 = vadd.f32 %v785_v36, %v710_v13  ;;  %v3554_v19 = vld [vmem:[#allocation2 + $0xb8] sm:$0xff]  ;;  %v3559_v45 = vld [vmem:[#allocation2 + $0x90] sm:$0xff] }
 0x100   :  { %v476_v27 = vmul.f32 %v3467_v33, %v3537_v59  ;;  %v587_v53 = vadd.f32 %v586_v40, %v481_v5  ;;  %v682_v54 = vmul.f32 %v3515_v1, %v244_v60  ;;  %4271 = vst [vmem:[#allocation61_spill] sm:$0xff] %v3554_v19  ;;  %v803_v55 = vadd.f32 %v802_v11, %v711_v12  ;;  %v3561_v8 = vld [vmem:[#allocation2 + $0x98] sm:$0xff]  ;;  %v3567_v24 = vld [vmem:[#allocation2 + $0x1b0] sm:$0xff]  ;;  %v3569_v11 = vpop.permute.xlu0 %407 }
 0x101   :  { %v477_v48 = vmul.f32 %v3467_v33, %v3541_v28  ;;  %v677_v17 = vmul.f32 %v3483_v62, %v239_v57  ;;  %4272 = vst [vmem:[#allocation62_spill] sm:$0xff] %v3559_v45  ;;  %4273 = vst [vmem:[#allocation63_spill] sm:$0xff] %v3561_v8  ;;  %v718_v7 = vmul.f32 %v3515_v1, %v280_v52  ;;  %v3564_v36 = vld [vmem:[#allocation2 + $0x1d8] sm:$0xff]  ;;  %v247_v52 = vld [vmem:[#allocation5 + $0xd0] sm:$0xff] }
 0x102   :  { %4274 = vst [vmem:[#allocation64_spill] sm:$0xff] %v3564_v36  ;;  %v501_v2 = vadd.f32 %v500_v35, %v440_v25  ;;  %v518_v40 = vadd.f32 %v517_v31, %v441_v63  ;;  %v678_v60 = vmul.f32 %v3483_v62, %v240_v32  ;;  %4275 = vst [vmem:[#allocation65_spill] sm:$0xff] %v3567_v24  ;;  %v3573_v12 = vld [vmem:[#allocation2 + $0x1b8] sm:$0xff]  ;;  %v283_v63 = vld [vmem:[#allocation5 + $0x1f0] sm:$0xff] }
 0x103   :  { %v771_v4 = vadd.f32 %v770_v41, %v682_v54  ;;  %v713_v33 = vmul.f32 %v3483_v62, %v275_v6  ;;  %v714_v13 = vmul.f32 %v3483_v62, %v276_v56  ;;  %4276 = vst [vmem:[#allocation66_spill] sm:$0xff] %v3573_v12  ;;  %v822_v57 = vadd.f32 %v821_v26, %v718_v7  ;;  %v242_v41 = vld [vmem:[#allocation5 + $0xa8] sm:$0xff]  ;;  %v243_v6 = vld [vmem:[#allocation5 + $0xb0] sm:$0xff]  ;;  %v3585_v7 = vpop.permute.xlu1 %646 }
 0x104   :  { %v448_v5 = vmul.f32 %v3534_v29, %v3554_v19  ;;  %v552_v35 = vadd.f32 %v551_v58, %v476_v27  ;;  %v443_v31 = vmul.f32 %v3500_v46, %v3559_v45  ;;  %v444_v54 = vmul.f32 %v3500_v46, %v3561_v8  ;;  %v278_v19 = vld [vmem:[#allocation5 + $0x1c8] sm:$0xff]  ;;  %v3590_v28 = vld [vmem:[#allocation2 + $0xd0] sm:$0xff] }
 0x105   :  { %v484_v25 = vmul.f32 %v3534_v29, %v3564_v36  ;;  %v569_v62 = vadd.f32 %v568_v14, %v477_v48  ;;  %v736_v32 = vadd.f32 %v735_v34, %v677_v17  ;;  %v479_v26 = vmul.f32 %v3500_v46, %v3567_v24  ;;  %4277 = vst [vmem:[#allocation67_spill] sm:$0xff] %v3590_v28  ;;  %v279_v34 = vld [vmem:[#allocation5 + $0x1d0] sm:$0xff]  ;;  %v3593_v17 = vld [vmem:[#allocation2 + $0xa8] sm:$0xff]  ;;  %v253_v24 = vld [vmem:[#allocation5 + $0x100] sm:$0xff] }
 0x106   :  { %v537_v56 = vadd.f32 %v536_v47, %v448_v5  ;;  %v753_v58 = vadd.f32 %v752_v39, %v678_v60  ;;  %v480_v27 = vmul.f32 %v3500_v46, %v3573_v12  ;;  %v685_v45 = vmul.f32 %v3549_v37, %v247_v52  ;;  %4278 = vst [vmem:[#allocation68_spill] sm:$0xff] %v3593_v17  ;;  %v3596_v5 = vld [vmem:[#allocation2 + $0x1f0] sm:$0xff]  ;;  %v3601_v52 = vld [vmem:[#allocation2 + $0x1c8] sm:$0xff] }
 0x107   :  { %v588_v8 = vadd.f32 %v587_v53, %v484_v25  ;;  %v787_v36 = vadd.f32 %v786_v23, %v713_v33  ;;  %v804_v14 = vadd.f32 %v803_v55, %v714_v13  ;;  %v680_v48 = vmul.f32 %v3515_v1, %v242_v41  ;;  %4279 = vst [vmem:[#allocation69_spill] sm:$0xff] %v3596_v5  ;;  %v3599_v53 = vld [vmem:[#allocation2 + $0xb0] sm:$0xff]  ;;  %v3603_v23 = vpop.permute.xlu0 %412 }
 0x108   :  { %v721_v47 = vmul.f32 %v3549_v37, %v283_v63  ;;  %v502_v39 = vadd.f32 %v501_v2, %v443_v31  ;;  %v519_v60 = vadd.f32 %v518_v40, %v444_v54  ;;  %v681_v46 = vmul.f32 %v3515_v1, %v243_v6  ;;  %4280 = vst [vmem:[#allocation70_spill] sm:$0xff] %v3599_v53  ;;  %v3606_v13 = vld [vmem:[#allocation2 + $0x1d0] sm:$0xff]  ;;  %v250_v2 = vld [vmem:[#allocation5 + $0xe8] sm:$0xff]  ;;  %v245_v6 = vld [vmem:[#allocation5 + $0xc0] sm:$0xff] }
 0x109   :  { %4281 = vst [vmem:[#allocation71_spill] sm:$0xff] %v3601_v52  ;;  %v772_v25 = vadd.f32 %v771_v4, %v685_v45  ;;  %v553_v55 = vadd.f32 %v552_v35, %v479_v26  ;;  %v716_v33 = vmul.f32 %v3515_v1, %v278_v19  ;;  %4282 = vst [vmem:[#allocation72_spill] sm:$0xff] %v3606_v13  ;;  %v246_v45 = vld [vmem:[#allocation5 + $0xc8] sm:$0xff] }
 0x10a   :  { %v823_v41 = vadd.f32 %v822_v57, %v721_v47  ;;  %v451_v63 = vmul.f32 %v3569_v11, %v3590_v28  ;;  %v570_v40 = vadd.f32 %v569_v62, %v480_v27  ;;  %v717_v31 = vmul.f32 %v3515_v1, %v279_v34  ;;  %v286_v35 = vld [vmem:[#allocation5 + $0x208] sm:$0xff]  ;;  %v281_v47 = vld [vmem:[#allocation5 + $0x1e0] sm:$0xff]  ;;  %v3619_v27 = vpop.permute.xlu1 %651 }
 0x10b   :  { %v446_v54 = vmul.f32 %v3534_v29, %v3593_v17  ;;  %v487_v4 = vmul.f32 %v3569_v11, %v3596_v5  ;;  %v737_v19 = vadd.f32 %v736_v32, %v680_v48  ;;  %v447_v57 = vmul.f32 %v3534_v29, %v3599_v53  ;;  %v3624_v5 = vld [vmem:[#allocation2 + $0xe8] sm:$0xff] }
 0x10c   :  { %v482_v26 = vmul.f32 %v3534_v29, %v3601_v52  ;;  %v538_v62 = vadd.f32 %v537_v56, %v451_v63  ;;  %v754_v1 = vadd.f32 %v753_v58, %v681_v46  ;;  %v483_v34 = vmul.f32 %v3534_v29, %v3606_v13  ;;  %4283 = vst [vmem:[#allocation73_spill] sm:$0xff] %v3624_v5  ;;  %v282_v48 = vld [vmem:[#allocation5 + $0x1e8] sm:$0xff]  ;;  %v3628_v52 = vld [vmem:[#allocation2 + $0xc0] sm:$0xff] }
 0x10d   :  { %v589_v28 = vadd.f32 %v588_v8, %v487_v4  ;;  %v688_v17 = vmul.f32 %v3585_v7, %v250_v2  ;;  %v788_v32 = vadd.f32 %v787_v36, %v716_v33  ;;  %v683_v53 = vmul.f32 %v3549_v37, %v245_v6  ;;  %4284 = vst [vmem:[#allocation74_spill] sm:$0xff] %v3628_v52  ;;  %v3631_v63 = vld [vmem:[#allocation2 + $0x208] sm:$0xff]  ;;  %v3636_v4 = vpop.permute.xlu0 %417  ;;  %v3638_v6 = vld [vmem:[#allocation2 + $0x1e0] sm:$0xff] }
 0x10e   :  { %v684_v12 = vmul.f32 %v3549_v37, %v246_v45  ;;  %v724_v56 = vmul.f32 %v3585_v7, %v286_v35  ;;  %4285 = vst [vmem:[#allocation75_spill] sm:$0xff] %v3631_v63  ;;  %v805_v58 = vadd.f32 %v804_v14, %v717_v31  ;;  %v503_v46 = vadd.f32 %v502_v39, %v446_v54  ;;  %v3634_v8 = vld [vmem:[#allocation2 + $0xc8] sm:$0xff] }
 0x10f   :  { %v719_v29 = vmul.f32 %v3549_v37, %v281_v47  ;;  %4286 = vst [vmem:[#allocation76_spill] sm:$0xff] %v3634_v8  ;;  %v773_v2 = vadd.f32 %v772_v25, %v688_v17  ;;  %v520_v36 = vadd.f32 %v519_v60, %v447_v57  ;;  %v554_v33 = vadd.f32 %v553_v55, %v482_v26  ;;  %v3640_v45 = vld [vmem:[#allocation2 + $0x1e8] sm:$0xff]  ;;  %v248_v17 = vld [vmem:[#allocation5 + $0xd8] sm:$0xff]  ;;  %v249_v25 = vld [vmem:[#allocation5 + $0xe0] sm:$0xff] }
 0x110   :  { %4287 = vst [vmem:[#allocation77_spill] sm:$0xff] %v3638_v6  ;;  %4288 = vst [vmem:[#allocation78_spill] sm:$0xff] %v3640_v45  ;;  %v824_v13 = vadd.f32 %v823_v41, %v724_v56  ;;  %v454_v35 = vmul.f32 %v3603_v23, %v3624_v5  ;;  %v571_v14 = vadd.f32 %v570_v40, %v483_v34  ;;  %v289_v55 = vld [vmem:[#allocation5 + $0x220] sm:$0xff]  ;;  %v284_v26 = vld [vmem:[#allocation5 + $0x1f8] sm:$0xff]  ;;  %v3651_v56 = vpop.permute.xlu1 %656 }
 0x111   :  { %v720_v39 = vmul.f32 %v3549_v37, %v282_v48  ;;  %v449_v31 = vmul.f32 %v3569_v11, %v3628_v52  ;;  %v490_v60 = vmul.f32 %v3603_v23, %v3631_v63  ;;  %v738_v54 = vadd.f32 %v737_v19, %v683_v53  ;;  %v285_v34 = vld [vmem:[#allocation5 + $0x200] sm:$0xff] }
 0x112   :  { %v755_v57 = vadd.f32 %v754_v1, %v684_v12  ;;  %v450_v41 = vmul.f32 %v3569_v11, %v3634_v8  ;;  %v539_v47 = vadd.f32 %v538_v62, %v454_v35  ;;  %v789_v40 = vadd.f32 %v788_v32, %v719_v29  ;;  %v181_v52 = vld [vmem:[#allocation2 + $0x100] sm:$0xff]  ;;  %v3660_v1 = vld [vmem:[#allocation2 + $0xd8] sm:$0xff] }
 0x113   :  { %v485_v37 = vmul.f32 %v3569_v11, %v3638_v6  ;;  %v590_v48 = vadd.f32 %v589_v28, %v490_v60  ;;  %v691_v5 = vmul.f32 %v3619_v27, %v253_v24  ;;  %v486_v53 = vmul.f32 %v3569_v11, %v3640_v45  ;;  %4289 = vst [vmem:[#allocation79_spill] sm:$0xff] %v3660_v1  ;;  %v3662_v62 = vld [vmem:[#allocation2 + $0xe0] sm:$0xff]  ;;  %v3666_v60 = vpop.permute.xlu0 %422  ;;  %v256_v8 = vld [vmem:[#allocation5 + $0x118] sm:$0xff] }
 0x114   :  { %v686_v12 = vmul.f32 %v3585_v7, %v248_v17  ;;  %v687_v19 = vmul.f32 %v3585_v7, %v249_v25  ;;  %4290 = vst [vmem:[#allocation80_spill] sm:$0xff] %v3662_v62  ;;  %v727_v32 = vmul.f32 %v3619_v27, %v289_v55  ;;  %v217_v29 = vld [vmem:[#allocation2 + $0x220] sm:$0xff]  ;;  %v806_v35 = vadd.f32 %v805_v58, %v720_v39  ;;  %v3669_v17 = vld [vmem:[#allocation2 + $0x1f8] sm:$0xff] }
 0x115   :  { %v504_v6 = vadd.f32 %v503_v46, %v449_v31  ;;  %v722_v28 = vmul.f32 %v3585_v7, %v284_v26  ;;  %v774_v24 = vadd.f32 %v773_v2, %v691_v5  ;;  %4291 = vst [vmem:[#allocation81_spill] sm:$0xff] %v3666_v60  ;;  %v521_v63 = vadd.f32 %v520_v36, %v450_v41  ;;  %v251_v46 = vld [vmem:[#allocation5 + $0xf0] sm:$0xff]  ;;  %v292_v36 = vld [vmem:[#allocation5 + $0x238] sm:$0xff] }
 0x116   :  { %v723_v11 = vmul.f32 %v3585_v7, %v285_v34  ;;  %4292 = vst [vmem:[#allocation82_spill] sm:$0xff] %v3669_v17  ;;  %v825_v25 = vadd.f32 %v824_v13, %v727_v32  ;;  %v457_v45 = vmul.f32 %v3636_v4, %v181_v52  ;;  %v555_v59 = vadd.f32 %v554_v33, %v485_v37  ;;  %v252_v13 = vld [vmem:[#allocation5 + $0xf8] sm:$0xff]  ;;  %v3681_v52 = vpop.permute.xlu1 %846  ;;  %v287_v26 = vld [vmem:[#allocation5 + $0x210] sm:$0xff] }
 0x117   :  { %v452_v58 = vmul.f32 %v3603_v23, %v3660_v1  ;;  %v453_v5 = vmul.f32 %v3603_v23, %v3662_v62  ;;  %v493_v2 = vmul.f32 %v3636_v4, %v217_v29  ;;  %v572_v7 = vadd.f32 %v571_v14, %v486_v53  ;;  %v288_v37 = vld [vmem:[#allocation5 + $0x218] sm:$0xff]  ;;  %v3685_v34 = vld [vmem:[#allocation2 + $0xf0] sm:$0xff] }
 0x118   :  { %v739_v39 = vadd.f32 %v738_v54, %v686_v12  ;;  %v756_v31 = vadd.f32 %v755_v57, %v687_v19  ;;  %v3679_v55 = vadd.f32 %v539_v47, %v457_v45  ;;  %v790_v33 = vadd.f32 %v789_v40, %v722_v28  ;;  %4295 = vst [vmem:[#allocation85_spill] sm:$0xff] %v3685_v34  ;;  %v3693_v57 = vld [vmem:[#allocation2 + $0xf8] sm:$0xff]  ;;  %v3695_v47 = vld [vmem:[#allocation2 + $0x210] sm:$0xff] }
 0x119   :  { %v488_v41 = vmul.f32 %v3603_v23, %v3669_v17  ;;  %v3687_v32 = vadd.f32 %v590_v48, %v493_v2  ;;  %v694_v29 = vmul.f32 %v3651_v56, %v256_v8  ;;  %v807_v14 = vadd.f32 %v806_v35, %v723_v11  ;;  %4297 = vst [vmem:[#allocation87_spill] sm:$0xff] %v3693_v57  ;;  %v3699_v48 = vld [vmem:[#allocation2 + $0x218] sm:$0xff]  ;;  %v3703_v8 = vpop.permute.xlu0 %841  ;;  %v290_v2 = vld [vmem:[#allocation5 + $0x228] sm:$0xff] }
 0x11a   :  { %4294 = vst [vmem:[#allocation84_spill] sm:$0xff] %v3679_v55  ;;  %v489_v54 = vmul.f32 %v3603_v23, %v3672_v21  ;;  %v689_v45 = vmul.f32 %v3619_v27, %v251_v46  ;;  %4298 = vst [vmem:[#allocation88_spill] sm:$0xff] %v3695_v47  ;;  %v730_v40 = vmul.f32 %v3651_v56, %v292_v36  ;;  %v254_v46 = vld [vmem:[#allocation5 + $0x108] sm:$0xff]  ;;  %v336_v17 = vld [vmem:[#allocation7 + $0x158] sm:$0xff] }
 0x11b   :  { %4296 = vst [vmem:[#allocation86_spill] sm:$0xff] %v3687_v32  ;;  %v505_v53 = vadd.f32 %v504_v6, %v452_v58  ;;  %v522_v12 = vadd.f32 %v521_v63, %v453_v5  ;;  %v690_v19 = vmul.f32 %v3619_v27, %v252_v13  ;;  %4299 = vst [vmem:[#allocation89_spill] sm:$0xff] %v3699_v48  ;;  %v3731_v32 = vld [vmem:[#allocation2 + $0x110] sm:$0xff]  ;;  %v218_v55 = vld [vmem:[#allocation2 + $0x228] sm:$0xff] }
 0x11c   :  { %v3701_v28 = vadd.f32 %v774_v24, %v694_v29  ;;  %v725_v23 = vmul.f32 %v3619_v27, %v287_v26  ;;  %v726_v35 = vmul.f32 %v3619_v27, %v288_v37  ;;  %v455_v11 = vmul.f32 %v3636_v4, %v3685_v34  ;;  %v182_v26 = vld [vmem:[#allocation2 + $0x108] sm:$0xff]  ;;  %v3721_v37 = vpop.permute.xlu1 %1080  ;;  %4301 = vst [vmem:[#allocation91_spill] sm:$0xff] %v3731_v32  ;;  %v300_v34 = vld [vmem:[#allocation7 + $0x38] sm:$0xff] }
 0x11d   :  { %v3709_v36 = vadd.f32 %v825_v25, %v730_v40  ;;  %v556_v63 = vadd.f32 %v555_v59, %v488_v41  ;;  %v456_v6 = vmul.f32 %v3636_v4, %v3693_v57  ;;  %v491_v24 = vmul.f32 %v3636_v4, %v3695_v47  ;;  %v255_v41 = vld [vmem:[#allocation5 + $0x110] sm:$0xff]  ;;  %v330_v47 = vld [vmem:[#allocation7 + $0x128] sm:$0xff] }
 0x11e   :  { %v904_v58 = vmul.f32 %v3681_v52, %v3279_v16  ;;  %v573_v5 = vadd.f32 %v572_v7, %v489_v54  ;;  %v740_v13 = vadd.f32 %v739_v39, %v689_v45  ;;  %v492_v27 = vmul.f32 %v3636_v4, %v3699_v48  ;;  %v298_v7 = vld [vmem:[#allocation7 + $0x28] sm:$0xff]  ;;  %v291_v45 = vld [vmem:[#allocation5 + $0x230] sm:$0xff] }
 0x11f   :  { %4300 = vst [vmem:[#allocation90_spill] sm:$0xff] %v3709_v36  ;;  %v940_v25 = vmul.f32 %v3681_v52, %v3291_v22  ;;  %v3723_v59 = vadd.f32 %v756_v31, %v690_v19  ;;  %v692_v29 = vmul.f32 %v3651_v56, %v254_v46  ;;  %v728_v40 = vmul.f32 %v3651_v56, %v290_v2  ;;  %v334_v31 = vld [vmem:[#allocation7 + $0x148] sm:$0xff] }
 0x120   :  { %v901_v16 = vmul.f32 %v3703_v8, %v3277_v15  ;;  %v791_v39 = vadd.f32 %v790_v33, %v725_v23  ;;  %v3729_v54 = vadd.f32 %v807_v14, %v726_v35  ;;  %v506_v4 = vadd.f32 %v505_v53, %v455_v11  ;;  %v295_v15 = vld [vmem:[#allocation7 + $0x10] sm:$0xff]  ;;  %v1076_v14 = vpop.permute.xlu0 %1075 }
 0x121   :  { %v937_v22 = vmul.f32 %v3703_v8, %v3287_v20  ;;  %v3735_v19 = vadd.f32 %v522_v12, %v456_v6  ;;  %v557_v46 = vadd.f32 %v556_v63, %v491_v24  ;;  %v458_v2 = vmul.f32 %v3666_v60, %v182_v26  ;;  %v331_v33 = vld [vmem:[#allocation7 + $0x130] sm:$0xff] }
 0x122   :  { %v3738_v48 = vadd.f32 %v904_v58, %v901_v16  ;;  %v3740_v23 = vadd.f32 %v573_v5, %v492_v27  ;;  %v3743_v53 = vmul.f32 %v3651_v56, %v255_v41  ;;  %v3745_v35 = vld [vmem:[#allocation2 + $0x230] sm:$0xff]  ;;  %v1138_v12 = vmul.f32 %v3721_v37, %v298_v7  ;;  %v337_v41 = vld [vmem:[#allocation7 + $0x160] sm:$0xff]  ;;  %v1086_v16 = vpop.permute.xlu1 %1085  ;;  %v296_v7 = vld [vmem:[#allocation7 + $0x18] sm:$0xff] }
 0x123   :  { %4302 = vst [vmem:[#allocation92_spill] sm:$0xff] %v3745_v35  ;;  %v1056_v20 = vadd.f32 %v940_v25, %v937_v22  ;;  %v3749_v11 = vmul.f32 %v3651_v56, %v291_v45  ;;  %v3751_v63 = vadd.f32 %v740_v13, %v692_v29  ;;  %v3753_v6 = vadd.f32 %v791_v39, %v728_v40  ;;  %v301_v25 = vld [vmem:[#allocation7 + $0x40] sm:$0xff] }
 0x124   :  { %v1174_v24 = vmul.f32 %v3721_v37, %v334_v31  ;;  %v3758_v58 = vmul.f32 %v3666_v60, %v3731_v32  ;;  %v494_v5 = vmul.f32 %v3666_v60, %v218_v55  ;;  %v1135_v27 = vmul.f32 %v1076_v14, %v295_v15  ;;  %v297_v45 = vld [vmem:[#allocation7 + $0x20] sm:$0xff]  ;;  %v294_v15 = vld [vmem:[#allocation7 + $0x8] sm:$0xff] }
 0x125   :  { %v1171_v26 = vmul.f32 %v1076_v14, %v331_v33  ;;  %v3763_v56 = vmul.f32 %v3666_v60, %v3745_v35  ;;  %v3765_v13 = vadd.f32 %v506_v4, %v458_v2  ;;  %v902_v29 = vmul.f32 %v3681_v52, %v3356_v9  ;;  %v293_v9 = vld [vmem:[#allocation7] sm:$0xff]  ;;  %v852_v35 = vpop.permute.xlu0 %851 }
 0x126   :  { %v899_v40 = vmul.f32 %v3703_v8, %v3321_v43  ;;  %v903_v55 = vmul.f32 %v3681_v52, %v3358_v10  ;;  %v938_v39 = vmul.f32 %v3681_v52, %v3395_v38  ;;  %v1239_v22 = vadd.f32 %v1138_v12, %v1135_v27  ;;  %v332_v12 = vld [vmem:[#allocation7 + $0x138] sm:$0xff]  ;;  %v1091_v60 = vpop.permute.xlu1 %1090 }
 0x127   :  { %v1290_v31 = vadd.f32 %v1174_v24, %v1171_v26  ;;  %v900_v4 = vmul.f32 %v3703_v8, %v3323_v44  ;;  %v935_v2 = vmul.f32 %v3703_v8, %v3331_v49  ;;  %v1141_v33 = vmul.f32 %v1086_v16, %v301_v25  ;;  %v329_v44 = vld [vmem:[#allocation7 + $0x120] sm:$0xff]  ;;  %v299_v25 = vld [vmem:[#allocation7 + $0x30] sm:$0xff] }
 0x128   :  { %v1177_v43 = vmul.f32 %v1086_v16, %v337_v41  ;;  %v3779_v32 = vadd.f32 %v557_v46, %v494_v5  ;;  %v939_v10 = vmul.f32 %v3681_v52, %v3401_v61  ;;  %v936_v38 = vmul.f32 %v3703_v8, %v3333_v50  ;;  %v333_v26 = vld [vmem:[#allocation7 + $0x140] sm:$0xff]  ;;  %v304_v50 = vld [vmem:[#allocation7 + $0x58] sm:$0xff] }
 0x129   :  { %v1136_v24 = vmul.f32 %v3721_v37, %v296_v7  ;;  %v971_v27 = vadd.f32 %v902_v29, %v899_v40  ;;  %v1137_v49 = vmul.f32 %v3721_v37, %v297_v45  ;;  %v1240_v41 = vadd.f32 %v1239_v22, %v1141_v33  ;;  %v340_v8 = vld [vmem:[#allocation7 + $0x178] sm:$0xff]  ;;  %v335_v45 = vld [vmem:[#allocation7 + $0x150] sm:$0xff]  ;;  %v3792_v62 = vpop.permute.xlu0 %856 }
 0x12a   :  { %v1291_v57 = vadd.f32 %v1290_v31, %v1177_v43  ;;  %v1133_v46 = vmul.f32 %v1076_v14, %v293_v9  ;;  %v1134_v5 = vmul.f32 %v1076_v14, %v294_v15  ;;  %v907_v61 = vmul.f32 %v852_v35, %v3364_v0 }
 0x12b   :  { %v943_v52 = vmul.f32 %v852_v35, %v3375_v42  ;;  %v988_v7 = vadd.f32 %v903_v55, %v900_v4  ;;  %v1022_v21 = vadd.f32 %v938_v39, %v935_v2  ;;  %v1172_v29 = vmul.f32 %v3721_v37, %v332_v12 }
 0x12c   :  { %v1169_v40 = vmul.f32 %v1076_v14, %v329_v44  ;;  %v1173_v22 = vmul.f32 %v3721_v37, %v333_v26  ;;  %v1170_v31 = vmul.f32 %v1076_v14, %v330_v47  ;;  %v1006_v9 = vadd.f32 %v3738_v48, %v907_v61  ;;  %v307_v14 = vld [vmem:[#allocation7 + $0x70] sm:$0xff] }
 0x12d   :  { %v1057_v15 = vadd.f32 %v1056_v20, %v943_v52  ;;  %v1139_v33 = vmul.f32 %v1086_v16, %v299_v25  ;;  %v1140_v0 = vmul.f32 %v1086_v16, %v300_v34  ;;  %v1144_v43 = vmul.f32 %v1091_v60, %v304_v50  ;;  %v343_v20 = vld [vmem:[#allocation7 + $0x190] sm:$0xff]  ;;  %v302_v25 = vld [vmem:[#allocation7 + $0x48] sm:$0xff] }
 0x12e   :  { %v1180_v42 = vmul.f32 %v1091_v60, %v340_v8  ;;  %v1205_v1 = vadd.f32 %v1136_v24, %v1133_v46  ;;  %v1222_v55 = vadd.f32 %v1137_v49, %v1134_v5  ;;  %v1175_v39 = vmul.f32 %v1086_v16, %v335_v45  ;;  %v3800_v24 = vpop.permute.xlu1 %1095  ;;  %v4303_v49 = vld [vmem:[#allocation41_spill] sm:$0xff]  ;;  %v3816_v45 = vpop.permute.xlu0 %861 }
 0x12f   :  { %v1176_v4 = vmul.f32 %v1086_v16, %v336_v17  ;;  %v1256_v2 = vadd.f32 %v1172_v29, %v1169_v40  ;;  %v905_v12 = vmul.f32 %v852_v35, %v3423_v3  ;;  %v1241_v44 = vadd.f32 %v1240_v41, %v1144_v43 }
 0x130   :  { %v1292_v36 = vadd.f32 %v1291_v57, %v1180_v42  ;;  %v1273_v37 = vadd.f32 %v1173_v22, %v1170_v31  ;;  %v906_v47 = vmul.f32 %v852_v35, %v3425_v30  ;;  %v910_v48 = vmul.f32 %v3792_v62, %v3418_v18  ;;  %v303_v30 = vld [vmem:[#allocation7 + $0x50] sm:$0xff]  ;;  %v4304_v18 = vld [vmem:[#allocation42_spill] sm:$0xff] }
 0x131   :  { %v946_v34 = vmul.f32 %v3792_v62, %v3428_v51  ;;  %v1039_v26 = vadd.f32 %v939_v10, %v936_v38  ;;  %v1206_v17 = vadd.f32 %v1205_v1, %v1139_v33  ;;  %v1223_v16 = vadd.f32 %v1222_v55, %v1140_v0  ;;  %v338_v1 = vld [vmem:[#allocation7 + $0x168] sm:$0xff]  ;;  %v339_v38 = vld [vmem:[#allocation7 + $0x170] sm:$0xff] }
 0x132   :  { %v941_v3 = vmul.f32 %v852_v35, %v4303_v49  ;;  %v1257_v57 = vadd.f32 %v1256_v2, %v1175_v39  ;;  %v3803_v41 = vadd.f32 %v1273_v37, %v1176_v4  ;;  %v1007_v46 = vadd.f32 %v1006_v9, %v910_v48  ;;  %v4305_v33 = vld [vmem:[#allocation43_spill] sm:$0xff]  ;;  %v4306_v4 = vld [vmem:[#allocation44_spill] sm:$0xff]  ;;  %v4308_v37 = vld [vmem:[#allocation46_spill] sm:$0xff] }
 0x133   :  { %v1058_v5 = vadd.f32 %v1057_v15, %v946_v34  ;;  %v942_v61 = vmul.f32 %v852_v35, %v4304_v18  ;;  %v3806_v52 = vadd.f32 %v971_v27, %v905_v12  ;;  %v1147_v51 = vmul.f32 %v3800_v24, %v307_v14 }
 0x134   :  { %v1183_v50 = vmul.f32 %v3800_v24, %v343_v20  ;;  %v3810_v10 = vadd.f32 %v988_v7, %v906_v47  ;;  %v1142_v8 = vmul.f32 %v1091_v60, %v302_v25  ;;  %v524_v29 = vadd.f32 %v3735_v19, %v3758_v58 }
 0x135   :  { %v575_v40 = vadd.f32 %v3740_v23, %v3763_v56  ;;  %v3818_v35 = vadd.f32 %v1022_v21, %v941_v3  ;;  %v1143_v27 = vmul.f32 %v1091_v60, %v303_v30  ;;  %v3820_v22 = vadd.f32 %v1241_v44, %v1147_v51 }
 0x136   :  { %v3822_v31 = vadd.f32 %v1292_v36, %v1183_v50  ;;  %v525_v7 = vrot.slane %v524_v29, 4  ;;  %v758_v15 = vadd.f32 %v3723_v59, %v3743_v53  ;;  %v809_v19 = vadd.f32 %v3729_v54, %v3749_v11  ;;  %v4307_v53 = vld [vmem:[#allocation45_spill] sm:$0xff] }
 0x137   :  { %v576_v9 = vrot.slane %v575_v40, 4  ;;  %v3828_v58 = vadd.f32 %v1039_v26, %v942_v61  ;;  %v1178_v23 = vmul.f32 %v1091_v60, %v338_v1  ;;  %v1179_v56 = vmul.f32 %v1091_v60, %v339_v38 }
 0x138   :  { %v913_v21 = vmul.f32 %v3816_v45, %v4305_v33  ;;  %v526_v0 = vadd.f32 %v525_v7, %v524_v29  ;;  %v759_v42 = vrot.slane %v758_v15, 4  ;;  %v810_v36 = vrot.slane %v809_v19, 4 }
 0x139   :  { %v577_v43 = vadd.f32 %v576_v9, %v575_v40  ;;  %v3832_v55 = vadd.f32 %v1206_v17, %v1142_v8  ;;  %v3834_v39 = vadd.f32 %v1223_v16, %v1143_v27  ;;  %v908_v59 = vmul.f32 %v3792_v62, %v4306_v4 }
 0x13a   :  { %v949_v54 = vmul.f32 %v3816_v45, %v4307_v53  ;;  %v527_v11 = vrot.slane %v526_v0, 2  ;;  %v760_v60 = vadd.f32 %v759_v42, %v758_v15  ;;  %v811_v12 = vadd.f32 %v810_v36, %v809_v19  ;;  %v310_v15 = vld [vmem:[#allocation7 + $0x88] sm:$0xff]  ;;  %v3856_v19 = vpop.permute.xlu1 %1100  ;;  %v4310_v36 = vld [vmem:[#allocation48_spill] sm:$0xff] }
 0x13b   :  { %v578_v2 = vrot.slane %v577_v43, 2  ;;  %v3840_v44 = vadd.f32 %v1257_v57, %v1178_v23  ;;  %v909_v47 = vmul.f32 %v3792_v62, %v4308_v37  ;;  %v3844_v48 = vadd.f32 %v1007_v46, %v913_v21  ;;  %v346_v42 = vld [vmem:[#allocation7 + $0x1a8] sm:$0xff] }
 0x13c   :  { %v3846_v34 = vadd.f32 %v1058_v5, %v949_v54  ;;  %v528_v14 = vadd.f32 %v527_v11, %v526_v0  ;;  %v761_v26 = vrot.slane %v760_v60, 2  ;;  %v812_v17 = vrot.slane %v811_v12, 2 }
 0x13d   :  { %v579_v20 = vadd.f32 %v578_v2, %v577_v43  ;;  %v508_v16 = vrot.slane %v3765_v13, 4  ;;  %v559_v49 = vrot.slane %v3779_v32, 4  ;;  %v742_v3 = vrot.slane %v3751_v63, 4  ;;  %v305_v2 = vld [vmem:[#allocation7 + $0x60] sm:$0xff] }
 0x13e   :  { %v793_v25 = vrot.slane %v3753_v6, 4  ;;  %v529_v57 = vrot.slane %v528_v14, 1  ;;  %v762_v18 = vadd.f32 %v761_v26, %v760_v60  ;;  %v813_v61 = vadd.f32 %v812_v17, %v811_v12 }
 0x13f   :  { %v580_v30 = vrot.slane %v579_v20, 1  ;;  %v509_v46 = vadd.f32 %v508_v16, %v3765_v13  ;;  %v560_v5 = vadd.f32 %v559_v49, %v3779_v32  ;;  %v743_v51 = vadd.f32 %v742_v3, %v3751_v63  ;;  %v4309_v13 = vld [vmem:[#allocation47_spill] sm:$0xff]  ;;  %v341_v16 = vld [vmem:[#allocation7 + $0x180] sm:$0xff] }
 0x140   :  { %v794_v50 = vadd.f32 %v793_v25, %v3753_v6  ;;  %v530_v1 = vadd.f32 %v529_v57, %v528_v14  ;;  %v763_v8 = vrot.slane %v762_v18, 1  ;;  %v814_v29 = vrot.slane %v813_v61, 1  ;;  %v3870_v57 = vpop.permute.xlu0 %866 }
 0x141   :  { %v581_v38 = vadd.f32 %v580_v30, %v579_v20  ;;  %v510_v40 = vrot.slane %v509_v46, 2  ;;  %v561_v27 = vrot.slane %v560_v5, 2  ;;  %v744_v7 = vrot.slane %v743_v51, 2 }
 0x142   :  { %v795_v9 = vrot.slane %v794_v50, 2  ;;  %v3859_v23 = vadd.f32 %v3803_v41, %v1179_v56  ;;  %v944_v32 = vmul.f32 %v3792_v62, %v4309_v13  ;;  %v764_v63 = vadd.f32 %v763_v8, %v762_v18  ;;  %v306_v41 = vld [vmem:[#allocation7 + $0x68] sm:$0xff] }
 0x143   :  { %v815_v33 = vadd.f32 %v814_v29, %v813_v61  ;;  %v511_v6 = vadd.f32 %v510_v40, %v509_v46  ;;  %v562_v21 = vadd.f32 %v561_v27, %v560_v5  ;;  %v745_v0 = vadd.f32 %v744_v7, %v743_v51  ;;  %v308_v46 = vld [vmem:[#allocation7 + $0x78] sm:$0xff]  ;;  %v4312_v29 = vld [vmem:[#allocation50_spill] sm:$0xff] }
 0x144   :  { %v796_v43 = vadd.f32 %v795_v9, %v794_v50  ;;  %v945_v4 = vmul.f32 %v3792_v62, %v4310_v36  ;;  %v834_v53 = vadd.f32 %v764_v63, %v530_v1  ;;  %v1150_v11 = vmul.f32 %v3856_v19, %v310_v15  ;;  %v342_v62 = vld [vmem:[#allocation7 + $0x188] sm:$0xff]  ;;  %v4313_v40 = vld [vmem:[#allocation52_spill] sm:$0xff]  ;;  %v309_v7 = vld [vmem:[#allocation7 + $0x80] sm:$0xff] }
 0x145   :  { %v837_v54 = vadd.f32 %v815_v33, %v581_v38  ;;  %v512_v56 = vrot.slane %v511_v6, 1  ;;  %v563_v60 = vrot.slane %v562_v21, 1  ;;  %v746_v12 = vrot.slane %v745_v0, 1  ;;  %v4311_v38 = vld [vmem:[#allocation49_spill] sm:$0xff]  ;;  %v4315_v9 = vld [vmem:[#allocation51_spill] sm:$0xff]  ;;  %v4316_v13 = vld [vmem:[#allocation54_spill] sm:$0xff] }
 0x146   :  { %v797_v37 = vrot.slane %v796_v43, 1  ;;  %v973_v14 = vadd.f32 %v3806_v52, %v908_v59  ;;  %v990_v20 = vadd.f32 %v3810_v10, %v909_v47  ;;  %v1186_v17 = vmul.f32 %v3856_v19, %v346_v42  ;;  %v345_v63 = vld [vmem:[#allocation7 + $0x1a0] sm:$0xff]  ;;  %v4317_v36 = vld [vmem:[#allocation20_spill] sm:$0xff] }
 0x147   :  { %v1482_v26 = vsel %vm1480_vm0, %v837_v54, %v834_v53  ;;  %v513_v49 = vadd.f32 %v512_v56, %v511_v6  ;;  %v564_v3 = vadd.f32 %v563_v60, %v562_v21  ;;  %v747_v25 = vadd.f32 %v746_v12, %v745_v0  ;;  %v4320_v53 = vld [vmem:[#allocation22_spill] sm:$0xff]  ;;  %v4321_v54 = vld [vmem:[#allocation21_spill] sm:$0xff]  ;;  %v4323_v56 = vld [vmem:[#allocation24_spill] sm:$0xff] }
 0x148   :  { %1551 = vmatprep.mubr.f32.mxu0 %v1482_v26  ;;  %1693 = vmatprep.mubr.f32.mxu1 %v1482_v26  ;;  %v1145_v30 = vmul.f32 %v3800_v24, %v305_v2  ;;  %v1146_v18 = vmul.f32 %v3800_v24, %v306_v41  ;;  %v798_v52 = vadd.f32 %v797_v37, %v796_v43  ;;  %v872_v2 = vpop.permute.xlu0 %871  ;;  %v4326_v12 = vmov 0.0|0.0  }
 0x149   :  { %v3875_v10 = vadd.f32 %v3820_v22, %v1150_v11  ;;  %v1024_v59 = vadd.f32 %v3818_v35, %v944_v32  ;;  %v1041_v47 = vadd.f32 %v3828_v58, %v945_v4  ;;  %v833_v61 = vadd.f32 %v747_v25, %v513_v49  ;;  %v4314_v58 = vld [vmem:[#allocation53_spill] sm:$0xff]  ;;  %v4318_v4 = vld [vmem:[#allocation19_spill] sm:$0xff] }
 0x14a   :  { %v3880_v5 = vadd.f32 %v3822_v31, %v1186_v17  ;;  %v1181_v51 = vmul.f32 %v3800_v24, %v341_v16  ;;  %v1182_v50 = vmul.f32 %v3800_v24, %v342_v62  ;;  %v836_v1 = vadd.f32 %v798_v52, %v564_v3  ;;  %v344_v31 = vld [vmem:[#allocation7 + $0x198] sm:$0xff]  ;;  %v1106_v62 = vpop.permute.xlu1 %1105  ;;  %v4329_v25 = vld [vmem:[#allocation59_spill] sm:$0xff] }
 0x14b   :  { %v916_v8 = vmul.f32 %v3870_v57, %v4311_v38  ;;  %v911_v22 = vmul.f32 %v3816_v45, %v4312_v29  ;;  %v912_v35 = vmul.f32 %v3816_v45, %v4313_v40  ;;  %v947_v27 = vmul.f32 %v3816_v45, %v4314_v58  ;;  %v4327_v3 = vld [vmem:[#allocation56_spill] sm:$0xff]  ;;  %v4337_v40 = vld [vmem:[#allocation58_spill] sm:$0xff] }
 0x14c   :  { %v952_v15 = vmul.f32 %v3870_v57, %v4315_v9  ;;  %v948_v24 = vmul.f32 %v3816_v45, %v4316_v13  ;;  %v1481_v32 = vsel %vm1480_vm0, %v836_v1, %v833_v61  ;;  %v1148_v33 = vmul.f32 %v3856_v19, %v308_v46  ;;  %v312_v52 = vld [vmem:[#allocation7 + $0x98] sm:$0xff]  ;;  %v313_v61 = vld [vmem:[#allocation7 + $0xa0] sm:$0xff] }
 0x14d   :  { %v1009_v6 = vadd.f32 %v3844_v48, %v916_v8  ;;  %v1208_v21 = vadd.f32 %v3832_v55, %v1145_v30  ;;  %v1225_v0 = vadd.f32 %v3834_v39, %v1146_v18  ;;  %1552 = vmatmul.mubr.f32.vlgmr.msra.gmra.mrb[0].mxu0 %v1481_v32  ;;  %1694 = vmatmul.mubr.f32.vlgmr.msra.gmra.mrb[0].mxu1 %v1481_v32  ;;  %v2976_v49 = vmov 0.0   ;;  %v311_v18 = vld [vmem:[#allocation7 + $0x90] sm:$0xff]  ;;  %v349_v9 = vld [vmem:[#allocation7 + $0x1c0] sm:$0xff] }
 0x14e   :  { %v1060_v43 = vadd.f32 %v3846_v34, %v952_v15  ;;  %v1259_v42 = vadd.f32 %v3840_v44, %v1181_v51  ;;  %v4319_v45 = vpack.c.bf16 %v4317_v36, %v4318_v4  ;;  %v4322_v11 = vpack.c.bf16 %v4320_v53, %v4321_v54  ;;  %v4324_v44 = vld [vmem:[#allocation23_spill] sm:$0xff]  ;;  %1622 = vmatprep.mubr.f32.mxu0 %v2976_v49  ;;  %v4331_v51 = vld [vmem:[#allocation26_spill] sm:$0xff]  ;;  %v4334_v38 = vld [vmem:[#allocation28_spill] sm:$0xff]  ;;  %v877_v53 = vpop.permute.xlu0 %876 }
 0x14f   :  { %v1149_v48 = vmul.f32 %v3856_v19, %v309_v7  ;;  %v1184_v55 = vmul.f32 %v3856_v19, %v344_v31  ;;  %v1276_v39 = vadd.f32 %v3859_v23, %v1182_v50  ;;  %v974_v41 = vadd.f32 %v973_v14, %v911_v22  ;;  %v4328_v14 = vld [vmem:[#allocation57_spill] sm:$0xff]  ;;  %2433 = vmatprep.mubr.msk.f32.mxu1 %vm2977_vm1, %v2976_v49  ;;  %v4335_v8 = vld [vmem:[#allocation27_spill] sm:$0xff]  ;;  %v4339_v15 = vld [vmem:[#allocation30_spill] sm:$0xff] }
 0x150   :  { %2538 = vmatpush1.bf16.msra.mxu0 %v4319_v45  ;;  %2601 = vmatpush3.bf16.msra.mxu1 %v4322_v11  ;;  %v1185_v34 = vmul.f32 %v3856_v19, %v345_v63  ;;  %v4325_v60 = vpack.c.bf16 %v4323_v56, %v4324_v44  ;;  %v991_v37 = vadd.f32 %v990_v20, %v912_v35  ;;  %v4330_v20 = vld [vmem:[#allocation55_spill] sm:$0xff]  ;;  %v4332_v50 = vld [vmem:[#allocation25_spill] sm:$0xff] }
 0x151   :  { %2602 = vmatprep.subr.bf16.mxu1 %v4326_v12  ;;  %v1025_v26 = vadd.f32 %v1024_v59, %v947_v27  ;;  %v1042_v17 = vadd.f32 %v1041_v47, %v948_v24  ;;  %v1209_v16 = vadd.f32 %v1208_v21, %v1148_v33  ;;  %v914_v23 = vmul.f32 %v3870_v57, %v4327_v3  ;;  %v347_v22 = vld [vmem:[#allocation7 + $0x1b0] sm:$0xff]  ;;  %v348_v31 = vld [vmem:[#allocation7 + $0x1b8] sm:$0xff] }
 0x152   :  { %2540 = vmatprep.subr.bf16.mxu0 %v4325_v60  ;;  %v915_v19 = vmul.f32 %v3870_v57, %v4328_v14  ;;  %v950_v30 = vmul.f32 %v3870_v57, %v4329_v25  ;;  %v919_v59 = vmul.f32 %v872_v2, %v4330_v20  ;;  %v1226_v47 = vadd.f32 %v1225_v0, %v1149_v48  ;;  %v4338_v27 = vld [vmem:[#allocation60_spill] sm:$0xff]  ;;  %v4340_v13 = vld [vmem:[#allocation29_spill] sm:$0xff]  ;;  %v4342_v48 = vld [vmem:[#allocation62_spill] sm:$0xff] }
 0x153   :  { %v1260_v46 = vadd.f32 %v1259_v42, %v1184_v55  ;;  %v4333_v1 = vpack.c.bf16 %v4331_v51, %v4332_v50  ;;  %v4336_v29 = vpack.c.bf16 %v4334_v38, %v4335_v8  ;;  %v955_v35 = vmul.f32 %v872_v2, %v4337_v40  ;;  %v4347_v44 = vld [vmem:[#allocation33_spill] sm:$0xff]  ;;  %v4349_v3 = vld [vmem:[#allocation63_spill] sm:$0xff]  ;;  %v4351_v25 = vld [vmem:[#allocation66_spill] sm:$0xff] }
 0x154   :  { %v1277_v58 = vadd.f32 %v1276_v39, %v1185_v34  ;;  %v951_v7 = vmul.f32 %v3870_v57, %v4338_v27  ;;  %v4341_v24 = vpack.c.bf16 %v4339_v15, %v4340_v13  ;;  %v1010_v32 = vadd.f32 %v1009_v6, %v919_v59  ;;  %v4343_v39 = vld [vmem:[#allocation32_spill] sm:$0xff]  ;;  %v4344_v34 = vld [vmem:[#allocation31_spill] sm:$0xff]  ;;  %v4346_v6 = vld [vmem:[#allocation34_spill] sm:$0xff] }
 0x155   :  { %2542 = vmatpush1.bf16.msra.mxu0 %v4333_v1  ;;  %2604 = vmatpush3.bf16.msra.mxu1 %v4336_v29  ;;  %v1151_v63 = vmul.f32 %v1106_v62, %v311_v18  ;;  %v1152_v33 = vmul.f32 %v1106_v62, %v312_v52  ;;  %v1153_v21 = vmul.f32 %v1106_v62, %v313_v61  ;;  %v776_v57 = vrot.slane %v3701_v28, 4  ;;  %v4350_v14 = vld [vmem:[#allocation65_spill] sm:$0xff]  ;;  %v4353_v18 = vld [vmem:[#allocation35_spill] sm:$0xff]  ;;  %v4356_v40 = vld [vmem:[#allocation64_spill] sm:$0xff] }
 0x156   :  { %2544 = vmatprep.subr.bf16.mxu0 %v4341_v24  ;;  %2605 = vmatprep.subr.bf16.mxu1 %v4326_v12  ;;  %v1061_v0 = vadd.f32 %v1060_v43, %v955_v35  ;;  %v975_v42 = vadd.f32 %v974_v41, %v914_v23  ;;  %v992_v36 = vadd.f32 %v991_v37, %v915_v19  ;;  %v314_v43 = vld [vmem:[#allocation7 + $0xa8] sm:$0xff]  ;;  %v315_v41 = vld [vmem:[#allocation7 + $0xb0] sm:$0xff]  ;;  %v1111_v37 = vpop.permute.xlu1 %1110  ;;  %v316_v51 = vld [vmem:[#allocation7 + $0xb8] sm:$0xff] }
 0x157   :  { %v1026_v4 = vadd.f32 %v1025_v26, %v950_v30  ;;  %v1187_v45 = vmul.f32 %v1106_v62, %v347_v22  ;;  %v1188_v54 = vmul.f32 %v1106_v62, %v348_v31  ;;  %v1189_v11 = vmul.f32 %v1106_v62, %v349_v9  ;;  %v4352_v30 = vld [vmem:[#allocation36_spill] sm:$0xff]  ;;  %v350_v50 = vld [vmem:[#allocation7 + $0x1c8] sm:$0xff]  ;;  %v4355_v1 = vld [vmem:[#allocation61_spill] sm:$0xff] }
 0x158   :  { %v917_v55 = vmul.f32 %v872_v2, %v4342_v48  ;;  %v4345_v56 = vpack.c.bf16 %v4343_v39, %v4344_v34  ;;  %v4348_v60 = vpack.c.bf16 %v4346_v6, %v4347_v44  ;;  %v1043_v26 = vadd.f32 %v1042_v17, %v951_v7  ;;  %v351_v8 = vld [vmem:[#allocation7 + $0x1d0] sm:$0xff]  ;;  %v1434_v35 = vld [vmem:[#allocation8 + $0x3c8] sm:$0xff]  ;;  %v1437_v27 = vld [vmem:[#allocation8 + $0x3e0] sm:$0xff] }
 0x159   :  { %v918_v23 = vmul.f32 %v872_v2, %v4349_v3  ;;  %v953_v19 = vmul.f32 %v872_v2, %v4350_v14  ;;  %v954_v62 = vmul.f32 %v872_v2, %v4351_v25  ;;  %v4354_v52 = vpack.c.bf16 %v4352_v30, %v4353_v18  ;;  %v352_v31 = vld [vmem:[#allocation7 + $0x1d8] sm:$0xff]  ;;  %v4357_v9 = vld [vmem:[#allocation38_spill] sm:$0xff]  ;;  %v4365_v14 = vld [vmem:[#allocation71_spill] sm:$0xff] }
 0x15a   :  { %2546 = vmatpush1.bf16.msra.mxu0 %v4345_v56  ;;  %2607 = vmatpush3.bf16.msra.mxu1 %v4348_v60  ;;  %v1210_v61 = vadd.f32 %v1209_v16, %v1151_v63  ;;  %v1227_v20 = vadd.f32 %v1226_v47, %v1152_v33  ;;  %v1244_v59 = vadd.f32 %v3875_v10, %v1153_v21  ;;  %v4358_v15 = vld [vmem:[#allocation37_spill] sm:$0xff]  ;;  %v4360_v21 = vld [vmem:[#allocation40_spill] sm:$0xff]  ;;  %v318_v34 = vld [vmem:[#allocation7 + $0xc8] sm:$0xff] }
 0x15b   :  { %2548 = vmatprep.subr.bf16.mxu0 %v4354_v52  ;;  %2608 = vmatprep.subr.bf16.mxu1 %v4326_v12  ;;  %v922_v17 = vmul.f32 %v877_v53, %v4355_v1  ;;  %v1261_v38 = vadd.f32 %v1260_v46, %v1187_v45  ;;  %v1154_v29 = vmul.f32 %v1111_v37, %v314_v43  ;;  %v4361_v45 = vld [vmem:[#allocation39_spill] sm:$0xff]  ;;  %v317_v39 = vld [vmem:[#allocation7 + $0xc0] sm:$0xff]  ;;  %v4363_v44 = vld [vmem:[#allocation68_spill] sm:$0xff] }
 0x15c   :  { %v1155_v22 = vmul.f32 %v1111_v37, %v315_v41  ;;  %v958_v2 = vmul.f32 %v877_v53, %v4356_v40  ;;  %v1278_v7 = vadd.f32 %v1277_v58, %v1188_v54  ;;  %v1295_v16 = vadd.f32 %v3880_v5, %v1189_v11  ;;  %v3965_v58 = vpop.permute.xlu0 %881  ;;  %v1116_v11 = vpop.permute.xlu1 %1115  ;;  %v353_v43 = vld [vmem:[#allocation7 + $0x1e0] sm:$0xff]  ;;  %v1435_v41 = vld [vmem:[#allocation8 + $0x3d0] sm:$0xff]  ;;  %v354_v30 = vld [vmem:[#allocation7 + $0x1e8] sm:$0xff] }
 0x15d   :  { %v976_v47 = vadd.f32 %v975_v42, %v917_v55  ;;  %v1011_v10 = vadd.f32 %v1010_v32, %v922_v17  ;;  %v4359_v13 = vpack.c.bf16 %v4357_v9, %v4358_v15  ;;  %v993_v24 = vadd.f32 %v992_v36, %v918_v23  ;;  %v319_v32 = vld [vmem:[#allocation7 + $0xd0] sm:$0xff]  ;;  %v1433_v36 = vld [vmem:[#allocation8 + $0x3c0] sm:$0xff]  ;;  %v1440_v40 = vld [vmem:[#allocation8 + $0x3f8] sm:$0xff] }
 0x15e   :  { %v1027_v63 = vadd.f32 %v1026_v4, %v953_v19  ;;  %v1044_v46 = vadd.f32 %v1043_v26, %v954_v62  ;;  %v1062_v33 = vadd.f32 %v1061_v0, %v958_v2  ;;  %v4362_v48 = vpack.c.bf16 %v4360_v21, %v4361_v45  ;;  %v1436_v4 = vld [vmem:[#allocation8 + $0x3d8] sm:$0xff]  ;;  %v1438_v26 = vld [vmem:[#allocation8 + $0x3e8] sm:$0xff]  ;;  %v355_v18 = vld [vmem:[#allocation7 + $0x1f0] sm:$0xff] }
 0x15f   :  { %2550 = vmatpush1.bf16.msra.mxu0 %v4359_v13  ;;  %v1156_v5 = vmul.f32 %v1111_v37, %v316_v51  ;;  %v1190_v42 = vmul.f32 %v1111_v37, %v350_v50  ;;  %v1191_v54 = vmul.f32 %v1111_v37, %v351_v8  ;;  %v2551_v55 = vpack.c.bf16 %v1437_v27, %v1434_v35  ;;  %v4364_v3 = vld [vmem:[#allocation70_spill] sm:$0xff]  ;;  %v4366_v25 = vld [vmem:[#allocation72_spill] sm:$0xff]  ;;  %v4367_v52 = vld [vmem:[#allocation67_spill] sm:$0xff] }
 0x160   :  { %2610 = vmatpush3.bf16.msra.mxu1 %v4362_v48  ;;  %v1192_v56 = vmul.f32 %v1111_v37, %v352_v31  ;;  %v1211_v0 = vadd.f32 %v1210_v61, %v1154_v29  ;;  %v1228_v6 = vadd.f32 %v1227_v20, %v1155_v22  ;;  %v920_v60 = vmul.f32 %v877_v53, %v4363_v44  ;;  %v4368_v20 = vld [vmem:[#allocation69_spill] sm:$0xff]  ;;  %v1443_v2 = vld [vmem:[#allocation8 + $0x410] sm:$0xff]  ;;  %v887_v45 = vpop.permute.xlu0 %886 }
 0x161   :  { %2611 = vmatprep.subr.bf16.mxu1 %v4326_v12  ;;  %v921_v23 = vmul.f32 %v877_v53, %v4364_v3  ;;  %v956_v19 = vmul.f32 %v877_v53, %v4365_v14  ;;  %v957_v62 = vmul.f32 %v877_v53, %v4366_v25  ;;  %2552 = vmatprep.subr.bf16.mxu0 %v2551_v55  ;;  %v1439_v48 = vld [vmem:[#allocation8 + $0x3f0] sm:$0xff]  ;;  %v4373_v14 = vld [vmem:[#allocation77_spill] sm:$0xff]  ;;  %v4374_v25 = vld [vmem:[#allocation78_spill] sm:$0xff] }
 0x162   :  { %v925_v51 = vmul.f32 %v3965_v58, %v4367_v52  ;;  %v1157_v37 = vmul.f32 %v1116_v11, %v317_v39  ;;  %v1158_v61 = vmul.f32 %v1116_v11, %v318_v34  ;;  %v961_v50 = vmul.f32 %v3965_v58, %v4368_v20  ;;  %v4371_v44 = vld [vmem:[#allocation76_spill] sm:$0xff]  ;;  %v1446_v52 = vld [vmem:[#allocation8 + $0x428] sm:$0xff] }
 0x163   :  { %v2553_v1 = vpack.c.bf16 %v1436_v4, %v1433_v36  ;;  %v1159_v17 = vmul.f32 %v1116_v11, %v319_v32  ;;  %v1193_v8 = vmul.f32 %v1116_v11, %v353_v43  ;;  %v2612_v22 = vpack.c.bf16 %v1438_v26, %v1435_v41  ;;  %v1441_v36 = vld [vmem:[#allocation8 + $0x400] sm:$0xff]  ;;  %v356_v43 = vld [vmem:[#allocation7 + $0x1f8] sm:$0xff]  ;;  %v4372_v41 = vld [vmem:[#allocation75_spill] sm:$0xff] }
 0x164   :  { %v1012_v29 = vadd.f32 %v1011_v10, %v925_v51  ;;  %v1245_v35 = vadd.f32 %v1244_v59, %v1156_v5  ;;  %v1194_v53 = vmul.f32 %v1116_v11, %v354_v30  ;;  %v1195_v27 = vmul.f32 %v1116_v11, %v355_v18  ;;  %v1442_v10 = vld [vmem:[#allocation8 + $0x408] sm:$0xff]  ;;  %v1444_v59 = vld [vmem:[#allocation8 + $0x418] sm:$0xff]  ;;  %v1449_v51 = vld [vmem:[#allocation8 + $0x440] sm:$0xff] }
 0x165   :  { %v1063_v31 = vadd.f32 %v1062_v33, %v961_v50  ;;  %2554 = vmatpush1.bf16.msra.mxu0 %v2553_v1  ;;  %v1262_v9 = vadd.f32 %v1261_v38, %v1190_v42  ;;  %v1279_v15 = vadd.f32 %v1278_v7, %v1191_v54  ;;  %v1296_v13 = vadd.f32 %v1295_v16, %v1192_v56  ;;  %v320_v38 = vld [vmem:[#allocation7 + $0xd8] sm:$0xff]  ;;  %v1121_v7 = vpop.permute.xlu1 %1120  ;;  %v4369_v42 = vld [vmem:[#allocation74_spill] sm:$0xff] }
 0x166   :  { %v977_v21 = vadd.f32 %v976_v47, %v920_v60  ;;  %2613 = vmatpush3.bf16.msra.mxu1 %v2612_v22  ;;  %v994_v39 = vadd.f32 %v993_v24, %v921_v23  ;;  %v1028_v34 = vadd.f32 %v1027_v63, %v956_v19  ;;  %v1045_v32 = vadd.f32 %v1044_v46, %v957_v62  ;;  %v321_v24 = vld [vmem:[#allocation7 + $0xe0] sm:$0xff]  ;;  %v322_v63 = vld [vmem:[#allocation7 + $0xe8] sm:$0xff] }
 0x167   :  { %v2555_v55 = vpack.c.bf16 %v1443_v2, %v1440_v40  ;;  %2614 = vmatprep.subr.bf16.mxu1 %v4326_v12  ;;  %v1212_v5 = vadd.f32 %v1211_v0, %v1157_v37  ;;  %v1229_v11 = vadd.f32 %v1228_v6, %v1158_v61  ;;  %v1246_v33 = vadd.f32 %v1245_v35, %v1159_v17  ;;  %v4370_v46 = vld [vmem:[#allocation73_spill] sm:$0xff]  ;;  %v358_v6 = vld [vmem:[#allocation7 + $0x208] sm:$0xff] }
 0x168   :  { %v1263_v4 = vadd.f32 %v1262_v9, %v1193_v8  ;;  %v1280_v16 = vadd.f32 %v1279_v15, %v1194_v53  ;;  %v1297_v47 = vadd.f32 %v1296_v13, %v1195_v27  ;;  %v923_v54 = vmul.f32 %v3965_v58, %v4369_v42  ;;  %v357_v0 = vld [vmem:[#allocation7 + $0x200] sm:$0xff]  ;;  %v1448_v8 = vld [vmem:[#allocation8 + $0x438] sm:$0xff]  ;;  %v4376_v35 = vld [vmem:[#allocation79_spill] sm:$0xff] }
 0x169   :  { %2556 = vmatprep.subr.bf16.mxu0 %v2555_v55  ;;  %v928_v56 = vmul.f32 %v887_v45, %v4370_v46  ;;  %v924_v60 = vmul.f32 %v3965_v58, %v4371_v44  ;;  %v964_v26 = vmul.f32 %v887_v45, %v4372_v41  ;;  %v2557_v3 = vpack.c.bf16 %v1442_v10, %v1439_v48  ;;  %v4375_v37 = vld [vmem:[#allocation90_spill] sm:$0xff]  ;;  %v4377_v27 = vld [vmem:[#allocation80_spill] sm:$0xff]  ;;  %v4379_v48 = vld [vmem:[#allocation83_spill] sm:$0xff]  ;;  %v1126_v55 = vpop.permute.xlu1 %1125 }
 0x16a   :  { %v2615_v23 = vpack.c.bf16 %v1444_v59, %v1441_v36  ;;  %v959_v19 = vmul.f32 %v3965_v58, %v4373_v14  ;;  %v960_v62 = vmul.f32 %v3965_v58, %v4374_v25  ;;  %v1160_v30 = vmul.f32 %v1121_v7, %v320_v38  ;;  %v1445_v17 = vld [vmem:[#allocation8 + $0x420] sm:$0xff]  ;;  %v1450_v53 = vld [vmem:[#allocation8 + $0x448] sm:$0xff]  ;;  %v323_v42 = vld [vmem:[#allocation7 + $0xf0] sm:$0xff] }
 0x16b   :  { %v3987_v18 = vadd.f32 %v1012_v29, %v928_v56  ;;  %v827_v61 = vrot.slane %v4375_v37, 4  ;;  %v1161_v20 = vmul.f32 %v1121_v7, %v321_v24  ;;  %v1162_v50 = vmul.f32 %v1121_v7, %v322_v63  ;;  %2558 = vmatpush1.bf16.msra.mxu0 %v2557_v3  ;;  %v1447_v29 = vld [vmem:[#allocation8 + $0x430] sm:$0xff]  ;;  %v4378_v15 = vld [vmem:[#allocation82_spill] sm:$0xff]  ;;  %v324_v24 = vld [vmem:[#allocation7 + $0xf8] sm:$0xff] }
 0x16c   :  { %v3990_v1 = vadd.f32 %v1063_v31, %v964_v26  ;;  %2616 = vmatpush3.bf16.msra.mxu1 %v2615_v23  ;;  %v1196_v22 = vmul.f32 %v1121_v7, %v356_v43  ;;  %v1197_v40 = vmul.f32 %v1121_v7, %v357_v0  ;;  %v1198_v2 = vmul.f32 %v1121_v7, %v358_v6  ;;  %v3997_v63 = vld [vmem:[#allocation2 + $0x118] sm:$0xff]  ;;  %v325_v43 = vld [vmem:[#allocation7 + $0x100] sm:$0xff]  ;;  %v1455_v41 = vld [vmem:[#allocation8 + $0x470] sm:$0xff] }
 0x16d   :  { %v926_v58 = vmul.f32 %v887_v45, %v4376_v35  ;;  %2617 = vmatprep.subr.bf16.mxu1 %v4326_v12  ;;  %v927_v9 = vmul.f32 %v887_v45, %v4377_v27  ;;  %v962_v13 = vmul.f32 %v887_v45, %v4378_v15  ;;  %v963_v31 = vmul.f32 %v887_v45, %v4379_v48  ;;  %v1452_v6 = vld [vmem:[#allocation8 + $0x458] sm:$0xff]  ;;  %v2799_v35 = vld [vmem:[#allocation2 + $0x100] sm:$0xff] }
 0x16e   :  { %v2559_v10 = vpack.c.bf16 %v1449_v51, %v1446_v52  ;;  %v978_v36 = vadd.f32 %v977_v21, %v923_v54  ;;  %v995_v59 = vadd.f32 %v994_v39, %v924_v60  ;;  %v1029_v38 = vadd.f32 %v1028_v34, %v959_v19  ;;  %v359_v21 = vld [vmem:[#allocation7 + $0x210] sm:$0xff]  ;;  %v360_v39 = vld [vmem:[#allocation7 + $0x218] sm:$0xff]  ;;  %v361_v34 = vld [vmem:[#allocation7 + $0x220] sm:$0xff] }
 0x16f   :  { %v2561_v7 = vpack.c.bf16 %v1448_v8, %v1445_v17  ;;  %v1046_v46 = vadd.f32 %v1045_v32, %v960_v62  ;;  %v1213_v56 = vadd.f32 %v1212_v5, %v1160_v30  ;;  %v1230_v44 = vadd.f32 %v1229_v11, %v1161_v20  ;;  %v892_v11 = vpop.permute.xlu0 %891  ;;  %v220_v14 = vld [vmem:[#allocation2 + $0x238] sm:$0xff]  ;;  %v326_v51 = vld [vmem:[#allocation7 + $0x108] sm:$0xff]  ;;  %v327_v20 = vld [vmem:[#allocation7 + $0x110] sm:$0xff]  ;;  %v1131_v17 = vpop.permute.xlu1 %1130 }
 0x170   :  { %2560 = vmatprep.subr.bf16.mxu0 %v2559_v10  ;;  %v2618_v0 = vpack.c.bf16 %v1450_v53, %v1447_v29  ;;  %v1247_v26 = vadd.f32 %v1246_v33, %v1162_v50  ;;  %v1264_v45 = vadd.f32 %v1263_v4, %v1196_v22  ;;  %v1281_v3 = vadd.f32 %v1280_v16, %v1197_v40  ;;  %v4380_v16 = vld [vmem:[#allocation81_spill] sm:$0xff]  ;;  %v4382_v40 = vld [vmem:[#allocation87_spill] sm:$0xff]  ;;  %v4383_v15 = vld [vmem:[#allocation88_spill] sm:$0xff] }
 0x171   :  { %v1298_v23 = vadd.f32 %v1297_v47, %v1198_v2  ;;  %2562 = vmatpush1.bf16.msra.mxu0 %v2561_v7  ;;  %v3999_v54 = vadd.f32 %v978_v36, %v926_v58  ;;  %v4001_v60 = vadd.f32 %v995_v59, %v927_v9  ;;  %v4003_v32 = vadd.f32 %v1029_v38, %v962_v13  ;;  %v328_v50 = vld [vmem:[#allocation7 + $0x118] sm:$0xff]  ;;  %v362_v29 = vld [vmem:[#allocation7 + $0x228] sm:$0xff]  ;;  %v363_v53 = vld [vmem:[#allocation7 + $0x230] sm:$0xff] }
 0x172   :  { %v4005_v5 = vadd.f32 %v1046_v46, %v963_v31  ;;  %2619 = vmatpush3.bf16.msra.mxu1 %v2618_v0  ;;  %v1163_v19 = vmul.f32 %v1126_v55, %v323_v42  ;;  %v1164_v33 = vmul.f32 %v1126_v55, %v324_v24  ;;  %v2563_v4 = vpack.c.bf16 %v1455_v41, %v1452_v6  ;;  %v4381_v8 = vld [vmem:[#allocation85_spill] sm:$0xff]  ;;  %v4385_v36 = vld [vmem:[#allocation84_spill] sm:$0xff]  ;;  %v4386_v7 = vld [vmem:[#allocation86_spill] sm:$0xff] }
 0x173   :  { %2620 = vmatprep.subr.bf16.mxu1 %v4326_v12  ;;  %v460_v47 = vmul.f32 %v4380_v16, %v3997_v63  ;;  %v1165_v25 = vmul.f32 %v1126_v55, %v325_v43  ;;  %v1199_v62 = vmul.f32 %v1126_v55, %v359_v21  ;;  %v1200_v30 = vmul.f32 %v1126_v55, %v360_v39  ;;  %v364_v27 = vld [vmem:[#allocation7 + $0x238] sm:$0xff]  ;;  %v897_v21 = vpop.permute.xlu0 %896  ;;  %v1451_v39 = vld [vmem:[#allocation8 + $0x450] sm:$0xff] }
 0x174   :  { %v1201_v52 = vmul.f32 %v1126_v55, %v361_v34  ;;  %v929_v22 = vmul.f32 %v892_v11, %v4381_v8  ;;  %v930_v2 = vmul.f32 %v892_v11, %v4382_v40  ;;  %v931_v58 = vmul.f32 %v2799_v35, %v892_v11  ;;  %2564 = vmatprep.subr.bf16.mxu0 %v2563_v4  ;;  %v4384_v48 = vld [vmem:[#allocation89_spill] sm:$0xff] }
 0x175   :  { %v496_v9 = vmul.f32 %v4380_v16, %v220_v14  ;;  %v965_v13 = vmul.f32 %v892_v11, %v4383_v15  ;;  %v966_v31 = vmul.f32 %v892_v11, %v4384_v48  ;;  %v2800_v55 = vld [vmem:[#allocation2 + $0x220] sm:$0xff]  ;;  %v541_v59 = vadd.f32 %v4385_v36, %v460_v47  ;;  %v1454_v47 = vld [vmem:[#allocation8 + $0x468] sm:$0xff] }
 0x176   :  { %v967_v10 = vmul.f32 %v2800_v55, %v892_v11  ;;  %v1166_v38 = vmul.f32 %v1131_v17, %v326_v51  ;;  %v1167_v42 = vmul.f32 %v1131_v17, %v327_v20  ;;  %v4016_v24 = vmul.f32 %v1131_v17, %v328_v50  ;;  %v1453_v51 = vld [vmem:[#allocation8 + $0x460] sm:$0xff]  ;;  %v1456_v20 = vld [vmem:[#allocation8 + $0x478] sm:$0xff]  ;;  %v1791_v15 = vld [vmem:[#allocation10 + $0x8] sm:$0xff] }
 0x177   :  { %v592_v46 = vadd.f32 %v4386_v7, %v496_v9  ;;  %v1202_v43 = vmul.f32 %v1131_v17, %v362_v29  ;;  %v1203_v0 = vmul.f32 %v1131_v17, %v363_v53  ;;  %v4019_v6 = vmul.f32 %v1131_v17, %v364_v27  ;;  %v1794_v48 = vld [vmem:[#allocation10 + $0x20] sm:$0xff]  ;;  %v2802_v55 = vld [vmem:[#allocation2 + $0x228] sm:$0xff] }
 0x178   :  { %v1214_v41 = vadd.f32 %v1213_v56, %v1163_v19  ;;  %v1231_v34 = vadd.f32 %v1230_v44, %v1164_v33  ;;  %v4021_v4 = vadd.f32 %v1247_v26, %v1165_v25  ;;  %v1265_v16 = vadd.f32 %v1264_v45, %v1199_v62  ;;  %v2801_v26 = vld [vmem:[#allocation2 + $0x108] sm:$0xff] }
 0x179   :  { %v1014_v11 = vadd.f32 %v3987_v18, %v931_v58  ;;  %v1282_v50 = vadd.f32 %v1281_v3, %v1200_v30  ;;  %v542_v8 = vrot.slane %v541_v59, 4  ;;  %v593_v40 = vrot.slane %v592_v46, 4  ;;  %v4387_v25 = vld [vmem:[#allocation91_spill] sm:$0xff]  ;;  %v4388_v58 = vld [vmem:[#allocation92_spill] sm:$0xff] }
 0x17a   :  { %v1065_v35 = vadd.f32 %v3990_v1, %v967_v10  ;;  %v4025_v29 = vadd.f32 %v1214_v41, %v1166_v38  ;;  %v1299_v17 = vadd.f32 %v1298_v23, %v1201_v52  ;;  %v934_v56 = vmul.f32 %v897_v21, %v3997_v63  ;;  %v1843_v7 = vld [vmem:[#allocation10 + $0x1a8] sm:$0xff] }
 0x17b   :  { %v970_v19 = vmul.f32 %v897_v21, %v220_v14  ;;  %v4028_v44 = vadd.f32 %v1231_v34, %v1167_v42  ;;  %v932_v45 = vmul.f32 %v2801_v26, %v897_v21  ;;  %v2565_v33 = vpack.c.bf16 %v1454_v47, %v1451_v39  ;;  %v1792_v26 = vld [vmem:[#allocation10 + $0x10] sm:$0xff] }
 0x17c   :  { %v2621_v18 = vpack.c.bf16 %v1456_v20, %v1453_v51  ;;  %v933_v62 = vmul.f32 %v897_v21, %v4387_v25  ;;  %v969_v3 = vmul.f32 %v897_v21, %v4388_v58  ;;  %v4032_v30 = vadd.f32 %v1014_v11, %v934_v56  ;;  %v1797_v58 = vld [vmem:[#allocation10 + $0x38] sm:$0xff] }
 0x17d   :  { %v4034_v53 = vadd.f32 %v1065_v35, %v970_v19  ;;  %v4036_v1 = vadd.f32 %v1282_v50, %v1203_v0  ;;  %2566 = vmatpush1.bf16.msra.mxu0 %v2565_v33  ;;  %v543_v63 = vadd.f32 %v542_v8, %v541_v59  ;;  %v594_v23 = vadd.f32 %v593_v40, %v592_v46  ;;  %v1840_v59 = vld [vmem:[#allocation10 + $0x190] sm:$0xff] }
 0x17e   :  { %2622 = vmatpush3.bf16.msra.mxu1 %v2621_v18  ;;  %v980_v14 = vadd.f32 %v3999_v54, %v929_v22  ;;  %v997_v52 = vadd.f32 %v4001_v60, %v930_v2  ;;  %v1031_v27 = vadd.f32 %v4003_v32, %v965_v13  ;;  %v1048_v9 = vadd.f32 %v4005_v5, %v966_v31 }
 0x17f   :  { %v968_v10 = vmul.f32 %v2802_v55, %v897_v21  ;;  %v544_v36 = vrot.slane %v543_v63, 2  ;;  %v595_v38 = vrot.slane %v594_v23, 2  ;;  %v777_v42 = vadd.f32 %v776_v57, %v3701_v28 }
 0x180   :  { %v981_v46 = vadd.f32 %v980_v14, %v932_v45  ;;  %v998_v54 = vadd.f32 %v997_v52, %v933_v62  ;;  %v1049_v22 = vadd.f32 %v1048_v9, %v969_v3  ;;  %v828_v60 = vadd.f32 %v827_v61, %v4375_v37  ;;  %v1795_v62 = vld [vmem:[#allocation10 + $0x28] sm:$0xff]  ;;  %v1800_v3 = vld [vmem:[#allocation10 + $0x50] sm:$0xff] }
 0x181   :  { %v545_v32 = vadd.f32 %v544_v36, %v543_v63  ;;  %v596_v5 = vadd.f32 %v595_v38, %v594_v23  ;;  %v778_v2 = vrot.slane %v777_v42, 2  ;;  %v2623_v13 = vpack.c.bf16 %v1794_v48, %v1791_v15  ;;  %v1846_v23 = vld [vmem:[#allocation10 + $0x1c0] sm:$0xff]  ;;  %v1796_v52 = vld [vmem:[#allocation10 + $0x30] sm:$0xff]  ;;  %v1801_v38 = vld [vmem:[#allocation10 + $0x58] sm:$0xff] }
 0x182   :  { %v1216_v31 = vrot.slane %v4025_v29, 4  ;;  %v4049_v0 = vadd.f32 %v1265_v16, %v1202_v43  ;;  %v829_v41 = vrot.slane %v828_v60, 2  ;;  %v2719_v21 = vpack.c.bf16 %v1843_v7, %v1840_v59  ;;  %v1790_v43 = vld [vmem:[#allocation10] sm:$0xff]  ;;  %v1793_v16 = vld [vmem:[#allocation10 + $0x18] sm:$0xff] }
 0x183   :  { %v1032_v28 = vadd.f32 %v1031_v27, %v968_v10  ;;  %v546_v57 = vrot.slane %v545_v32, 1  ;;  %v597_v39 = vrot.slane %v596_v5, 1  ;;  %v779_v34 = vadd.f32 %v778_v2, %v777_v42  ;;  %2624 = vmatprep.subr.bf16.mxu1 %v2623_v13  ;;  %v1799_v27 = vld [vmem:[#allocation10 + $0x48] sm:$0xff]  ;;  %v1798_v36 = vld [vmem:[#allocation10 + $0x40] sm:$0xff] }
 0x184   :  { %v1233_v11 = vrot.slane %v4028_v44, 4  ;;  %v982_v47 = vrot.slane %v981_v46, 4  ;;  %v999_v51 = vrot.slane %v998_v54, 4  ;;  %v830_v37 = vadd.f32 %v829_v41, %v828_v60  ;;  %2720 = vmatprep.subr.bf16.mxu0 %v2719_v21  ;;  %v1803_v42 = vld [vmem:[#allocation10 + $0x68] sm:$0xff]  ;;  %v1852_v60 = vld [vmem:[#allocation10 + $0x1f0] sm:$0xff]  ;;  %v1802_v41 = vld [vmem:[#allocation10 + $0x60] sm:$0xff] }
 0x185   :  { %v1284_v61 = vrot.slane %v4036_v1, 4  ;;  %v1050_v20 = vrot.slane %v1049_v22, 4  ;;  %v547_v50 = vadd.f32 %v546_v57, %v545_v32  ;;  %v780_v8 = vrot.slane %v779_v34, 1  ;;  %v1855_v32 = vld [vmem:[#allocation10 + $0x208] sm:$0xff]  ;;  %v1805_v21 = vld [vmem:[#allocation10 + $0x78] sm:$0xff]  ;;  %v1804_v57 = vld [vmem:[#allocation10 + $0x70] sm:$0xff] }
 0x186   :  { %v4055_v40 = vadd.f32 %v4021_v4, %v4016_v24  ;;  %v4058_v35 = vadd.f32 %v1299_v17, %v4019_v6  ;;  %v598_v56 = vadd.f32 %v597_v39, %v596_v5  ;;  %v831_v19 = vrot.slane %v830_v37, 1  ;;  %v1849_v6 = vld [vmem:[#allocation10 + $0x1d8] sm:$0xff] }
 0x187   :  { %v4061_v45 = vadd.f32 %v1216_v31, %v4025_v29  ;;  %v1267_v33 = vrot.slane %v4049_v0, 4  ;;  %v1033_v18 = vrot.slane %v1032_v28, 4  ;;  %v781_v25 = vadd.f32 %v780_v8, %v779_v34  ;;  %v1858_v8 = vld [vmem:[#allocation10 + $0x220] sm:$0xff] }
 0x188   :  { %v4064_v63 = vadd.f32 %v982_v47, %v981_v46  ;;  %v832_v24 = vadd.f32 %v831_v19, %v830_v37  ;;  %v2625_v4 = vpack.c.bf16 %v1793_v16, %v1790_v43  ;;  %v1000_v17 = vadd.f32 %v999_v51, %v998_v54  ;;  %v1806_v46 = vld [vmem:[#allocation10 + $0x80] sm:$0xff]  ;;  %v1861_v43 = vld [vmem:[#allocation10 + $0x238] sm:$0xff] }
 0x189   :  { %v835_v14 = vadd.f32 %v781_v25, %v547_v50  ;;  %v1051_v9 = vadd.f32 %v1050_v20, %v1049_v22  ;;  %v1234_v29 = vadd.f32 %v1233_v11, %v4028_v44  ;;  %v1285_v15 = vadd.f32 %v1284_v61, %v4036_v1  ;;  %v1809_v61 = vld [vmem:[#allocation10 + $0x98] sm:$0xff]  ;;  %v1812_v20 = vld [vmem:[#allocation10 + $0xb0] sm:$0xff] }
 0x18a   :  { %v838_v48 = vadd.f32 %v832_v24, %v598_v56  ;;  %v2721_v55 = vpack.c.bf16 %v1795_v62, %v1792_v26  ;;  %v2627_v10 = vpack.c.bf16 %v1800_v3, %v1797_v58  ;;  %v1001_v59 = vrot.slane %v1000_v17, 2 }
 0x18b   :  { %v2723_v7 = vpack.c.bf16 %v1849_v6, %v1846_v23  ;;  %v1052_v54 = vrot.slane %v1051_v9, 2  ;;  %v1235_v5 = vrot.slane %v1234_v29, 2  ;;  %v1286_v2 = vrot.slane %v1285_v15, 2 }
 0x18c   :  { %v1034_v13 = vadd.f32 %v1033_v18, %v1032_v28  ;;  %v1483_v22 = vsel %vm1480_vm0, %v838_v48, %v835_v14  ;;  %v2629_v44 = vpack.c.bf16 %v1799_v27, %v1796_v52  ;;  %v1002_v31 = vadd.f32 %v1001_v59, %v1000_v17  ;;  %v1807_v28 = vld [vmem:[#allocation10 + $0x88] sm:$0xff]  ;;  %v1808_v52 = vld [vmem:[#allocation10 + $0x90] sm:$0xff] }
 0x18d   :  { %v1250_v1 = vrot.slane %v4055_v40, 4  ;;  %1623 = vmatmul.mubr.f32.vlgmr.msra.gmra.mrb[0].mxu0 %v1483_v22  ;;  %2434 = vmatmul.mubr.f32.vlgmr.msra.gmra.mrb[2].mxu1 %v1483_v22  ;;  %v1053_v39 = vadd.f32 %v1052_v54, %v1051_v9  ;;  %v1236_v34 = vadd.f32 %v1235_v5, %v1234_v29  ;;  %v1287_v11 = vadd.f32 %v1286_v2, %v1285_v15  ;;  %v1811_v27 = vld [vmem:[#allocation10 + $0xa8] sm:$0xff]  ;;  %v1864_v59 = vld [vmem:[#allocation10 + $0x250] sm:$0xff] }
 0x18e   :  { %2626 = vmatpush1.bf16.msra.mxu1 %v2625_v4  ;;  %2722 = vmatpush3.bf16.msra.mxu0 %v2721_v55  ;;  %v2725_v47 = vpack.c.bf16 %v1801_v38, %v1798_v36  ;;  %v2631_v51 = vpack.c.bf16 %v1806_v46, %v1803_v42  ;;  %v2727_v37 = vpack.c.bf16 %v1855_v32, %v1852_v60  ;;  %v1003_v50 = vrot.slane %v1002_v31, 1  ;;  %v1815_v29 = vld [vmem:[#allocation10 + $0xc8] sm:$0xff]  ;;  %v1818_v42 = vld [vmem:[#allocation10 + $0xe0] sm:$0xff] }
 0x18f   :  { %2628 = vmatprep.subr.bf16.mxu1 %v2627_v10  ;;  %2724 = vmatprep.subr.bf16.mxu0 %v2723_v7  ;;  %v1054_v16 = vrot.slane %v1053_v39, 1  ;;  %v1237_v56 = vrot.slane %v1236_v34, 1  ;;  %v1288_v19 = vrot.slane %v1287_v11, 1  ;;  %v984_v26 = vrot.slane %v4064_v63, 2  ;;  %v1867_v7 = vld [vmem:[#allocation10 + $0x268] sm:$0xff] }
 0x190   :  { %v1268_v18 = vadd.f32 %v1267_v33, %v4049_v0  ;;  %v1016_v25 = vrot.slane %v4032_v30, 4  ;;  %v1067_v62 = vrot.slane %v4034_v53, 4  ;;  %v1004_v58 = vadd.f32 %v1003_v50, %v1002_v31  ;;  %v1810_v0 = vld [vmem:[#allocation10 + $0xa0] sm:$0xff]  ;;  %v1813_v33 = vld [vmem:[#allocation10 + $0xb8] sm:$0xff] }
 0x191   :  { %v2633_v3 = vpack.c.bf16 %v1805_v21, %v1802_v41  ;;  %v1055_v24 = vadd.f32 %v1054_v16, %v1053_v39  ;;  %v1238_v4 = vadd.f32 %v1237_v56, %v1236_v34  ;;  %v1289_v23 = vadd.f32 %v1288_v19, %v1287_v11  ;;  %v1821_v39 = vld [vmem:[#allocation10 + $0xf8] sm:$0xff]  ;;  %v1820_v16 = vld [vmem:[#allocation10 + $0xf0] sm:$0xff]  ;;  %v1823_v56 = vld [vmem:[#allocation10 + $0x108] sm:$0xff] }
 0x192   :  { %2630 = vmatpush1.bf16.msra.mxu1 %v2629_v44  ;;  %2726 = vmatpush3.bf16.msra.mxu0 %v2725_v47  ;;  %v2729_v6 = vpack.c.bf16 %v1807_v28, %v1804_v57  ;;  %v2635_v17 = vpack.c.bf16 %v1812_v20, %v1809_v61  ;;  %v2731_v14 = vpack.c.bf16 %v1861_v43, %v1858_v8  ;;  %v1035_v9 = vrot.slane %v1034_v13, 2  ;;  %v1814_v44 = vld [vmem:[#allocation10 + $0xc0] sm:$0xff]  ;;  %v1816_v57 = vld [vmem:[#allocation10 + $0xd0] sm:$0xff] }
 0x193   :  { %2632 = vmatprep.subr.bf16.mxu1 %v2631_v51  ;;  %2728 = vmatprep.subr.bf16.mxu0 %v2727_v37  ;;  %v1308_v15 = vadd.f32 %v1238_v4, %v1004_v58  ;;  %v1311_v48 = vadd.f32 %v1289_v23, %v1055_v24  ;;  %v985_v55 = vadd.f32 %v984_v26, %v4064_v63  ;;  %v1218_v10 = vrot.slane %v4061_v45, 2  ;;  %v1870_v47 = vld [vmem:[#allocation10 + $0x280] sm:$0xff]  ;;  %v1873_v51 = vld [vmem:[#allocation10 + $0x298] sm:$0xff]  ;;  %v1876_v24 = vld [vmem:[#allocation10 + $0x2b0] sm:$0xff] }
 0x194   :  { %v1301_v36 = vrot.slane %v4058_v35, 4  ;;  %v4078_v38 = vadd.f32 %v1016_v25, %v4032_v30  ;;  %v1036_v46 = vadd.f32 %v1035_v9, %v1034_v13  ;;  %v1269_v60 = vrot.slane %v1268_v18, 2  ;;  %v1817_v30 = vld [vmem:[#allocation10 + $0xd8] sm:$0xff]  ;;  %v1879_v4 = vld [vmem:[#allocation10 + $0x2c8] sm:$0xff] }
 0x195   :  { %v4081_v32 = vadd.f32 %v1067_v62, %v4034_v53  ;;  %v1958_v54 = vsel %vm1480_vm0, %v1311_v48, %v1308_v15  ;;  %v986_v5 = vrot.slane %v985_v55, 1  ;;  %v1219_v63 = vadd.f32 %v1218_v10, %v4061_v45  ;;  %v1819_v53 = vld [vmem:[#allocation10 + $0xe8] sm:$0xff]  ;;  %v1824_v45 = vld [vmem:[#allocation10 + $0x110] sm:$0xff]  ;;  %v1822_v62 = vld [vmem:[#allocation10 + $0x100] sm:$0xff] }
 0x196   :  { %2634 = vmatpush1.bf16.msra.mxu1 %v2633_v3  ;;  %2730 = vmatpush3.bf16.msra.mxu0 %v2729_v6  ;;  %v2637_v2 = vpack.c.bf16 %v1811_v27, %v1808_v52  ;;  %v2733_v22 = vpack.c.bf16 %v1813_v33, %v1810_v0  ;;  %v1037_v31 = vrot.slane %v1036_v46, 1  ;;  %v1270_v41 = vadd.f32 %v1269_v60, %v1268_v18  ;;  %v1825_v58 = vld [vmem:[#allocation10 + $0x118] sm:$0xff]  ;;  %v1827_v3 = vld [vmem:[#allocation10 + $0x128] sm:$0xff]  ;;  %v1828_v15 = vld [vmem:[#allocation10 + $0x130] sm:$0xff] }
 0x197   :  { %2636 = vmatprep.subr.bf16.mxu1 %v2635_v17  ;;  %2732 = vmatprep.subr.bf16.mxu0 %v2731_v14  ;;  %v2639_v13 = vpack.c.bf16 %v1818_v42, %v1815_v29  ;;  %v2735_v21 = vpack.c.bf16 %v1867_v7, %v1864_v59  ;;  %v987_v34 = vadd.f32 %v986_v5, %v985_v55  ;;  %v1220_v11 = vrot.slane %v1219_v63, 1  ;;  %v1826_v14 = vld [vmem:[#allocation10 + $0x120] sm:$0xff]  ;;  %v1829_v52 = vld [vmem:[#allocation10 + $0x138] sm:$0xff]  ;;  %v1831_v48 = vld [vmem:[#allocation10 + $0x148] sm:$0xff] }
 0x198   :  { %2027 = vmatprep.mubr.f32.mxu1 %v1958_v54  ;;  %2169 = vmatprep.mubr.f32.mxu0 %v1958_v54  ;;  %v1038_v37 = vadd.f32 %v1037_v31, %v1036_v46  ;;  %v1271_v28 = vrot.slane %v1270_v41, 1  ;;  %v1251_v61 = vadd.f32 %v1250_v1, %v4055_v40  ;;  %v1302_v20 = vadd.f32 %v1301_v36, %v4058_v35  ;;  %v1830_v1 = vld [vmem:[#allocation10 + $0x140] sm:$0xff]  ;;  %v1833_v55 = vld [vmem:[#allocation10 + $0x158] sm:$0xff]  ;;  %v1836_v42 = vld [vmem:[#allocation10 + $0x170] sm:$0xff] }
 0x199   :  { %v1221_v50 = vadd.f32 %v1220_v11, %v1219_v63  ;;  %v2641_v8 = vpack.c.bf16 %v1817_v30, %v1814_v44  ;;  %v2737_v43 = vpack.c.bf16 %v1819_v53, %v1816_v57  ;;  %v1018_v26 = vrot.slane %v4078_v38, 2  ;;  %v1882_v59 = vld [vmem:[#allocation10 + $0x2e0] sm:$0xff]  ;;  %v1885_v7 = vld [vmem:[#allocation10 + $0x2f8] sm:$0xff]  ;;  %v1839_v53 = vld [vmem:[#allocation10 + $0x188] sm:$0xff] }
 0x19a   :  { %2638 = vmatpush1.bf16.msra.mxu1 %v2637_v2  ;;  %2734 = vmatpush3.bf16.msra.mxu0 %v2733_v22  ;;  %v1272_v19 = vadd.f32 %v1271_v28, %v1270_v41  ;;  %v2643_v18 = vpack.c.bf16 %v1824_v45, %v1821_v39  ;;  %v2739_v25 = vpack.c.bf16 %v1873_v51, %v1870_v47  ;;  %v1069_v35 = vrot.slane %v4081_v32, 2  ;;  %v1832_v2 = vld [vmem:[#allocation10 + $0x150] sm:$0xff]  ;;  %v1834_v41 = vld [vmem:[#allocation10 + $0x160] sm:$0xff] }
 0x19b   :  { %2640 = vmatprep.subr.bf16.mxu1 %v2639_v13  ;;  %2736 = vmatprep.subr.bf16.mxu0 %v2735_v21  ;;  %v1307_v40 = vadd.f32 %v1221_v50, %v987_v34  ;;  %v2645_v6 = vpack.c.bf16 %v1823_v56, %v1820_v16  ;;  %v2741_v17 = vpack.c.bf16 %v1825_v58, %v1822_v62  ;;  %v1252_v0 = vrot.slane %v1251_v61, 2  ;;  %v1837_v13 = vld [vmem:[#allocation10 + $0x178] sm:$0xff]  ;;  %v1842_v39 = vld [vmem:[#allocation10 + $0x1a0] sm:$0xff]  ;;  %v1891_v50 = vld [vmem:[#allocation10 + $0x328] sm:$0xff] }
 0x19c   :  { %v1310_v23 = vadd.f32 %v1272_v19, %v1038_v37  ;;  %v1019_v9 = vadd.f32 %v1018_v26, %v4078_v38  ;;  %v2647_v33 = vpack.c.bf16 %v1830_v1, %v1827_v3  ;;  %v2743_v29 = vpack.c.bf16 %v1879_v4, %v1876_v24  ;;  %v1838_v51 = vld [vmem:[#allocation10 + $0x180] sm:$0xff]  ;;  %v1848_v16 = vld [vmem:[#allocation10 + $0x1d0] sm:$0xff]  ;;  %v1847_v62 = vld [vmem:[#allocation10 + $0x1c8] sm:$0xff] }
 0x19d   :  { %v1070_v10 = vadd.f32 %v1069_v35, %v4081_v32  ;;  %v1303_v36 = vrot.slane %v1302_v20, 2  ;;  %v1253_v60 = vadd.f32 %v1252_v0, %v1251_v61  ;;  %v2649_v38 = vpack.c.bf16 %v1829_v52, %v1826_v14  ;;  %v1835_v32 = vld [vmem:[#allocation10 + $0x168] sm:$0xff]  ;;  %v1841_v61 = vld [vmem:[#allocation10 + $0x198] sm:$0xff]  ;;  %v1894_v58 = vld [vmem:[#allocation10 + $0x340] sm:$0xff] }
 0x19e   :  { %2642 = vmatpush1.bf16.msra.mxu1 %v2641_v8  ;;  %2738 = vmatpush3.bf16.msra.mxu0 %v2737_v43  ;;  %v4092_v27 = vsel %vm1480_vm0, %v1310_v23, %v1307_v40  ;;  %v1020_v46 = vrot.slane %v1019_v9, 1  ;;  %v2745_v63 = vpack.c.bf16 %v1831_v48, %v1828_v15  ;;  %v2651_v30 = vpack.c.bf16 %v1836_v42, %v1833_v55  ;;  %v1845_v43 = vld [vmem:[#allocation10 + $0x1b8] sm:$0xff]  ;;  %v1851_v40 = vld [vmem:[#allocation10 + $0x1e8] sm:$0xff]  ;;  %v1854_v35 = vld [vmem:[#allocation10 + $0x200] sm:$0xff] }
 0x19f   :  { %2644 = vmatprep.subr.bf16.mxu1 %v2643_v18  ;;  %2740 = vmatprep.subr.bf16.mxu0 %v2739_v25  ;;  %v1071_v54 = vrot.slane %v1070_v10, 1  ;;  %v1304_v5 = vadd.f32 %v1303_v36, %v1302_v20  ;;  %v1254_v44 = vrot.slane %v1253_v60, 1  ;;  %v2747_v31 = vpack.c.bf16 %v1885_v7, %v1882_v59  ;;  %v1888_v20 = vld [vmem:[#allocation10 + $0x310] sm:$0xff]  ;;  %v1897_v3 = vld [vmem:[#allocation10 + $0x358] sm:$0xff]  ;;  %v1850_v4 = vld [vmem:[#allocation10 + $0x1e0] sm:$0xff] }
 0x1a0   :  { %v1021_v22 = vadd.f32 %v1020_v46, %v1019_v9  ;;  %v2653_v45 = vpack.c.bf16 %v1835_v32, %v1832_v2  ;;  %v2749_v47 = vpack.c.bf16 %v1837_v13, %v1834_v41  ;;  %v2655_v28 = vpack.c.bf16 %v1842_v39, %v1839_v53  ;;  %v1844_v18 = vld [vmem:[#allocation10 + $0x1b0] sm:$0xff]  ;;  %v1903_v14 = vld [vmem:[#allocation10 + $0x388] sm:$0xff]  ;;  %v1857_v52 = vld [vmem:[#allocation10 + $0x218] sm:$0xff] }
 0x1a1   :  { %v1072_v21 = vadd.f32 %v1071_v54, %v1070_v10  ;;  %v1305_v57 = vrot.slane %v1304_v5, 1  ;;  %v1255_v34 = vadd.f32 %v1254_v44, %v1253_v60  ;;  %v2657_v19 = vpack.c.bf16 %v1841_v61, %v1838_v51  ;;  %v1860_v9 = vld [vmem:[#allocation10 + $0x230] sm:$0xff]  ;;  %v1859_v48 = vld [vmem:[#allocation10 + $0x228] sm:$0xff]  ;;  %v1906_v55 = vld [vmem:[#allocation10 + $0x3a0] sm:$0xff] }
 0x1a2   :  { %2646 = vmatpush1.bf16.msra.mxu1 %v2645_v6  ;;  %2742 = vmatpush3.bf16.msra.mxu0 %v2741_v17  ;;  %v2752_v26 = vpack.c.bf16 %v1891_v50, %v1888_v20  ;;  %v2659_v25 = vpack.c.bf16 %v1848_v16, %v1845_v43  ;;  %v2661_v1 = vpack.c.bf16 %v1847_v62, %v1844_v18  ;;  %v1853_v6 = vld [vmem:[#allocation10 + $0x1f8] sm:$0xff]  ;;  %v1900_v17 = vld [vmem:[#allocation10 + $0x370] sm:$0xff]  ;;  %v1863_v36 = vld [vmem:[#allocation10 + $0x248] sm:$0xff] }
 0x1a3   :  { %2648 = vmatprep.subr.bf16.mxu1 %v2647_v33  ;;  %2744 = vmatprep.subr.bf16.mxu0 %v2743_v29  ;;  %v1306_v11 = vadd.f32 %v1305_v57, %v1304_v5  ;;  %v1309_v37 = vadd.f32 %v1255_v34, %v1021_v22  ;;  %v2755_v24 = vpack.c.bf16 %v1897_v3, %v1894_v58  ;;  %v1856_v29 = vld [vmem:[#allocation10 + $0x210] sm:$0xff]  ;;  %v1909_v10 = vld [vmem:[#allocation10 + $0x3b8] sm:$0xff]  ;;  %v1866_v42 = vld [vmem:[#allocation10 + $0x260] sm:$0xff] }
 0x1a4   :  { %v2663_v23 = vpack.c.bf16 %v1854_v35, %v1851_v40  ;;  %v2665_v0 = vpack.c.bf16 %v1853_v6, %v1850_v4  ;;  %v2758_v33 = vpack.c.bf16 %v1903_v14, %v1900_v17  ;;  %v2667_v15 = vpack.c.bf16 %v1860_v9, %v1857_v52  ;;  %v1862_v46 = vld [vmem:[#allocation10 + $0x240] sm:$0xff]  ;;  %v1865_v54 = vld [vmem:[#allocation10 + $0x258] sm:$0xff]  ;;  %v1912_v5 = vld [vmem:[#allocation10 + $0x3d0] sm:$0xff] }
 0x1a5   :  { %v1312_v8 = vadd.f32 %v1306_v11, %v1072_v21  ;;  %v2669_v59 = vpack.c.bf16 %v1859_v48, %v1856_v29  ;;  %v2761_v7 = vpack.c.bf16 %v1909_v10, %v1906_v55  ;;  %v2671_v60 = vpack.c.bf16 %v1866_v42, %v1863_v36  ;;  %v1872_v2 = vld [vmem:[#allocation10 + $0x290] sm:$0xff]  ;;  %v1871_v32 = vld [vmem:[#allocation10 + $0x288] sm:$0xff]  ;;  %v1918_v41 = vld [vmem:[#allocation10 + $0x400] sm:$0xff] }
 0x1a6   :  { %2650 = vmatpush1.bf16.msra.mxu1 %v2649_v38  ;;  %2746 = vmatpush3.bf16.msra.mxu0 %v2745_v63  ;;  %v1915_v38 = vld [vmem:[#allocation10 + $0x3e8] sm:$0xff]  ;;  %v1869_v63 = vld [vmem:[#allocation10 + $0x278] sm:$0xff]  ;;  %v2673_v22 = vpack.c.bf16 %v1865_v54, %v1862_v46  ;;  %v1878_v57 = vld [vmem:[#allocation10 + $0x2c0] sm:$0xff] }
 0x1a7   :  { %2652 = vmatprep.subr.bf16.mxu1 %v2651_v30  ;;  %2748 = vmatprep.subr.bf16.mxu0 %v2747_v31  ;;  %v4097_v56 = vsel %vm1480_vm0, %v1312_v8, %v1309_v37  ;;  %v2764_v44 = vpack.c.bf16 %v1915_v38, %v1912_v5  ;;  %v1868_v30 = vld [vmem:[#allocation10 + $0x270] sm:$0xff]  ;;  %v2675_v31 = vpack.c.bf16 %v1872_v2, %v1869_v63  ;;  %v1921_v13 = vld [vmem:[#allocation10 + $0x418] sm:$0xff]  ;;  %v1875_v21 = vld [vmem:[#allocation10 + $0x2a8] sm:$0xff] }
 0x1a8   :  { %v2677_v53 = vpack.c.bf16 %v1871_v32, %v1868_v30  ;;  %v2767_v39 = vpack.c.bf16 %v1921_v13, %v1918_v41  ;;  %v1874_v34 = vld [vmem:[#allocation10 + $0x2a0] sm:$0xff]  ;;  %v2679_v11 = vpack.c.bf16 %v1878_v57, %v1875_v21  ;;  %v1927_v51 = vld [vmem:[#allocation10 + $0x448] sm:$0xff]  ;;  %v1881_v37 = vld [vmem:[#allocation10 + $0x2d8] sm:$0xff] }
 0x1a9   :  { %v1880_v50 = vld [vmem:[#allocation10 + $0x2d0] sm:$0xff]  ;;  %v1883_v43 = vld [vmem:[#allocation10 + $0x2e8] sm:$0xff]  ;;  %v1930_v16 = vld [vmem:[#allocation10 + $0x460] sm:$0xff] }
 0x1aa   :  { %2654 = vmatpush1.bf16.msra.mxu1 %v2653_v45  ;;  %2750 = vmatpush3.bf16.msra.mxu0 %v2749_v47  ;;  %v1877_v45 = vld [vmem:[#allocation10 + $0x2b8] sm:$0xff]  ;;  %v1924_v47 = vld [vmem:[#allocation10 + $0x430] sm:$0xff]  ;;  %v1890_v18 = vld [vmem:[#allocation10 + $0x320] sm:$0xff] }
 0x1ab   :  { %2656 = vmatprep.subr.bf16.mxu1 %v2655_v28  ;;  %2751 = vmatprep.subr.bf16.mxu0 %v4326_v12  ;;  %v1884_v28 = vld [vmem:[#allocation10 + $0x2f0] sm:$0xff]  ;;  %v2681_v61 = vpack.c.bf16 %v1877_v45, %v1874_v34  ;;  %v2770_v20 = vpack.c.bf16 %v1927_v51, %v1924_v47  ;;  %v1886_v3 = vld [vmem:[#allocation10 + $0x300] sm:$0xff]  ;;  %v1889_v40 = vld [vmem:[#allocation10 + $0x318] sm:$0xff]  ;;  %v1459_v51 = vlaneseq }
 0x1ac   :  { %v2683_v8 = vpack.c.bf16 %v1884_v28, %v1881_v37  ;;  %v1893_v35 = vld [vmem:[#allocation10 + $0x338] sm:$0xff]  ;;  %v1895_v6 = vld [vmem:[#allocation10 + $0x348] sm:$0xff]  ;;  %v1902_v14 = vld [vmem:[#allocation10 + $0x380] sm:$0xff] }
 0x1ad   :  { %2170 = vmatmul.mubr.f32.vlgmr.msra.gmra.mrb[2].mxu0 %v4092_v27  ;;  %v1899_v17 = vld [vmem:[#allocation10 + $0x368] sm:$0xff]  ;;  %v1898_v9 = vld [vmem:[#allocation10 + $0x360] sm:$0xff]  ;;  %v1908_v29 = vld [vmem:[#allocation10 + $0x3b0] sm:$0xff]  ;;  %v1460_v37 = vshrl.u32 %v1459_v51, 7 }
 0x1ae   :  { %2658 = vmatpush1.bf16.msra.mxu1 %v2657_v19  ;;  %2753 = vmatpush3.bf16.msra.mxu0 %v2752_v26  ;;  %v1933_v19 = vld [vmem:[#allocation10 + $0x478] sm:$0xff]  ;;  %v1887_v26 = vld [vmem:[#allocation10 + $0x308] sm:$0xff]  ;;  %v2695_v52 = vpack.c.bf16 %v1902_v14, %v1899_v17  ;;  %v1904_v55 = vld [vmem:[#allocation10 + $0x390] sm:$0xff] }
 0x1af   :  { %2660 = vmatprep.subr.bf16.mxu1 %v2659_v25  ;;  %2754 = vmatprep.subr.bf16.mxu0 %v4326_v12  ;;  %v2685_v25 = vpack.c.bf16 %v1883_v43, %v1880_v50  ;;  %v2773_v62 = vpack.c.bf16 %v1933_v19, %v1930_v16  ;;  %v2687_v58 = vpack.c.bf16 %v1890_v18, %v1887_v26  ;;  %v1907_v10 = vld [vmem:[#allocation10 + $0x3a8] sm:$0xff]  ;;  %v1917_v46 = vld [vmem:[#allocation10 + $0x3f8] sm:$0xff]  ;;  %v1916_v38 = vld [vmem:[#allocation10 + $0x3f0] sm:$0xff]  ;;  %v1469_v28 = vsub.s32 2, %v1460_v37 }
 0x1b0   :  { %2468 = vmatprep.mubr.msk.f32.mxu0 %vm2977_vm1, %v2976_v49  ;;  %v1911_v36 = vld [vmem:[#allocation10 + $0x3c8] sm:$0xff]  ;;  %v2701_v42 = vpack.c.bf16 %v1907_v10, %v1904_v55  ;;  %v1925_v32 = vld [vmem:[#allocation10 + $0x438] sm:$0xff]  ;;  %v1932_v13 = vld [vmem:[#allocation10 + $0x470] sm:$0xff]  ;;  %v2978_v50 = vmov 1983009808   ;;  %v1465_v43 = vsub.s32 1, %v1460_v37 }
 0x1b1   :  { %v1919_v63 = vld [vmem:[#allocation10 + $0x408] sm:$0xff]  ;;  %v1929_v41 = vld [vmem:[#allocation10 + $0x458] sm:$0xff] }
 0x1b2   :  { %2662 = vmatpush1.bf16.msra.mxu1 %v2661_v1  ;;  %2756 = vmatpush3.bf16.msra.mxu0 %v2755_v24  ;;  %v1896_v1 = vld [vmem:[#allocation10 + $0x350] sm:$0xff]  ;;  %v2689_v24 = vpack.c.bf16 %v1889_v40, %v1886_v3  ;;  %v1923_v2 = vld [vmem:[#allocation10 + $0x428] sm:$0xff]  ;;  %v2715_v57 = vpack.c.bf16 %v1932_v13, %v1929_v41 }
 0x1b3   :  { %2664 = vmatprep.subr.bf16.mxu1 %v2663_v23  ;;  %2757 = vmatprep.subr.bf16.mxu0 %v4326_v12  ;;  %v2691_v4 = vpack.c.bf16 %v1896_v1, %v1893_v35  ;;  %v1892_v23 = vld [vmem:[#allocation10 + $0x330] sm:$0xff] }
 0x1b6   :  { %2666 = vmatpush1.bf16.msra.mxu1 %v2665_v0  ;;  %2759 = vmatpush3.bf16.msra.mxu0 %v2758_v33  ;;  %v1901_v0 = vld [vmem:[#allocation10 + $0x378] sm:$0xff] }
 0x1b7   :  { %2668 = vmatprep.subr.bf16.mxu1 %v2667_v15  ;;  %2760 = vmatprep.subr.bf16.mxu0 %v4326_v12  ;;  %v1905_v33 = vld [vmem:[#allocation10 + $0x398] sm:$0xff]  ;;  %v2697_v15 = vpack.c.bf16 %v1901_v0, %v1898_v9 }
 0x1b8   :  { %v2699_v48 = vpack.c.bf16 %v1908_v29, %v1905_v33 }
 0x1ba   :  { %2670 = vmatpush1.bf16.msra.mxu1 %v2669_v59  ;;  %2762 = vmatpush3.bf16.msra.mxu0 %v2761_v7  ;;  %v1910_v7 = vld [vmem:[#allocation10 + $0x3c0] sm:$0xff] }
 0x1bb   :  { %2672 = vmatprep.subr.bf16.mxu1 %v2671_v60  ;;  %2763 = vmatprep.subr.bf16.mxu0 %v4326_v12  ;;  %v1920_v60 = vld [vmem:[#allocation10 + $0x410] sm:$0xff] }
 0x1bc   :  { %v2707_v5 = vpack.c.bf16 %v1920_v60, %v1917_v46 }
 0x1be   :  { %2674 = vmatpush1.bf16.msra.mxu1 %v2673_v22  ;;  %2765 = vmatpush3.bf16.msra.mxu0 %v2764_v44  ;;  %v1926_v22 = vld [vmem:[#allocation10 + $0x440] sm:$0xff]  ;;  %v2709_v44 = vpack.c.bf16 %v1919_v63, %v1916_v38 }
 0x1bf   :  { %2676 = vmatprep.subr.bf16.mxu1 %v2675_v31  ;;  %2766 = vmatprep.subr.bf16.mxu0 %v4326_v12  ;;  %v2711_v30 = vpack.c.bf16 %v1926_v22, %v1923_v2  ;;  %v1922_v31 = vld [vmem:[#allocation10 + $0x420] sm:$0xff] }
 0x1c0   :  { %v2713_v21 = vpack.c.bf16 %v1925_v32, %v1922_v31 }
 0x1c2   :  { %2678 = vmatpush1.bf16.msra.mxu1 %v2677_v53  ;;  %2768 = vmatpush3.bf16.msra.mxu0 %v2767_v39  ;;  %v1928_v53 = vld [vmem:[#allocation10 + $0x450] sm:$0xff]  ;;  %v1931_v39 = vld [vmem:[#allocation10 + $0x468] sm:$0xff] }
 0x1c3   :  { %2680 = vmatprep.subr.bf16.mxu1 %v2679_v11  ;;  %2769 = vmatprep.subr.bf16.mxu0 %v4326_v12  ;;  %v2717_v34 = vpack.c.bf16 %v1931_v39, %v1928_v53 }
 0x1c6   :  { %2682 = vmatpush1.bf16.msra.mxu1 %v2681_v61  ;;  %2771 = vmatpush3.bf16.msra.mxu0 %v2770_v20  ;;  %v1457_v61 = vld [vmem:[%s4149_s5] sm:$0x7]  ;;  %v1461_v20 = vsub.s32 0, %v1460_v37  ;;  %s2272_s5 = sshll.u32 %s2979_s24, 4  ;;  %s2273_s5 = int_to_ptr.vmem [resolvable:$true] %s2272_s5 }
 0x1c7   :  { %2684 = vmatprep.subr.bf16.mxu1 %v2683_v8  ;;  %2772 = vmatprep.subr.bf16.mxu0 %v4326_v12  ;;  %v2693_v12 = vpack.c.bf16 %v1895_v6, %v1892_v23  ;;  %v1774_v8 = vunpack.c.l.s4 %v2978_v50  ;;  %v1470_v16 = vrot.slane %v1457_v61, %v1469_v28  ;;  %v1466_v18 = vrot.slane %v1457_v61, %v1465_v43  ;;  %s2913_s25 = scalar_lea.vmem %s2273_s5, 96  ;;  %p2918_p13 = scmp.lt.s32.totalorder %s2273_s5, %s2273_s5 }
 0x1c8   :  { %v1462_v19 = vrot.slane %v1457_v61, %v1461_v20  ;;  %p2914_p12 = scmp.ne.s32.totalorder %s2273_s5, %s2913_s25  ;;  %p2919_p0 = scmp.lt.s32.totalorder %s2913_s25, %s2913_s25 }
 0x1c9   :  { %v1775_v26 = vunpack.c.0.s8 %v1774_v8 }
 0x1ca   :  { %2686 = vmatpush1.bf16.msra.mxu1 %v2685_v25  ;;  %2774 = vmatpush3.bf16.msra.mxu0 %v2773_v62  ;;  %p2920_p1 = por %p2919_p0, %p2918_p13 }
 0x1cb   :  { %2688 = vmatprep.subr.bf16.mxu1 %v2687_v58  ;;  %v1778_v1 = vsub.s32 %v1775_v26, %v1460_v37 }
 0x1cc   :  { %p2921_p2 = pnand %p2920_p1, %p2914_p12 }
 0x1cd   :  { %2028 = vmatmul.mubr.f32.vlgmr.msra.gmra.mrb[4].mxu1 %v4092_v27  ;;  %2469 = vmatmul.mubr.f32.vlgmr.msra.gmra.mrb[4].mxu0 %v4097_v56  ;;  %v1914_v27 = vld [vmem:[#allocation10 + $0x3e0] sm:$0xff] }
 0x1ce   :  { %2690 = vmatpush1.bf16.msra.mxu1 %v2689_v24  ;;  %2098 = vmatprep.mubr.f32.mxu1 %v2976_v49  ;;  %v2703_v59 = vpack.c.bf16 %v1914_v27, %v1911_v36  ;;  %v1913_v49 = vld [vmem:[#allocation10 + $0x3d8] sm:$0xff] }
 0x1cf   :  { %2692 = vmatprep.subr.bf16.mxu1 %v2691_v4  ;;  %v2705_v54 = vpack.c.bf16 %v1913_v49, %v1910_v7 }
 0x1d2   :  { %2694 = vmatpush1.bf16.msra.mxu1 %v2693_v12 }
 0x1d3   :  { %2696 = vmatprep.subr.bf16.mxu1 %v2695_v52 }
 0x1d6   :  { %2698 = vmatpush1.bf16.msra.mxu1 %v2697_v15 }
 0x1d7   :  { %2700 = vmatprep.subr.bf16.mxu1 %v2699_v48 }
 0x1da   :  { %2702 = vmatpush1.bf16.msra.mxu1 %v2701_v42 }
 0x1db   :  { %2704 = vmatprep.subr.bf16.mxu1 %v2703_v59 }
 0x1de   :  { %2706 = vmatpush1.bf16.msra.mxu1 %v2705_v54 }
 0x1df   :  { %2708 = vmatprep.subr.bf16.mxu1 %v2707_v5 }
 0x1e2   :  { %2710 = vmatpush1.bf16.msra.mxu1 %v2709_v44 }
 0x1e3   :  { %2712 = vmatprep.subr.bf16.mxu1 %v2711_v30 }
 0x1e6   :  { %2714 = vmatpush1.bf16.msra.mxu1 %v2713_v21 }
 0x1e7   :  { %2716 = vmatprep.subr.bf16.mxu1 %v2715_v57 }
 0x1ea   :  { %2718 = vmatpush1.bf16.msra.mxu1 %v2717_v34 }
 0x1ed   :  { %2099 = vmatmul.mubr.f32.vlgmr.msra.gmra.mrb[4].mxu1 %v4097_v56 }
 0x220   :  { %v2329_v11 = vpop.f32.mrb[0].mxu1 }
 0x221   :  { %v2330_v45 = vpop.f32.mrb[1].mxu1 }
 0x222   :  { %v2331_v47 = vadd.f32 %v2330_v45, %v2329_v11 }
 0x224   :  { %v1696_v25 = vadd.f32 %v2331_v47, %v1470_v16 }
 0x260   :  { %v1624_v56 = vpop.f32.mrb[0].mxu0  ;;  %v1765_v62 = vpop.f32.mrb[2].mxu1 }
 0x261   :  { %v2775_v58 = vadd.f32 %v1624_v56, %v1462_v19  ;;  %v1766_v3 = vadd.f32 %v1765_v62, %v1696_v25  ;;  %v1626_v40 = vpop.f32.mrb[1].mxu0  ;;  %v2435_v35 = vpop.f32.mrb[3].mxu1 }
 0x262   :  { %v2776_v24 = vadd.f32 %v1626_v40, %v1466_v18 }
 0x263   :  { %v1786_v23 = vrot.slane %v1766_v3, %v1778_v1 }
 0x264   :  { %v1772_v4 = vcombine.low %v2775_v58, %v2776_v24 }
 0x266   :  { %v1779_v6 = vrot.slane %v1772_v4, %v1778_v1 }
 0x268   :  { %v1787_v17 = vcombine.low %v1779_v6, %v1786_v23 }
 0x26a   :  { %1789 = vst [vmem:[#allocation11] sm:$0x3f] %v1787_v17 }
 0x26b   :  { %2924 = shalt.err (!%p2921_p2)
}
 0x26c   :  { %s2925_s12 = scalar_lea.hbm %s4152_s8, 96 }
 0x26d   :  { %p2926_p3 = scmp.ne.s32.totalorder %s4152_s8, %s2925_s12  ;;  %p2929_p4 = scmp.lt.u32.totalorder %s2925_s12, %s4152_s8 }
 0x26f   :  { %p2931_p5 = pnand %p2929_p4, %p2926_p3 }
 0x271   :  { %2934 = shalt.err (!%p2931_p5)
}
 0x272   :  { %2275 = dma.vmem_to_hbm [thread:$0]  %s2273_s5, 96, %s4152_s8, [#allocation4]   ;;  %v1934_v14 = vld [vmem:[%s4151_s7] sm:$0x7] }
 0x273   :  { %v1947_v52 = vrot.slane %v1934_v14, %v1469_v28  ;;  %v1939_v55 = vrot.slane %v1934_v14, %v1461_v20  ;;  %v1943_v10 = vrot.slane %v1934_v14, %v1465_v43  ;;  %s2980_s8 = smov [#allocation12]  }
 0x274   :  { %s2282_s22 = sshll.u32 %s2980_s8, 4  ;;  %s2283_s22 = int_to_ptr.vmem [resolvable:$true] %s2282_s22 }
 0x275   :  { %s2935_s7 = scalar_lea.vmem %s2283_s22, 96  ;;  %p2940_p7 = scmp.lt.s32.totalorder %s2283_s22, %s2283_s22 }
 0x276   :  { %p2936_p6 = scmp.ne.s32.totalorder %s2283_s22, %s2935_s7  ;;  %p2941_p8 = scmp.lt.s32.totalorder %s2935_s7, %s2935_s7 }
 0x278   :  { %p2942_p9 = por %p2941_p8, %p2940_p7 }
 0x27a   :  { %p2943_p10 = pnand %p2942_p9, %p2936_p6 }
 0x280   :  { %v2381_v12 = vpop.f32.mrb[2].mxu0 }
 0x281   :  { %v2382_v9 = vpop.f32.mrb[3].mxu0 }
 0x282   :  { %v2383_v0 = vadd.f32 %v2382_v9, %v2381_v12 }
 0x284   :  { %v2172_v33 = vadd.f32 %v2383_v0, %v1947_v52 }
 0x2a0   :  { %v2241_v29 = vpop.f32.mrb[4].mxu0 }
 0x2a1   :  { %v2242_v15 = vadd.f32 %v2241_v29, %v2172_v33  ;;  %v2470_v48 = vpop.f32.mrb[5].mxu0 }
 0x2a3   :  { %v2262_v49 = vrot.slane %v2242_v15, %v1778_v1 }
 0x2c0   :  { %v2100_v36 = vpop.f32.mrb[4].mxu1 }
 0x2c1   :  { %v2777_v27 = vadd.f32 %v2100_v36, %v1939_v55  ;;  %v2102_v42 = vpop.f32.mrb[5].mxu1 }
 0x2c2   :  { %v2778_v59 = vadd.f32 %v2102_v42, %v1943_v10 }
 0x2c4   :  { %v2248_v7 = vcombine.low %v2777_v27, %v2778_v59 }
 0x2c6   :  { %v2255_v46 = vrot.slane %v2248_v7, %v1778_v1 }
 0x2c8   :  { %v2263_v60 = vcombine.low %v2255_v46, %v2262_v49 }
 0x2ca   :  { %2265 = vst [vmem:[#allocation12] sm:$0x3f] %v2263_v60 }
 0x2cb   :  { %2946 = shalt.err (!%p2943_p10)
}
 0x2cc   :  { %s2947_s1 = scalar_lea.hbm %s4153_s9, 96 }
 0x2cd   :  { %p2948_p11 = scmp.ne.s32.totalorder %s4153_s9, %s2947_s1  ;;  %p2951_p12 = scmp.lt.u32.totalorder %s2947_s1, %s4153_s9 }
 0x2cf   :  { %p2953_p13 = pnand %p2951_p12, %p2948_p11 }
 0x2d1   :  { %2956 = shalt.err (!%p2953_p13)
}
 0x2d2   :  { %2285 = dma.vmem_to_hbm [thread:$0]  %s2283_s22, 96, %s4153_s9, [#allocation13]  }
 0x2d3   :  { %2963 = dma.done.wait [#allocation4], 96  }
 0x2d4   :  { %2964 = vsyncadd [#allocation4], 4294967200 }
 0x2d5   :  { %2965 = dma.done.wait [#allocation13], 96  }
 0x2d6   :  { %2966 = vsyncadd [#allocation13], 4294967200 }
 0x2d7   :  { %2292 = vsyncpa [#allocation3], 1 }
 0x2d8   :  { %2293 = vsyncpa [#allocation6], 1 }
 0x2d9   :  { %2294 = vsyncpa [#allocation9], 1 }
 0x2da   :  { %2295 = vsyncpa [#allocation4], 1 }
 0x2db   :  { %2296 = vsyncpa [#allocation13], 1 }

</bundles_post_ra>
